<compile_context>
chip_gen: v6e
topology: v6e:2x2x1
jax: 0.10.0
libtpu: 0.0.40
codegen_flags: <defaults>
</compile_context>

<pallas_src>
import jax
import jax.numpy as jnp
from jax import lax
from jax.experimental import pallas as pl
from jax.experimental.pallas import tpu as pltpu


def actor_kernel(x_ref, w1_ref, b1_ref, w2_ref, b2_ref, out_ref):
    # x_ref : (BT, N*S)  BT decisions, each with N candidate state rows of S.
    # w1_ref: (H, S), b1_ref: (H, 1), w2_ref: (1, H)   (PyTorch Linear layout)
    # b2_ref: (1, 1) scalar in SMEM
    # out_ref: (N, BT)   candidate rows x decision lanes (lane-dense store)
    n_cand = out_ref.shape[0]
    s_size = w1_ref.shape[1]
    b2 = b2_ref[0, 0]
    # Contract w1 (H, S) with the state slice in its native (BT, S) layout.
    dn = (((1,), (1,)), ((), ()))

    logits = []
    for n in range(n_cand):                                   # N is small & static
        x_n = x_ref[:, n * s_size:(n + 1) * s_size]           # (BT, S)
        h = lax.dot_general(w1_ref[...], x_n, dimension_numbers=dn,
                            preferred_element_type=jnp.float32)   # (H, BT)
        h = jnp.maximum(h + b1_ref[...], 0.0)                  # fc1 bias + ReLU
        l_n = jnp.dot(w2_ref[...], h,
                      preferred_element_type=jnp.float32) + b2  # (1, BT)
        logits.append(l_n)

    # Per-decision softmax across the N candidate rows (exact per-group max,
    # decisions stay on the lane axis throughout).
    m = logits[0]
    for n in range(1, n_cand):
        m = jnp.maximum(m, logits[n])
    exps = [jnp.exp(l - m) for l in logits]
    denom = exps[0]
    for n in range(1, n_cand):
        denom = denom + exps[n]
    # approx=False keeps the tight 1e-5 tolerance; switch to approx=True (EUP
    # vrcp, free slot) if the tolerance is relaxed.
    inv = pl.reciprocal(denom, approx=False)
    for n in range(n_cand):
        out_ref[pl.ds(n, 1), :] = exps[n] * inv


def actor_forward(states, w1, b1, w2, b2, *, block_b=128):
    """states: (B, N, S) batch of B independent decisions (each softmaxed over
    its N candidates), or a single (N, S) decision like the PyTorch module.
    Returns (B, N) probabilities, or (1, N) for a single decision."""
    single = states.ndim == 2
    if single:
        states = states[None]
    B, N, S = states.shape
    H = w1.shape[0]
    BT = block_b                                   # lane tile: multiple of 128
    B_pad = ((B + BT - 1) // BT) * BT
    x = states.reshape(B, N * S)                   # free view, no transpose
    if B_pad != B:
        x = jnp.pad(x, ((0, B_pad - B), (0, 0)))   # dummy decisions, sliced off

    out = pl.pallas_call(
        actor_kernel,
        out_shape=jax.ShapeDtypeStruct((N, B_pad), jnp.float32),
        grid=(B_pad // BT,),
        in_specs=[
            pl.BlockSpec((BT, N * S), lambda i: (i, 0)),          # decision tile
            pl.BlockSpec((H, S), lambda i: (0, 0)),               # VMEM-resident
            pl.BlockSpec((H, 1), lambda i: (0, 0)),               # weights: fetched
            pl.BlockSpec((1, H), lambda i: (0, 0)),               # once, revisited
            pl.BlockSpec(memory_space=pltpu.MemorySpace.SMEM),    # scalar b2
        ],
        out_specs=pl.BlockSpec((N, BT), lambda i: (0, i)),        # lane-dense block
        compiler_params=pltpu.CompilerParams(
            dimension_semantics=("parallel",)),                   # v7x: 2 TCs
    )(x, w1, b1, w2, b2.reshape(1, 1))

    probs = out[:, :B].T                            # (B, N)
    if single:
        probs = probs[:1]                           # (1, N), like the torch module
    return probs


def init_params(key, state_size, hidden=256):
    # PyTorch nn.Linear-style U(-1/sqrt(fan_in), 1/sqrt(fan_in)), PyTorch layout.
    k1, k2, k3, k4 = jax.random.split(key, 4)
    lim1 = 1.0 / jnp.sqrt(jnp.float32(state_size))
    lim2 = 1.0 / jnp.sqrt(jnp.float32(hidden))
    w1 = jax.random.uniform(k1, (hidden, state_size), jnp.float32, -lim1, lim1)
    b1 = jax.random.uniform(k2, (hidden, 1), jnp.float32, -lim1, lim1)
    w2 = jax.random.uniform(k3, (1, hidden), jnp.float32, -lim2, lim2)
    b2 = jax.random.uniform(k4, (1,), jnp.float32, -lim2, lim2)
    return w1, b1, w2, b2


def reference_forward(states, w1, b1, w2, b2):
    # states: (B, N, S); softmax over the N candidates of each decision
    # (== dim=0 softmax of the original single-decision module).
    h = jnp.maximum(jnp.einsum("bns,hs->bnh", states, w1) + b1[:, 0], 0.0)
    logits = jnp.einsum("bnh,oh->bno", h, w2)[..., 0] + b2[0]
    return jax.nn.softmax(logits, axis=-1)


if __name__ == "__main__":
    key = jax.random.PRNGKey(0)
    B, N, STATE_SIZE = 256, 8, 32

    kx, kp = jax.random.split(key)
    states = jax.random.normal(kx, (B, N, STATE_SIZE), jnp.float32)
    w1, b1, w2, b2 = init_params(kp, STATE_SIZE)

    probs = actor_forward(states, w1, b1, w2, b2)
    probs = jax.block_until_ready(probs)

    ref = reference_forward(states, w1, b1, w2, b2)
    assert probs.shape == (B, N)
    assert jnp.allclose(probs, ref, atol=1e-5, rtol=1e-5)
    assert jnp.allclose(jnp.sum(probs, axis=-1), jnp.ones((B,)), atol=1e-5)

    # Single-decision path: the original module's exact (N, S) -> (1, N) shape
    # (exercises the padding path of the batched kernel).
    single = actor_forward(states[0], w1, b1, w2, b2)
    single = jax.block_until_ready(single)
    assert single.shape == (1, N)
    assert jnp.allclose(single, ref[0:1], atol=1e-5, rtol=1e-5)

    # TODO(synk): torch.distributions.Categorical (sampling / log_prob) is
    # host-side glue, not part of the tensor forward; the kernel returns probs.
    print("KERNEL_OK")
</pallas_src>

<mosaic_0001>
module attributes {stable_mosaic.version = 11 : i64} {
  func.func @actor_kernel(%arg0: i32, %arg1: memref<128x256xf32, #tpu.memory_space<vmem>>, %arg2: memref<256x32xf32, #tpu.memory_space<vmem>>, %arg3: memref<256x1xf32, #tpu.memory_space<vmem>>, %arg4: memref<1x256xf32, #tpu.memory_space<vmem>>, %arg5: memref<1x1xf32, #tpu.memory_space<smem>>, %arg6: memref<8x128xf32, #tpu.memory_space<vmem>>) attributes {dimension_semantics = [#tpu.dimension_semantics<parallel>], iteration_bounds = array<i64: 2>, scalar_prefetch = 0 : i64, scratch_operands = 0 : i64, tpu.core_type = #tpu.core_type<tc>, window_params = [{transform_indices = @transform_0, window_bounds = array<i64: 128, 256>}, {pipeline_mode = #tpu.pipeline_mode<synchronous>, transform_indices = @transform_1, window_bounds = array<i64: 256, 32>}, {pipeline_mode = #tpu.pipeline_mode<synchronous>, transform_indices = @transform_2, window_bounds = array<i64: 256, 1>}, {pipeline_mode = #tpu.pipeline_mode<synchronous>, transform_indices = @transform_3, window_bounds = array<i64: 1, 256>}, {transform_indices = @transform_4, window_bounds = array<i64: 1, 1>}, {transform_indices = @transform_5, window_bounds = array<i64: 8, 128>}]} {
    %c0 = arith.constant 0 : index
    %c0_0 = arith.constant 0 : index
    %0 = memref.load %arg5[%c0, %c0_0] : memref<1x1xf32, #tpu.memory_space<smem>>
    %c0_1 = arith.constant 0 : index
    %c0_2 = arith.constant 0 : index
    %1 = vector.load %arg1[%c0_1, %c0_2] : memref<128x256xf32, #tpu.memory_space<vmem>>, vector<128x32xf32>
    %c0_3 = arith.constant 0 : index
    %c0_4 = arith.constant 0 : index
    %2 = vector.load %arg2[%c0_3, %c0_4] : memref<256x32xf32, #tpu.memory_space<vmem>>, vector<256x32xf32>
    %cst = arith.constant dense<0.000000e+00> : vector<256x128xf32>
    %3 = tpu.matmul %2, %1, %cst {dimension_numbers = #tpu.dot_dimension_numbers<[1], [1], [0], [0], [0, 0, 1, 0], [], []>} : vector<256x32xf32>, vector<128x32xf32>, vector<256x128xf32> -> vector<256x128xf32>
    %c0_5 = arith.constant 0 : index
    %c0_6 = arith.constant 0 : index
    %4 = vector.load %arg3[%c0_5, %c0_6] : memref<256x1xf32, #tpu.memory_space<vmem>>, vector<256x1xf32>
    %5 = vector.broadcast %4 : vector<256x1xf32> to vector<256x128xf32>
    %6 = arith.addf %3, %5 : vector<256x128xf32>
    %cst_7 = arith.constant 0.000000e+00 : f32
    %7 = vector.broadcast %cst_7 : f32 to vector<256x128xf32>
    %8 = arith.maximumf %6, %7 : vector<256x128xf32>
    %c0_8 = arith.constant 0 : index
    %c0_9 = arith.constant 0 : index
    %9 = vector.load %arg4[%c0_8, %c0_9] : memref<1x256xf32, #tpu.memory_space<vmem>>, vector<1x256xf32>
    %cst_10 = arith.constant dense<0.000000e+00> : vector<1x128xf32>
    %10 = tpu.matmul %9, %8, %cst_10 {dimension_numbers = #tpu.dot_dimension_numbers<[1], [0], [0], [1], [0, 0, 1, 1], [], []>} : vector<1x256xf32>, vector<256x128xf32>, vector<1x128xf32> -> vector<1x128xf32>
    %11 = vector.broadcast %0 : f32 to vector<1x128xf32>
    %12 = arith.addf %10, %11 : vector<1x128xf32>
    %c0_11 = arith.constant 0 : index
    %c32 = arith.constant 32 : index
    %13 = vector.load %arg1[%c0_11, %c32] : memref<128x256xf32, #tpu.memory_space<vmem>>, vector<128x32xf32>
    %c0_12 = arith.constant 0 : index
    %c0_13 = arith.constant 0 : index
    %14 = vector.load %arg2[%c0_12, %c0_13] : memref<256x32xf32, #tpu.memory_space<vmem>>, vector<256x32xf32>
    %cst_14 = arith.constant dense<0.000000e+00> : vector<256x128xf32>
    %15 = tpu.matmul %14, %13, %cst_14 {dimension_numbers = #tpu.dot_dimension_numbers<[1], [1], [0], [0], [0, 0, 1, 0], [], []>} : vector<256x32xf32>, vector<128x32xf32>, vector<256x128xf32> -> vector<256x128xf32>
    %c0_15 = arith.constant 0 : index
    %c0_16 = arith.constant 0 : index
    %16 = vector.load %arg3[%c0_15, %c0_16] : memref<256x1xf32, #tpu.memory_space<vmem>>, vector<256x1xf32>
    %17 = vector.broadcast %16 : vector<256x1xf32> to vector<256x128xf32>
    %18 = arith.addf %15, %17 : vector<256x128xf32>
    %cst_17 = arith.constant 0.000000e+00 : f32
    %19 = vector.broadcast %cst_17 : f32 to vector<256x128xf32>
    %20 = arith.maximumf %18, %19 : vector<256x128xf32>
    %c0_18 = arith.constant 0 : index
    %c0_19 = arith.constant 0 : index
    %21 = vector.load %arg4[%c0_18, %c0_19] : memref<1x256xf32, #tpu.memory_space<vmem>>, vector<1x256xf32>
    %cst_20 = arith.constant dense<0.000000e+00> : vector<1x128xf32>
    %22 = tpu.matmul %21, %20, %cst_20 {dimension_numbers = #tpu.dot_dimension_numbers<[1], [0], [0], [1], [0, 0, 1, 1], [], []>} : vector<1x256xf32>, vector<256x128xf32>, vector<1x128xf32> -> vector<1x128xf32>
    %23 = vector.broadcast %0 : f32 to vector<1x128xf32>
    %24 = arith.addf %22, %23 : vector<1x128xf32>
    %c0_21 = arith.constant 0 : index
    %c64 = arith.constant 64 : index
    %25 = vector.load %arg1[%c0_21, %c64] : memref<128x256xf32, #tpu.memory_space<vmem>>, vector<128x32xf32>
    %c0_22 = arith.constant 0 : index
    %c0_23 = arith.constant 0 : index
    %26 = vector.load %arg2[%c0_22, %c0_23] : memref<256x32xf32, #tpu.memory_space<vmem>>, vector<256x32xf32>
    %cst_24 = arith.constant dense<0.000000e+00> : vector<256x128xf32>
    %27 = tpu.matmul %26, %25, %cst_24 {dimension_numbers = #tpu.dot_dimension_numbers<[1], [1], [0], [0], [0, 0, 1, 0], [], []>} : vector<256x32xf32>, vector<128x32xf32>, vector<256x128xf32> -> vector<256x128xf32>
    %c0_25 = arith.constant 0 : index
    %c0_26 = arith.constant 0 : index
    %28 = vector.load %arg3[%c0_25, %c0_26] : memref<256x1xf32, #tpu.memory_space<vmem>>, vector<256x1xf32>
    %29 = vector.broadcast %28 : vector<256x1xf32> to vector<256x128xf32>
    %30 = arith.addf %27, %29 : vector<256x128xf32>
    %cst_27 = arith.constant 0.000000e+00 : f32
    %31 = vector.broadcast %cst_27 : f32 to vector<256x128xf32>
    %32 = arith.maximumf %30, %31 : vector<256x128xf32>
    %c0_28 = arith.constant 0 : index
    %c0_29 = arith.constant 0 : index
    %33 = vector.load %arg4[%c0_28, %c0_29] : memref<1x256xf32, #tpu.memory_space<vmem>>, vector<1x256xf32>
    %cst_30 = arith.constant dense<0.000000e+00> : vector<1x128xf32>
    %34 = tpu.matmul %33, %32, %cst_30 {dimension_numbers = #tpu.dot_dimension_numbers<[1], [0], [0], [1], [0, 0, 1, 1], [], []>} : vector<1x256xf32>, vector<256x128xf32>, vector<1x128xf32> -> vector<1x128xf32>
    %35 = vector.broadcast %0 : f32 to vector<1x128xf32>
    %36 = arith.addf %34, %35 : vector<1x128xf32>
    %c0_31 = arith.constant 0 : index
    %c96 = arith.constant 96 : index
    %37 = vector.load %arg1[%c0_31, %c96] : memref<128x256xf32, #tpu.memory_space<vmem>>, vector<128x32xf32>
    %c0_32 = arith.constant 0 : index
    %c0_33 = arith.constant 0 : index
    %38 = vector.load %arg2[%c0_32, %c0_33] : memref<256x32xf32, #tpu.memory_space<vmem>>, vector<256x32xf32>
    %cst_34 = arith.constant dense<0.000000e+00> : vector<256x128xf32>
    %39 = tpu.matmul %38, %37, %cst_34 {dimension_numbers = #tpu.dot_dimension_numbers<[1], [1], [0], [0], [0, 0, 1, 0], [], []>} : vector<256x32xf32>, vector<128x32xf32>, vector<256x128xf32> -> vector<256x128xf32>
    %c0_35 = arith.constant 0 : index
    %c0_36 = arith.constant 0 : index
    %40 = vector.load %arg3[%c0_35, %c0_36] : memref<256x1xf32, #tpu.memory_space<vmem>>, vector<256x1xf32>
    %41 = vector.broadcast %40 : vector<256x1xf32> to vector<256x128xf32>
    %42 = arith.addf %39, %41 : vector<256x128xf32>
    %cst_37 = arith.constant 0.000000e+00 : f32
    %43 = vector.broadcast %cst_37 : f32 to vector<256x128xf32>
    %44 = arith.maximumf %42, %43 : vector<256x128xf32>
    %c0_38 = arith.constant 0 : index
    %c0_39 = arith.constant 0 : index
    %45 = vector.load %arg4[%c0_38, %c0_39] : memref<1x256xf32, #tpu.memory_space<vmem>>, vector<1x256xf32>
    %cst_40 = arith.constant dense<0.000000e+00> : vector<1x128xf32>
    %46 = tpu.matmul %45, %44, %cst_40 {dimension_numbers = #tpu.dot_dimension_numbers<[1], [0], [0], [1], [0, 0, 1, 1], [], []>} : vector<1x256xf32>, vector<256x128xf32>, vector<1x128xf32> -> vector<1x128xf32>
    %47 = vector.broadcast %0 : f32 to vector<1x128xf32>
    %48 = arith.addf %46, %47 : vector<1x128xf32>
    %c0_41 = arith.constant 0 : index
    %c128 = arith.constant 128 : index
    %49 = vector.load %arg1[%c0_41, %c128] : memref<128x256xf32, #tpu.memory_space<vmem>>, vector<128x32xf32>
    %c0_42 = arith.constant 0 : index
    %c0_43 = arith.constant 0 : index
    %50 = vector.load %arg2[%c0_42, %c0_43] : memref<256x32xf32, #tpu.memory_space<vmem>>, vector<256x32xf32>
    %cst_44 = arith.constant dense<0.000000e+00> : vector<256x128xf32>
    %51 = tpu.matmul %50, %49, %cst_44 {dimension_numbers = #tpu.dot_dimension_numbers<[1], [1], [0], [0], [0, 0, 1, 0], [], []>} : vector<256x32xf32>, vector<128x32xf32>, vector<256x128xf32> -> vector<256x128xf32>
    %c0_45 = arith.constant 0 : index
    %c0_46 = arith.constant 0 : index
    %52 = vector.load %arg3[%c0_45, %c0_46] : memref<256x1xf32, #tpu.memory_space<vmem>>, vector<256x1xf32>
    %53 = vector.broadcast %52 : vector<256x1xf32> to vector<256x128xf32>
    %54 = arith.addf %51, %53 : vector<256x128xf32>
    %cst_47 = arith.constant 0.000000e+00 : f32
    %55 = vector.broadcast %cst_47 : f32 to vector<256x128xf32>
    %56 = arith.maximumf %54, %55 : vector<256x128xf32>
    %c0_48 = arith.constant 0 : index
    %c0_49 = arith.constant 0 : index
    %57 = vector.load %arg4[%c0_48, %c0_49] : memref<1x256xf32, #tpu.memory_space<vmem>>, vector<1x256xf32>
    %cst_50 = arith.constant dense<0.000000e+00> : vector<1x128xf32>
    %58 = tpu.matmul %57, %56, %cst_50 {dimension_numbers = #tpu.dot_dimension_numbers<[1], [0], [0], [1], [0, 0, 1, 1], [], []>} : vector<1x256xf32>, vector<256x128xf32>, vector<1x128xf32> -> vector<1x128xf32>
    %59 = vector.broadcast %0 : f32 to vector<1x128xf32>
    %60 = arith.addf %58, %59 : vector<1x128xf32>
    %c0_51 = arith.constant 0 : index
    %c160 = arith.constant 160 : index
    %61 = vector.load %arg1[%c0_51, %c160] : memref<128x256xf32, #tpu.memory_space<vmem>>, vector<128x32xf32>
    %c0_52 = arith.constant 0 : index
    %c0_53 = arith.constant 0 : index
    %62 = vector.load %arg2[%c0_52, %c0_53] : memref<256x32xf32, #tpu.memory_space<vmem>>, vector<256x32xf32>
    %cst_54 = arith.constant dense<0.000000e+00> : vector<256x128xf32>
    %63 = tpu.matmul %62, %61, %cst_54 {dimension_numbers = #tpu.dot_dimension_numbers<[1], [1], [0], [0], [0, 0, 1, 0], [], []>} : vector<256x32xf32>, vector<128x32xf32>, vector<256x128xf32> -> vector<256x128xf32>
    %c0_55 = arith.constant 0 : index
    %c0_56 = arith.constant 0 : index
    %64 = vector.load %arg3[%c0_55, %c0_56] : memref<256x1xf32, #tpu.memory_space<vmem>>, vector<256x1xf32>
    %65 = vector.broadcast %64 : vector<256x1xf32> to vector<256x128xf32>
    %66 = arith.addf %63, %65 : vector<256x128xf32>
    %cst_57 = arith.constant 0.000000e+00 : f32
    %67 = vector.broadcast %cst_57 : f32 to vector<256x128xf32>
    %68 = arith.maximumf %66, %67 : vector<256x128xf32>
    %c0_58 = arith.constant 0 : index
    %c0_59 = arith.constant 0 : index
    %69 = vector.load %arg4[%c0_58, %c0_59] : memref<1x256xf32, #tpu.memory_space<vmem>>, vector<1x256xf32>
    %cst_60 = arith.constant dense<0.000000e+00> : vector<1x128xf32>
    %70 = tpu.matmul %69, %68, %cst_60 {dimension_numbers = #tpu.dot_dimension_numbers<[1], [0], [0], [1], [0, 0, 1, 1], [], []>} : vector<1x256xf32>, vector<256x128xf32>, vector<1x128xf32> -> vector<1x128xf32>
    %71 = vector.broadcast %0 : f32 to vector<1x128xf32>
    %72 = arith.addf %70, %71 : vector<1x128xf32>
    %c0_61 = arith.constant 0 : index
    %c192 = arith.constant 192 : index
    %73 = vector.load %arg1[%c0_61, %c192] : memref<128x256xf32, #tpu.memory_space<vmem>>, vector<128x32xf32>
    %c0_62 = arith.constant 0 : index
    %c0_63 = arith.constant 0 : index
    %74 = vector.load %arg2[%c0_62, %c0_63] : memref<256x32xf32, #tpu.memory_space<vmem>>, vector<256x32xf32>
    %cst_64 = arith.constant dense<0.000000e+00> : vector<256x128xf32>
    %75 = tpu.matmul %74, %73, %cst_64 {dimension_numbers = #tpu.dot_dimension_numbers<[1], [1], [0], [0], [0, 0, 1, 0], [], []>} : vector<256x32xf32>, vector<128x32xf32>, vector<256x128xf32> -> vector<256x128xf32>
    %c0_65 = arith.constant 0 : index
    %c0_66 = arith.constant 0 : index
    %76 = vector.load %arg3[%c0_65, %c0_66] : memref<256x1xf32, #tpu.memory_space<vmem>>, vector<256x1xf32>
    %77 = vector.broadcast %76 : vector<256x1xf32> to vector<256x128xf32>
    %78 = arith.addf %75, %77 : vector<256x128xf32>
    %cst_67 = arith.constant 0.000000e+00 : f32
    %79 = vector.broadcast %cst_67 : f32 to vector<256x128xf32>
    %80 = arith.maximumf %78, %79 : vector<256x128xf32>
    %c0_68 = arith.constant 0 : index
    %c0_69 = arith.constant 0 : index
    %81 = vector.load %arg4[%c0_68, %c0_69] : memref<1x256xf32, #tpu.memory_space<vmem>>, vector<1x256xf32>
    %cst_70 = arith.constant dense<0.000000e+00> : vector<1x128xf32>
    %82 = tpu.matmul %81, %80, %cst_70 {dimension_numbers = #tpu.dot_dimension_numbers<[1], [0], [0], [1], [0, 0, 1, 1], [], []>} : vector<1x256xf32>, vector<256x128xf32>, vector<1x128xf32> -> vector<1x128xf32>
    %83 = vector.broadcast %0 : f32 to vector<1x128xf32>
    %84 = arith.addf %82, %83 : vector<1x128xf32>
    %c0_71 = arith.constant 0 : index
    %c224 = arith.constant 224 : index
    %85 = vector.load %arg1[%c0_71, %c224] : memref<128x256xf32, #tpu.memory_space<vmem>>, vector<128x32xf32>
    %c0_72 = arith.constant 0 : index
    %c0_73 = arith.constant 0 : index
    %86 = vector.load %arg2[%c0_72, %c0_73] : memref<256x32xf32, #tpu.memory_space<vmem>>, vector<256x32xf32>
    %cst_74 = arith.constant dense<0.000000e+00> : vector<256x128xf32>
    %87 = tpu.matmul %86, %85, %cst_74 {dimension_numbers = #tpu.dot_dimension_numbers<[1], [1], [0], [0], [0, 0, 1, 0], [], []>} : vector<256x32xf32>, vector<128x32xf32>, vector<256x128xf32> -> vector<256x128xf32>
    %c0_75 = arith.constant 0 : index
    %c0_76 = arith.constant 0 : index
    %88 = vector.load %arg3[%c0_75, %c0_76] : memref<256x1xf32, #tpu.memory_space<vmem>>, vector<256x1xf32>
    %89 = vector.broadcast %88 : vector<256x1xf32> to vector<256x128xf32>
    %90 = arith.addf %87, %89 : vector<256x128xf32>
    %cst_77 = arith.constant 0.000000e+00 : f32
    %91 = vector.broadcast %cst_77 : f32 to vector<256x128xf32>
    %92 = arith.maximumf %90, %91 : vector<256x128xf32>
    %c0_78 = arith.constant 0 : index
    %c0_79 = arith.constant 0 : index
    %93 = vector.load %arg4[%c0_78, %c0_79] : memref<1x256xf32, #tpu.memory_space<vmem>>, vector<1x256xf32>
    %cst_80 = arith.constant dense<0.000000e+00> : vector<1x128xf32>
    %94 = tpu.matmul %93, %92, %cst_80 {dimension_numbers = #tpu.dot_dimension_numbers<[1], [0], [0], [1], [0, 0, 1, 1], [], []>} : vector<1x256xf32>, vector<256x128xf32>, vector<1x128xf32> -> vector<1x128xf32>
    %95 = vector.broadcast %0 : f32 to vector<1x128xf32>
    %96 = arith.addf %94, %95 : vector<1x128xf32>
    %97 = arith.maximumf %12, %24 : vector<1x128xf32>
    %98 = arith.maximumf %97, %36 : vector<1x128xf32>
    %99 = arith.maximumf %98, %48 : vector<1x128xf32>
    %100 = arith.maximumf %99, %60 : vector<1x128xf32>
    %101 = arith.maximumf %100, %72 : vector<1x128xf32>
    %102 = arith.maximumf %101, %84 : vector<1x128xf32>
    %103 = arith.maximumf %102, %96 : vector<1x128xf32>
    %104 = arith.subf %12, %103 : vector<1x128xf32>
    %105 = math.exp %104 : vector<1x128xf32>
    %106 = arith.subf %24, %103 : vector<1x128xf32>
    %107 = math.exp %106 : vector<1x128xf32>
    %108 = arith.subf %36, %103 : vector<1x128xf32>
    %109 = math.exp %108 : vector<1x128xf32>
    %110 = arith.subf %48, %103 : vector<1x128xf32>
    %111 = math.exp %110 : vector<1x128xf32>
    %112 = arith.subf %60, %103 : vector<1x128xf32>
    %113 = math.exp %112 : vector<1x128xf32>
    %114 = arith.subf %72, %103 : vector<1x128xf32>
    %115 = math.exp %114 : vector<1x128xf32>
    %116 = arith.subf %84, %103 : vector<1x128xf32>
    %117 = math.exp %116 : vector<1x128xf32>
    %118 = arith.subf %96, %103 : vector<1x128xf32>
    %119 = math.exp %118 : vector<1x128xf32>
    %120 = arith.addf %105, %107 : vector<1x128xf32>
    %121 = arith.addf %120, %109 : vector<1x128xf32>
    %122 = arith.addf %121, %111 : vector<1x128xf32>
    %123 = arith.addf %122, %113 : vector<1x128xf32>
    %124 = arith.addf %123, %115 : vector<1x128xf32>
    %125 = arith.addf %124, %117 : vector<1x128xf32>
    %126 = arith.addf %125, %119 : vector<1x128xf32>
    %127 = tpu.reciprocal %126 : vector<1x128xf32> -> vector<1x128xf32>
    %128 = arith.mulf %105, %127 : vector<1x128xf32>
    %c0_81 = arith.constant 0 : index
    %c0_82 = arith.constant 0 : index
    %129 = vector.load %arg6[%c0_81, %c0_82] : memref<8x128xf32, #tpu.memory_space<vmem>>, vector<1x128xf32>
    tpu.vector_store %arg6[%c0_81, %c0_82], %128 {strides = array<i32>} : memref<8x128xf32, #tpu.memory_space<vmem>>, vector<1x128xf32>,
    %130 = arith.mulf %107, %127 : vector<1x128xf32>
    %c1 = arith.constant 1 : index
    %c0_83 = arith.constant 0 : index
    %131 = vector.load %arg6[%c1, %c0_83] : memref<8x128xf32, #tpu.memory_space<vmem>>, vector<1x128xf32>
    tpu.vector_store %arg6[%c1, %c0_83], %130 {strides = array<i32>} : memref<8x128xf32, #tpu.memory_space<vmem>>, vector<1x128xf32>,
    %132 = arith.mulf %109, %127 : vector<1x128xf32>
    %c2 = arith.constant 2 : index
    %c0_84 = arith.constant 0 : index
    %133 = vector.load %arg6[%c2, %c0_84] : memref<8x128xf32, #tpu.memory_space<vmem>>, vector<1x128xf32>
    tpu.vector_store %arg6[%c2, %c0_84], %132 {strides = array<i32>} : memref<8x128xf32, #tpu.memory_space<vmem>>, vector<1x128xf32>,
    %134 = arith.mulf %111, %127 : vector<1x128xf32>
    %c3 = arith.constant 3 : index
    %c0_85 = arith.constant 0 : index
    %135 = vector.load %arg6[%c3, %c0_85] : memref<8x128xf32, #tpu.memory_space<vmem>>, vector<1x128xf32>
    tpu.vector_store %arg6[%c3, %c0_85], %134 {strides = array<i32>} : memref<8x128xf32, #tpu.memory_space<vmem>>, vector<1x128xf32>,
    %136 = arith.mulf %113, %127 : vector<1x128xf32>
    %c4 = arith.constant 4 : index
    %c0_86 = arith.constant 0 : index
    %137 = vector.load %arg6[%c4, %c0_86] : memref<8x128xf32, #tpu.memory_space<vmem>>, vector<1x128xf32>
    tpu.vector_store %arg6[%c4, %c0_86], %136 {strides = array<i32>} : memref<8x128xf32, #tpu.memory_space<vmem>>, vector<1x128xf32>,
    %138 = arith.mulf %115, %127 : vector<1x128xf32>
    %c5 = arith.constant 5 : index
    %c0_87 = arith.constant 0 : index
    %139 = vector.load %arg6[%c5, %c0_87] : memref<8x128xf32, #tpu.memory_space<vmem>>, vector<1x128xf32>
    tpu.vector_store %arg6[%c5, %c0_87], %138 {strides = array<i32>} : memref<8x128xf32, #tpu.memory_space<vmem>>, vector<1x128xf32>,
    %140 = arith.mulf %117, %127 : vector<1x128xf32>
    %c6 = arith.constant 6 : index
    %c0_88 = arith.constant 0 : index
    %141 = vector.load %arg6[%c6, %c0_88] : memref<8x128xf32, #tpu.memory_space<vmem>>, vector<1x128xf32>
    tpu.vector_store %arg6[%c6, %c0_88], %140 {strides = array<i32>} : memref<8x128xf32, #tpu.memory_space<vmem>>, vector<1x128xf32>,
    %142 = arith.mulf %119, %127 : vector<1x128xf32>
    %c7 = arith.constant 7 : index
    %c0_89 = arith.constant 0 : index
    %143 = vector.load %arg6[%c7, %c0_89] : memref<8x128xf32, #tpu.memory_space<vmem>>, vector<1x128xf32>
    tpu.vector_store %arg6[%c7, %c0_89], %142 {strides = array<i32>} : memref<8x128xf32, #tpu.memory_space<vmem>>, vector<1x128xf32>,
    return
  }
  func.func @transform_0(%arg0: i32) -> (i32, i32) {
    %c0_i32 = arith.constant 0 : i32
    %c0_i32_0 = arith.constant 0 : i32
    return %arg0, %c0_i32 : i32, i32
  }
  func.func @transform_1(%arg0: i32) -> (i32, i32) {
    %c0_i32 = arith.constant 0 : i32
    %c0_i32_0 = arith.constant 0 : i32
    %c0_i32_1 = arith.constant 0 : i32
    return %c0_i32, %c0_i32_0 : i32, i32
  }
  func.func @transform_2(%arg0: i32) -> (i32, i32) {
    %c0_i32 = arith.constant 0 : i32
    %c0_i32_0 = arith.constant 0 : i32
    %c0_i32_1 = arith.constant 0 : i32
    return %c0_i32, %c0_i32_0 : i32, i32
  }
  func.func @transform_3(%arg0: i32) -> (i32, i32) {
    %c0_i32 = arith.constant 0 : i32
    %c0_i32_0 = arith.constant 0 : i32
    %c0_i32_1 = arith.constant 0 : i32
    return %c0_i32, %c0_i32_0 : i32, i32
  }
  func.func @transform_4(%arg0: i32) -> (i32, i32) {
    %c0_i32 = arith.constant 0 : i32
    %c0_i32_0 = arith.constant 0 : i32
    %c0_i32_1 = arith.constant 0 : i32
    return %c0_i32, %c0_i32_0 : i32, i32
  }
  func.func @transform_5(%arg0: i32) -> (i32, i32) {
    %c0_i32 = arith.constant 0 : i32
    %c0_i32_0 = arith.constant 0 : i32
    return %c0_i32, %arg0 : i32, i32
  }
}

</mosaic_0001>

<bundles_post_ra>
// kernel: tpu_custom_call.1
= control target key start
LH: loop header
LB: loop body
LE: loop exit
PB: predicated region body
PF: predicated region fallthrough
CT: control target
= control target key end

     0   :  { %s8275_s0 = inlined_call_operand.vmem [shape: f32[256,256], index: 0, kind: input, shape index: {}]   ;;  %s8276_s1 = inlined_call_operand.vmem [shape: f32[256,32], index: 1, kind: input, shape index: {}]   ;;  %s8277_s2 = inlined_call_operand.vmem [shape: f32[256,1], index: 2, kind: input, shape index: {}]   ;;  %s8278_s3 = inlined_call_operand.vmem [shape: f32[1,256], index: 3, kind: input, shape index: {}]   ;;  %s8279_s4 = inlined_call_operand.<no memory space> [shape: f32[1,1], index: 4, kind: input, shape index: {}]   ;;  %s8280_s5 = inlined_call_operand.hbm [shape: f32[8,256], index: 5, kind: output, shape index: {}]  }
   0x1   :  { %10 = sst [smem:[#allocation2]] %s8279_s4 }
   0x2   :  { %11 = vsyncpa [#allocation4], 0 }
   0x3   :  { %13 = vsyncpa [#allocation4 + $0x1], 0  ;;  %s5748_s20 = smov 0   ;;  %s5750_s21 = smov 0  }
   0x4   :  { %s5752_s22 = smov 0   ;;  %s5754_s23 = smov 0  }
   0x5 LB: > { %s5769_s4 = sadd.s32 4294967295, %s5708_s23   ;;  %s3820_s24 = sadd.s32 4294967294, %s5708_s23   ;;  %s5708_s23 = sphi %s5754_s23, %s8880_s23   ;;  %s5704_s22 = sphi %s5752_s22, %s8879_s22   ;;  %s5700_s21 = sphi %s5750_s21, %s8878_s21   ;;  %s5696_s20 = sphi %s5748_s20, %s8877_s20  }
   0x6   : > { %s5773_s25 = sadd.s32 1, %s5708_s23   ;;  %s136_s26 = sadd.s32 1, %s5704_s22 }
   0x7   : > { %s133_s27 = ssub.s32 %s5708_s23, %s5773_s25  ;;  %p146_p0 = scmp.ne.s32.totalorder %s5704_s22, %s5700_s21 }
   0x8   : > { %p134_p1 = scmp.eq.s32.totalorder %s133_s27, 0  ;;  %p147_p2 = scmp.eq.s32.totalorder %s5769_s4, 1 }
   0x9   : > { %p152_p3 = scmp.ne.s32.totalorder %s5700_s21, %s5696_s20  ;;  %p153_p4 = scmp.eq.s32.totalorder %s3820_s24, 1 }
   0xa   : > { %s5784_s28 = scalar_select %p134_p1, %s5704_s22, %s136_s26  }
   0xb   : > { %p5786_p5 = por %p147_p2, %p146_p0  ;;  %p5790_p6 = por %p153_p4, %p152_p3 }
   0xc   : > { %p3823_p7 = scmp.ge.s32.totalorder %s5708_s23, 1  ;;  %p193_p8 = scmp.lt.s32.totalorder %s5708_s23, 3 }
   0xe   : > { %p194_p9 = pnand %p3823_p7, %p193_p8 }
  0x10   : > { %197 = sbr.rel (%p194_p9) target bundleno = 2187 (0x88b), region = 40 }
  0x15   : > { %s3825_s6 = sshll.u32 %s5769_s4, 4  ;;  %vm470_vm0 = vcmask 261120   ;;  %v5800_v0 = vld [vmem:[%s8276_s1] sm:$0xff]  ;;  %v5710_v1 = vmov 0   ;;  %v308_v2 = vld [vmem:[%s8277_s2 + $0xf0] sm:$0xff]  ;;  %v291_v6 = vld [vmem:[%s8277_s2 + $0x68] sm:$0xff] }
  0x16   : > { %8498 = vst [vmem:[#allocation6_spill] sm:$0xff] %v5800_v0  ;;  %p223_p10 = scmp.lt.s32.totalorder %s3825_s6, 31  ;;  %4913 = vmatprep.mubr.msk.f32.mxu0 %vm470_vm0, %v5800_v0  ;;  %5565 = vset.pattern.permute.xlu1 %v5710_v1  ;;  %v292_v3 = vld [vmem:[%s8277_s2 + $0x70] sm:$0xff]  ;;  %v290_v8 = vld [vmem:[%s8277_s2 + $0x60] sm:$0xff]  ;;  %v309_v9 = vld [vmem:[%s8277_s2 + $0xf8] sm:$0xff]  ;;  %s5711_s8 = smov 96  }
  0x17   : > { %5564 = vset.pattern.permute.xlu0 %v5710_v1  ;;  %462 = vperm.xlu1 %5565, %v308_v2   ;;  %v289_v11 = vld [vmem:[%s8277_s2 + $0x58] sm:$0xff]  ;;  %v288_v14 = vld [vmem:[%s8277_s2 + $0x50] sm:$0xff]  ;;  %v307_v15 = vld [vmem:[%s8277_s2 + $0xe8] sm:$0xff]  ;;  %s5712_s15 = smov 64   ;;  %s5713_s19 = smov 32  }
  0x18   : > { %s8882_s6 = smov (!%p223_p10, %s3825_s6), 31  ;;  %467 = vperm.xlu0 %5564, %v309_v9   ;;  %v293_v12 = vld [vmem:[%s8277_s2 + $0x78] sm:$0xff]  ;;  %v287_v17 = vld [vmem:[%s8277_s2 + $0x48] sm:$0xff]  ;;  %v306_v18 = vld [vmem:[%s8277_s2 + $0xe0] sm:$0xff]  ;;  %s219_s12 = sand.u32 1, %s5700_s21  }
  0x19   : > { %s4216_s13 = sshll.u32 %s8882_s6, 4  ;;  %v286_v20 = vld [vmem:[%s8277_s2 + $0x40] sm:$0xff]  ;;  %v305_v21 = vld [vmem:[%s8277_s2 + $0xd8] sm:$0xff]  ;;  %v304_v24 = vld [vmem:[%s8277_s2 + $0xd0] sm:$0xff]  ;;  %s4213_s14 = sshll.u32 %s5769_s4, 7 }
  0x1a   : > { %s5813_s16 = scalar_lea.vmem %s8275_s0, %s4216_s13  ;;  %v285_v23 = vld [vmem:[%s8277_s2 + $0x38] sm:$0xff]  ;;  %v284_v26 = vld [vmem:[%s8277_s2 + $0x30] sm:$0xff]  ;;  %v303_v27 = vld [vmem:[%s8277_s2 + $0xc8] sm:$0xff]  ;;  %s3824_s13 = sshll.u32 %s219_s12, 3 }
  0x1b   : > { %v5816_v4 = vld [vmem:[%s5813_s16 + $0xf0] sm:$0xff]  ;;  %v5819_v5 = vld [vmem:[%s5813_s16 + $0xe0] sm:$0xff]  ;;  %382 = vperm.xlu1 %5565, %v292_v3   ;;  %v283_v29 = vld [vmem:[%s8277_s2 + $0x28] sm:$0xff]  ;;  %s8234_s24 = scalar_lea.hbm %s8280_s5, %s4213_s14  ;;  %s3748_s4 = scalar_lea.sflag [#allocation4], %s219_s12 }
  0x1c   : > { %8499 = vst [vmem:[#allocation7_spill] sm:$0xff] %v5816_v4  ;;  %8500 = vst [vmem:[#allocation8_spill] sm:$0xff] %v5819_v5  ;;  %4881 = vmatprep.subr.msk.mxu0 %vm470_vm0, %v5816_v4  ;;  %v5831_v7 = vld [vmem:[%s5813_s16 + $0xd0] sm:$0xff]  ;;  %v5844_v10 = vld [vmem:[%s5813_s16 + $0xc0] sm:$0xff]  ;;  %387 = vperm.xlu0 %5564, %v293_v12  }
  0x1d   : > { %4882 = vmatpush3.xpose.msk.msra.mxu0 %vm470_vm0, %v5816_v4  ;;  %8501 = vst [vmem:[#allocation9_spill] sm:$0xff] %v5831_v7  ;;  %8502 = vst [vmem:[#allocation10_spill] sm:$0xff] %v5844_v10  ;;  %v5857_v13 = vld [vmem:[%s5813_s16 + $0xb0] sm:$0xff]  ;;  %v5870_v16 = vld [vmem:[%s5813_s16 + $0xa0] sm:$0xff] }
  0x1e   : > { %4883 = vmatprep.subr.msk.mxu0 %vm470_vm0, %v5819_v5  ;;  %8503 = vst [vmem:[#allocation11_spill] sm:$0xff] %v5857_v13  ;;  %8504 = vst [vmem:[#allocation12_spill] sm:$0xff] %v5870_v16  ;;  %v5883_v19 = vld [vmem:[%s5813_s16 + $0x90] sm:$0xff]  ;;  %v5896_v22 = vld [vmem:[%s5813_s16 + $0x80] sm:$0xff] }
  0x1f   : > { %377 = vperm.xlu1 %5565, %v291_v6   ;;  %8505 = vst [vmem:[#allocation13_spill] sm:$0xff] %v5883_v19  ;;  %8506 = vst [vmem:[#allocation14_spill] sm:$0xff] %v5896_v22  ;;  %v5909_v25 = vld [vmem:[%s5813_s16 + $0x70] sm:$0xff]  ;;  %v5922_v28 = vld [vmem:[%s5813_s16 + $0x60] sm:$0xff] }
  0x20   : > { %457 = vperm.xlu0 %5564, %v307_v15   ;;  %8507 = vst [vmem:[#allocation15_spill] sm:$0xff] %v5909_v25  ;;  %8508 = vst [vmem:[#allocation16_spill] sm:$0xff] %v5922_v28  ;;  %v302_v30 = vld [vmem:[%s8277_s2 + $0xc0] sm:$0xff]  ;;  %v5935_v31 = vld [vmem:[%s5813_s16 + $0x50] sm:$0xff] }
  0x21   : > { %4884 = vmatpush3.xpose.msk.msra.mxu0 %vm470_vm0, %v5819_v5  ;;  %8509 = vst [vmem:[#allocation17_spill] sm:$0xff] %v5935_v31  ;;  %v282_v32 = vld [vmem:[%s8277_s2 + $0x20] sm:$0xff]  ;;  %v301_v33 = vld [vmem:[%s8277_s2 + $0xb8] sm:$0xff]  ;;  %v300_v36 = vld [vmem:[%s8277_s2 + $0xb0] sm:$0xff] }
  0x22   : > { %4885 = vmatprep.subr.msk.mxu0 %vm470_vm0, %v5831_v7  ;;  %v5948_v34 = vld [vmem:[%s5813_s16 + $0x40] sm:$0xff]  ;;  %v281_v35 = vld [vmem:[%s8277_s2 + $0x18] sm:$0xff]  ;;  %v5961_v37 = vld [vmem:[%s5813_s16 + $0x30] sm:$0xff] }
  0x23   : > { %372 = vperm.xlu1 %5565, %v290_v8   ;;  %8510 = vst [vmem:[#allocation18_spill] sm:$0xff] %v5948_v34  ;;  %8511 = vst [vmem:[#allocation19_spill] sm:$0xff] %v5961_v37  ;;  %v280_v38 = vld [vmem:[%s8277_s2 + $0x10] sm:$0xff]  ;;  %v299_v39 = vld [vmem:[%s8277_s2 + $0xa8] sm:$0xff] }
  0x24   : > { %452 = vperm.xlu0 %5564, %v306_v18   ;;  %v5974_v40 = vld [vmem:[%s5813_s16 + $0x20] sm:$0xff]  ;;  %v279_v41 = vld [vmem:[%s8277_s2 + $0x8] sm:$0xff]  ;;  %v5987_v43 = vld [vmem:[%s5813_s16 + $0x10] sm:$0xff] }
  0x25   : > { %4886 = vmatpush3.xpose.msk.msra.mxu0 %vm470_vm0, %v5831_v7  ;;  %8512 = vst [vmem:[#allocation20_spill] sm:$0xff] %v5974_v40  ;;  %v298_v42 = vld [vmem:[%s8277_s2 + $0xa0] sm:$0xff]  ;;  %8513 = vst [vmem:[#allocation21_spill] sm:$0xff] %v5987_v43  ;;  %v297_v45 = vld [vmem:[%s8277_s2 + $0x98] sm:$0xff] }
  0x26   : > { %4887 = vmatprep.subr.msk.mxu0 %vm470_vm0, %v5844_v10  ;;  %v278_v44 = vld [vmem:[%s8277_s2] sm:$0xff]  ;;  %v296_v47 = vld [vmem:[%s8277_s2 + $0x90] sm:$0xff]  ;;  %v295_v48 = vld [vmem:[%s8277_s2 + $0x88] sm:$0xff] }
  0x27   : > { %367 = vperm.xlu1 %5565, %v289_v11   ;;  %v6000_v46 = vld [vmem:[%s5813_s16] sm:$0xff]  ;;  %v6019_v49 = vld [vmem:[%s8276_s1 + $0x8] sm:$0xff]  ;;  %v6024_v50 = vld [vmem:[%s8276_s1 + $0x10] sm:$0xff] }
  0x28   : > { %447 = vperm.xlu0 %5564, %v305_v21   ;;  %8514 = vst [vmem:[#allocation22_spill] sm:$0xff] %v6000_v46  ;;  %8515 = vst [vmem:[#allocation23_spill] sm:$0xff] %v6019_v49  ;;  %v294_v51 = vld [vmem:[%s8277_s2 + $0x80] sm:$0xff]  ;;  %v6038_v52 = vld [vmem:[%s8276_s1 + $0x18] sm:$0xff] }
  0x29   : > { %4888 = vmatpush3.xpose.msk.msra.mxu0 %vm470_vm0, %v5844_v10  ;;  %8516 = vst [vmem:[#allocation24_spill] sm:$0xff] %v6024_v50  ;;  %8517 = vst [vmem:[#allocation25_spill] sm:$0xff] %v6038_v52  ;;  %v6043_v53 = vld [vmem:[%s8276_s1 + $0x20] sm:$0xff]  ;;  %v6054_v54 = vld [vmem:[%s8276_s1 + $0x28] sm:$0xff] }
  0x2a   : > { %4889 = vmatprep.subr.msk.mxu0 %vm470_vm0, %v5857_v13  ;;  %8518 = vst [vmem:[#allocation26_spill] sm:$0xff] %v6043_v53  ;;  %8519 = vst [vmem:[#allocation27_spill] sm:$0xff] %v6054_v54  ;;  %v6059_v55 = vld [vmem:[%s8276_s1 + $0x30] sm:$0xff]  ;;  %v6072_v56 = vld [vmem:[%s8276_s1 + $0x38] sm:$0xff] }
  0x2b   : > { %362 = vperm.xlu1 %5565, %v288_v14   ;;  %8520 = vst [vmem:[#allocation28_spill] sm:$0xff] %v6059_v55  ;;  %8521 = vst [vmem:[#allocation29_spill] sm:$0xff] %v6072_v56  ;;  %v6077_v57 = vld [vmem:[%s8276_s1 + $0x40] sm:$0xff]  ;;  %v6090_v58 = vld [vmem:[%s8276_s1 + $0x48] sm:$0xff] }
  0x2c   : > { %442 = vperm.xlu0 %5564, %v304_v24   ;;  %8522 = vst [vmem:[#allocation30_spill] sm:$0xff] %v6077_v57  ;;  %8523 = vst [vmem:[#allocation31_spill] sm:$0xff] %v6090_v58  ;;  %v6095_v59 = vld [vmem:[%s8276_s1 + $0x50] sm:$0xff]  ;;  %v6108_v60 = vld [vmem:[%s8276_s1 + $0x58] sm:$0xff] }
  0x2d   : > { %4890 = vmatpush3.xpose.msk.msra.mxu0 %vm470_vm0, %v5857_v13  ;;  %8524 = vst [vmem:[#allocation32_spill] sm:$0xff] %v6095_v59  ;;  %8525 = vst [vmem:[#allocation33_spill] sm:$0xff] %v6108_v60  ;;  %v6113_v61 = vld [vmem:[%s8276_s1 + $0x60] sm:$0xff]  ;;  %v6126_v62 = vld [vmem:[%s8276_s1 + $0x68] sm:$0xff] }
  0x2e   : > { %4891 = vmatprep.subr.msk.mxu0 %vm470_vm0, %v5870_v16  ;;  %8526 = vst [vmem:[#allocation34_spill] sm:$0xff] %v6113_v61  ;;  %8527 = vst [vmem:[#allocation35_spill] sm:$0xff] %v6126_v62  ;;  %v6131_v63 = vld [vmem:[%s8276_s1 + $0x70] sm:$0xff]  ;;  %v6144_v1 = vld [vmem:[%s8276_s1 + $0x78] sm:$0xff] }
  0x2f   : > { %357 = vperm.xlu1 %5565, %v287_v17   ;;  %8528 = vst [vmem:[#allocation36_spill] sm:$0xff] %v6131_v63  ;;  %8529 = vst [vmem:[#allocation37_spill] sm:$0xff] %v6144_v1  ;;  %v6149_v2 = vld [vmem:[%s8276_s1 + $0x80] sm:$0xff]  ;;  %v6160_v3 = vld [vmem:[%s8276_s1 + $0x88] sm:$0xff] }
  0x30   : > { %437 = vperm.xlu0 %5564, %v303_v27   ;;  %8530 = vst [vmem:[#allocation38_spill] sm:$0xff] %v6149_v2  ;;  %8531 = vst [vmem:[#allocation39_spill] sm:$0xff] %v6160_v3  ;;  %v6165_v6 = vld [vmem:[%s8276_s1 + $0x90] sm:$0xff]  ;;  %v6176_v8 = vld [vmem:[%s8276_s1 + $0x98] sm:$0xff]  ;;  %v875_v27 = vlaneseq }
  0x31   : > { %4892 = vmatpush3.xpose.msk.msra.mxu0 %vm470_vm0, %v5870_v16  ;;  %8532 = vst [vmem:[#allocation40_spill] sm:$0xff] %v6165_v6  ;;  %8533 = vst [vmem:[#allocation41_spill] sm:$0xff] %v6176_v8  ;;  %v6181_v9 = vld [vmem:[%s8276_s1 + $0xa0] sm:$0xff]  ;;  %v6192_v11 = vld [vmem:[%s8276_s1 + $0xa8] sm:$0xff] }
  0x32   : > { %4893 = vmatprep.subr.msk.mxu0 %vm470_vm0, %v5883_v19  ;;  %8534 = vst [vmem:[#allocation42_spill] sm:$0xff] %v6181_v9  ;;  %8535 = vst [vmem:[#allocation43_spill] sm:$0xff] %v6192_v11  ;;  %v6197_v12 = vld [vmem:[%s8276_s1 + $0xb0] sm:$0xff]  ;;  %v6206_v14 = vld [vmem:[%s8276_s1 + $0xb8] sm:$0xff] }
  0x33   : > { %352 = vperm.xlu1 %5565, %v286_v20   ;;  %8536 = vst [vmem:[#allocation44_spill] sm:$0xff] %v6197_v12  ;;  %8537 = vst [vmem:[#allocation45_spill] sm:$0xff] %v6206_v14  ;;  %v6211_v15 = vld [vmem:[%s8276_s1 + $0xc0] sm:$0xff]  ;;  %v6220_v17 = vld [vmem:[%s8276_s1 + $0xc8] sm:$0xff] }
  0x34   : > { %432 = vperm.xlu0 %5564, %v302_v30   ;;  %8538 = vst [vmem:[#allocation46_spill] sm:$0xff] %v6211_v15  ;;  %8539 = vst [vmem:[#allocation47_spill] sm:$0xff] %v6220_v17  ;;  %v6225_v18 = vld [vmem:[%s8276_s1 + $0xd0] sm:$0xff]  ;;  %v6234_v20 = vld [vmem:[%s8276_s1 + $0xd8] sm:$0xff] }
  0x35   : > { %4894 = vmatpush3.xpose.msk.msra.mxu0 %vm470_vm0, %v5883_v19  ;;  %8540 = vst [vmem:[#allocation48_spill] sm:$0xff] %v6225_v18  ;;  %8541 = vst [vmem:[#allocation49_spill] sm:$0xff] %v6234_v20  ;;  %v6239_v21 = vld [vmem:[%s8276_s1 + $0xe0] sm:$0xff]  ;;  %v6253_v24 = vld [vmem:[%s8276_s1 + $0xf0] sm:$0xff] }
  0x36   : > { %4895 = vmatprep.subr.msk.mxu0 %vm470_vm0, %v5896_v22  ;;  %8542 = vst [vmem:[#allocation50_spill] sm:$0xff] %v6239_v21  ;;  %8544 = vst [vmem:[#allocation52_spill] sm:$0xff] %v6253_v24 }
  0x37   : > { %347 = vperm.xlu1 %5565, %v285_v23   ;;  %v6248_v23 = vld [vmem:[%s8276_s1 + $0xe8] sm:$0xff] }
  0x38   : > { %427 = vperm.xlu0 %5564, %v301_v33   ;;  %8543 = vst [vmem:[#allocation51_spill] sm:$0xff] %v6248_v23 }
  0x39   : > { %4896 = vmatpush3.xpose.msk.msra.mxu0 %vm470_vm0, %v5896_v22 }
  0x3a   : > { %4897 = vmatprep.subr.msk.mxu0 %vm470_vm0, %v5909_v25 }
  0x3b   : > { %342 = vperm.xlu1 %5565, %v284_v26   ;;  %v6262_v26 = vld [vmem:[%s8276_s1 + $0xf8] sm:$0xff] }
  0x3c   : > { %422 = vperm.xlu0 %5564, %v300_v36   ;;  %8545 = vst [vmem:[#allocation53_spill] sm:$0xff] %v6262_v26 }
  0x3d   : > { %4898 = vmatpush3.xpose.msk.msra.mxu0 %vm470_vm0, %v5909_v25 }
  0x3e   : > { %4899 = vmatprep.subr.msk.mxu0 %vm470_vm0, %v5922_v28 }
  0x3f   : > { %337 = vperm.xlu1 %5565, %v283_v29   ;;  %v876_v29 = vshrl.u32 %v875_v27, 7 }
  0x40   : > { %417 = vperm.xlu0 %5564, %v299_v39  }
  0x41   : > { %4900 = vmatpush3.xpose.msk.msra.mxu0 %vm470_vm0, %v5922_v28  ;;  %v881_v30 = vsub.s32 1, %v876_v29  ;;  %v877_v33 = vsub.s32 0, %v876_v29 }
  0x42   : > { %4901 = vmatprep.subr.msk.mxu0 %vm470_vm0, %v5935_v31 }
  0x43   : > { %332 = vperm.xlu1 %5565, %v282_v32   ;;  %v872_v32 = vld [vmem:[%s8278_s3] sm:$0x3] }
  0x44   : > { %412 = vperm.xlu0 %5564, %v298_v42   ;;  %v6297_v36 = vrot.slane %v872_v32, %v877_v33 }
  0x45   : > { %4902 = vmatpush3.xpose.msk.msra.mxu0 %vm470_vm0, %v5935_v31 }
  0x46   : > { %4903 = vmatprep.subr.msk.mxu0 %vm470_vm0, %v5948_v34  ;;  %8547 = vst [vmem:[#allocation55_spill] sm:$0xff] %v6297_v36 }
  0x47   : > { %327 = vperm.xlu1 %5565, %v281_v35   ;;  %v6295_v35 = vrot.slane %v872_v32, %v881_v30 }
  0x48   : > { %407 = vperm.xlu0 %5564, %v297_v45  }
  0x49   : > { %4904 = vmatpush3.xpose.msk.msra.mxu0 %vm470_vm0, %v5948_v34  ;;  %8546 = vst [vmem:[#allocation54_spill] sm:$0xff] %v6295_v35  ;;  %949 = vmatprep.mubr.f32.mxu1 %v6295_v35 }
  0x4a   : > { %4905 = vmatprep.subr.msk.mxu0 %vm470_vm0, %v5961_v37 }
  0x4b   : > { %322 = vperm.xlu1 %5565, %v280_v38  }
  0x4c   : > { %402 = vperm.xlu0 %5564, %v296_v47  }
  0x4d   : > { %4906 = vmatpush3.xpose.msk.msra.mxu0 %vm470_vm0, %v5961_v37 }
  0x4e   : > { %4907 = vmatprep.subr.msk.mxu0 %vm470_vm0, %v5974_v40 }
  0x4f   : > { %317 = vperm.xlu1 %5565, %v279_v41  }
  0x50   : > { %397 = vperm.xlu0 %5564, %v295_v48  }
  0x51   : > { %4908 = vmatpush3.xpose.msk.msra.mxu0 %vm470_vm0, %v5974_v40 }
  0x52   : > { %4909 = vmatprep.subr.msk.mxu0 %vm470_vm0, %v5987_v43 }
  0x53   : > { %312 = vperm.xlu1 %5565, %v278_v44  }
  0x54   : > { %392 = vperm.xlu0 %5564, %v294_v51  }
  0x55   : > { %4910 = vmatpush3.xpose.msk.msra.mxu0 %vm470_vm0, %v5987_v43 }
  0x56   : > { %4911 = vmatprep.subr.msk.mxu0 %vm470_vm0, %v6000_v46 }
  0x57   : > { %983 = vrot.lane.b32.xlu1 %v5819_v5, %s5711_s8 }
  0x58   : > { %985 = vrot.lane.b32.xlu0 %v5816_v4, %s5711_s8 }
  0x59   : > { %4912 = vmatpush3.xpose.msk.msra.mxu0 %vm470_vm0, %v6000_v46 }
  0x5b   : > { %979 = vrot.lane.b32.xlu1 %v5844_v10, %s5711_s8 }
  0x5c   : > { %4914 = vmatmul.mubr.msk.f32.vlgmr.msra.gmra.mxu0 %vm470_vm0, %v6019_v49  ;;  %981 = vrot.lane.b32.xlu0 %v5831_v7, %s5711_s8 }
  0x5d   : > { %4916 = vmatprep.mubr.msk.f32.mxu0 %vm470_vm0, %v6024_v50 }
  0x5f   : > { %975 = vrot.lane.b32.xlu1 %v5870_v16, %s5711_s8 }
  0x60   : > { %4917 = vmatmul.mubr.msk.f32.gmra.mxu0 %vm470_vm0, %v6038_v52  ;;  %977 = vrot.lane.b32.xlu0 %v5857_v13, %s5711_s8 }
  0x61   : > { %4919 = vmatprep.mubr.msk.f32.mxu0 %vm470_vm0, %v6043_v53 }
  0x63   : > { %971 = vrot.lane.b32.xlu1 %v5896_v22, %s5711_s8 }
  0x64   : > { %4920 = vmatmul.mubr.msk.f32.gmra.mxu0 %vm470_vm0, %v6054_v54  ;;  %973 = vrot.lane.b32.xlu0 %v5883_v19, %s5711_s8 }
  0x65   : > { %4922 = vmatprep.mubr.msk.f32.mxu0 %vm470_vm0, %v6059_v55 }
  0x67   : > { %967 = vrot.lane.b32.xlu1 %v5922_v28, %s5711_s8 }
  0x68   : > { %4923 = vmatmul.mubr.msk.f32.gmra.mxu0 %vm470_vm0, %v6072_v56  ;;  %969 = vrot.lane.b32.xlu0 %v5909_v25, %s5711_s8 }
  0x69   : > { %4925 = vmatprep.mubr.msk.f32.mxu0 %vm470_vm0, %v6077_v57 }
  0x6b   : > { %963 = vrot.lane.b32.xlu1 %v5948_v34, %s5711_s8 }
  0x6c   : > { %4926 = vmatmul.mubr.msk.f32.gmra.mxu0 %vm470_vm0, %v6090_v58  ;;  %965 = vrot.lane.b32.xlu0 %v5935_v31, %s5711_s8 }
  0x6d   : > { %4928 = vmatprep.mubr.msk.f32.mxu0 %vm470_vm0, %v6095_v59 }
  0x6f   : > { %959 = vrot.lane.b32.xlu1 %v5974_v40, %s5711_s8 }
  0x70   : > { %4929 = vmatmul.mubr.msk.f32.gmra.mxu0 %vm470_vm0, %v6108_v60  ;;  %961 = vrot.lane.b32.xlu0 %v5961_v37, %s5711_s8 }
  0x71   : > { %4931 = vmatprep.mubr.msk.f32.mxu0 %vm470_vm0, %v6113_v61 }
  0x73   : > { %955 = vrot.lane.b32.xlu1 %v6000_v46, %s5711_s8 }
  0x74   : > { %4932 = vmatmul.mubr.msk.f32.gmra.mxu0 %vm470_vm0, %v6126_v62  ;;  %957 = vrot.lane.b32.xlu0 %v5987_v43, %s5711_s8 }
  0x75   : > { %4934 = vmatprep.mubr.msk.f32.mxu0 %vm470_vm0, %v6131_v63 }
  0x78   : > { %4935 = vmatmul.mubr.msk.f32.gmra.mxu0 %vm470_vm0, %v6144_v1  ;;  %1376 = vrot.lane.b32.xlu0 %v5816_v4, %s5712_s15 }
  0x79   : > { %4937 = vmatprep.mubr.msk.f32.mxu0 %vm470_vm0, %v6149_v2 }
  0x7c   : > { %4938 = vmatmul.mubr.msk.f32.gmra.mxu0 %vm470_vm0, %v6160_v3  ;;  %1374 = vrot.lane.b32.xlu0 %v5819_v5, %s5712_s15 }
  0x7d   : > { %4940 = vmatprep.mubr.msk.f32.mxu0 %vm470_vm0, %v6165_v6 }
  0x80   : > { %4941 = vmatmul.mubr.msk.f32.gmra.mxu0 %vm470_vm0, %v6176_v8  ;;  %1372 = vrot.lane.b32.xlu0 %v5831_v7, %s5712_s15 }
  0x81   : > { %4943 = vmatprep.mubr.msk.f32.mxu0 %vm470_vm0, %v6181_v9 }
  0x84   : > { %4944 = vmatmul.mubr.msk.f32.gmra.mxu0 %vm470_vm0, %v6192_v11  ;;  %1370 = vrot.lane.b32.xlu0 %v5844_v10, %s5712_s15 }
  0x85   : > { %4946 = vmatprep.mubr.msk.f32.mxu0 %vm470_vm0, %v6197_v12 }
  0x88   : > { %4947 = vmatmul.mubr.msk.f32.gmra.mxu0 %vm470_vm0, %v6206_v14  ;;  %1368 = vrot.lane.b32.xlu0 %v5857_v13, %s5712_s15 }
  0x89   : > { %4949 = vmatprep.mubr.msk.f32.mxu0 %vm470_vm0, %v6211_v15 }
  0x8c   : > { %4950 = vmatmul.mubr.msk.f32.gmra.mxu0 %vm470_vm0, %v6220_v17  ;;  %1366 = vrot.lane.b32.xlu0 %v5870_v16, %s5712_s15 }
  0x8d   : > { %4952 = vmatprep.mubr.msk.f32.mxu0 %vm470_vm0, %v6225_v18 }
  0x90   : > { %4953 = vmatmul.mubr.msk.f32.gmra.mxu0 %vm470_vm0, %v6234_v20  ;;  %1364 = vrot.lane.b32.xlu0 %v5883_v19, %s5712_s15 }
  0x91   : > { %4955 = vmatprep.mubr.msk.f32.mxu0 %vm470_vm0, %v6239_v21 }
  0x92   : > { %v6307_v38 = vpop.permute.xlu1 %462 }
  0x93   : > { %8548 = vst [vmem:[#allocation56_spill] sm:$0xff] %v6307_v38  ;;  %v6309_v39 = vpop.permute.xlu0 %467 }
  0x94   : > { %4956 = vmatmul.mubr.msk.f32.gmra.mxu0 %vm470_vm0, %v6248_v23  ;;  %1362 = vrot.lane.b32.xlu0 %v5896_v22, %s5712_s15  ;;  %8549 = vst [vmem:[#allocation57_spill] sm:$0xff] %v6309_v39 }
  0x95   : > { %4958 = vmatprep.mubr.msk.f32.mxu0 %vm470_vm0, %v6253_v24 }
  0x96   : > { %v6315_v44 = vpop.permute.xlu1 %382 }
  0x97   : > { %8550 = vst [vmem:[#allocation58_spill] sm:$0xff] %v6315_v44  ;;  %v6317_v45 = vpop.permute.xlu0 %387 }
  0x98   : > { %4959 = vmatmul.mubr.msk.f32.gmra.mxu0 %vm470_vm0, %v6262_v26  ;;  %1360 = vrot.lane.b32.xlu0 %v5909_v25, %s5712_s15  ;;  %8551 = vst [vmem:[#allocation59_spill] sm:$0xff] %v6317_v45 }
  0x99   : > { %1340 = vmatprep.mubr.f32.mxu0 %v6295_v35 }
  0x9a   : > { %v6325_v27 = vpop.permute.xlu1 %377 }
  0x9b   : > { %v6327_v29 = vpop.permute.xlu0 %457 }
  0x9c   : > { %1358 = vrot.lane.b32.xlu0 %v5922_v28, %s5712_s15 }
  0x9e   : > { %v6335_v35 = vpop.permute.xlu1 %372 }
  0xa0   : > { %1356 = vrot.lane.b32.xlu0 %v5935_v31, %s5712_s15 }
  0xa2   : > { %v6343_v24 = vpop.permute.xlu1 %367 }
  0xa4   : > { %1354 = vrot.lane.b32.xlu0 %v5948_v34, %s5712_s15 }
  0xa6   : > { %v6347_v34 = vpop.permute.xlu1 %362 }
  0xa8   : > { %1352 = vrot.lane.b32.xlu0 %v5961_v37, %s5712_s15 }
  0xaa   : > { %v6353_v14 = vpop.permute.xlu1 %357 }
  0xac   : > { %1350 = vrot.lane.b32.xlu0 %v5974_v40, %s5712_s15 }
  0xae   : > { %v6363_v9 = vpop.permute.xlu1 %352 }
  0xb0   : > { %1348 = vrot.lane.b32.xlu0 %v5987_v43, %s5712_s15 }
  0xb2   : > { %v6371_v19 = vpop.permute.xlu1 %347 }
  0xb4   : > { %1346 = vrot.lane.b32.xlu0 %v6000_v46, %s5712_s15  ;;  %v6337_v46 = vpop.permute.xlu0 %452 }
  0xb6   : > { %v6377_v62 = vpop.permute.xlu1 %342 }
  0xb8   : > { %v6345_v23 = vpop.permute.xlu0 %447 }
  0xba   : > { %v6381_v59 = vpop.permute.xlu1 %337 }
  0xbc   : > { %v6349_v18 = vpop.permute.xlu0 %442 }
  0xbe   : > { %v6388_v4 = vpop.permute.xlu1 %332 }
  0xbf   : > { %8552 = vst [vmem:[#allocation60_spill] sm:$0xff] %v6388_v4 }
  0xc0   : > { %v6355_v28 = vpop.permute.xlu0 %437 }
  0xc4   : > { %v6365_v8 = vpop.permute.xlu0 %432 }
  0xc8   : > { %v6373_v2 = vpop.permute.xlu0 %427 }
  0xcc   : > { %v6379_v13 = vpop.permute.xlu0 %422 }
  0xd0   : > { %v6383_v58 = vpop.permute.xlu0 %417 }
  0xd4   : > { %v6392_v49 = vpop.permute.xlu0 %412 }
  0xd5   : > { %8553 = vst [vmem:[#allocation61_spill] sm:$0xff] %v6392_v49 }
 0x11c   : > { %v6311_v41 = vpop.f32.mrf.mxu0 }
 0x11e   : > { %v6313_v42 = vpop.f32.mrf.mxu0 }
 0x120   : > { %v6319_v47 = vpop.f32.mrf.mxu0 }
 0x122   : > { %v6321_v48 = vpop.f32.mrf.mxu0 }
 0x124   : > { %v6323_v51 = vpop.f32.mrf.mxu0 }
 0x126   : > { %v6329_v30 = vpop.f32.mrf.mxu0 }
 0x128   : > { %v6331_v32 = vpop.f32.mrf.mxu0 }
 0x12a   : > { %v6333_v33 = vpop.f32.mrf.mxu0 }
 0x12c   : > { %v6339_v43 = vpop.f32.mrf.mxu0 }
 0x12e   : > { %v6341_v26 = vpop.f32.mrf.mxu0 }
 0x130   : > { %v4930_v40 = vpop.f32.mrf.mxu0 }
 0x132   : > { %v731_v37 = vpop.f32.mrf.mxu0 }
 0x134   : > { %v4933_v21 = vpop.f32.mrf.mxu0 }
 0x135   : > { %v747_v0 = vadd.f32 %v4933_v21, %v6325_v27 }
 0x136   : > { %v741_v20 = vpop.f32.mrf.mxu0 }
 0x138   : > { %v4936_v17 = vpop.f32.mrf.mxu0 }
 0x139   : > { %v757_v57 = vadd.f32 %v4936_v17, %v6317_v45 }
 0x13a   : > { %v751_v31 = vpop.f32.mrf.mxu0 }
 0x13b   : > { %v752_v55 = vadd.f32 %v751_v31, %v6315_v44  ;;  %v855_v36 = vmax.f32 %v757_v57, 0.0 }
 0x13c   : > { %v6351_v15 = vpop.f32.mrf.mxu0 }
 0x13d   : > { %v854_v31 = vmax.f32 %v752_v55, 0.0 }
 0x13e   : > { %v6357_v12 = vpop.f32.mrf.mxu0 }
 0x140   : > { %v6359_v11 = vpop.f32.mrf.mxu0 }
 0x142   : > { %v6361_v25 = vpop.f32.mrf.mxu0 }
 0x144   : > { %v6367_v22 = vpop.f32.mrf.mxu0 }
 0x146   : > { %v6369_v6 = vpop.f32.mrf.mxu0 }
 0x148   : > { %v4948_v3 = vpop.f32.mrf.mxu0 }
 0x14a   : > { %v6375_v1 = vpop.f32.mrf.mxu0 }
 0x14c   : > { %v4951_v16 = vpop.f32.mrf.mxu0 }
 0x14d   : > { %v807_v55 = vadd.f32 %v4951_v16, %v6355_v28  ;;  %v797_v16 = vadd.f32 %v4948_v3, %v6373_v2  ;;  %v787_v3 = vadd.f32 %v6367_v22, %v6383_v58 }
 0x14e   : > { %v801_v63 = vpop.f32.mrf.mxu0 }
 0x150   : > { %v4954_v61 = vpop.f32.mrf.mxu0 }
 0x151   : > { %v817_v44 = vadd.f32 %v4954_v61, %v6345_v23  ;;  %v802_v61 = vadd.f32 %v801_v63, %v6365_v8  ;;  %v792_v63 = vadd.f32 %v6375_v1, %v6379_v13  ;;  %v782_v1 = vadd.f32 %v6369_v6, %v6392_v49 }
 0x152   : > { %v811_v60 = vpop.f32.mrf.mxu0 }
 0x153   : > { %v812_v57 = vadd.f32 %v811_v60, %v6349_v18 }
 0x154   : > { %v4957_v10 = vpop.f32.mrf.mxu0 }
 0x155   : > { %v827_v53 = vadd.f32 %v4957_v10, %v6327_v29  ;;  %v737_v10 = vadd.f32 %v4930_v40, %v6343_v24  ;;  %v866_v60 = vmax.f32 %v812_v57, 0.0  ;;  %v862_v57 = vmax.f32 %v792_v63, 0.0 }
 0x156   : > { %v821_v7 = vpop.f32.mrf.mxu0 }
 0x157   : > { %v822_v17 = vadd.f32 %v821_v7, %v6337_v46  ;;  %v6402_v7 = vpop.permute.xlu0 %407  ;;  %v851_v40 = vmax.f32 %v737_v10, 0.0 }
 0x158   : > { %v4960_v56 = vpop.f32.mrf.mxu0  ;;  %8555 = vst [vmem:[#allocation63_spill] sm:$0xff] %v6402_v7  ;;  %v777_v22 = vadd.f32 %v6359_v11, %v6402_v7 }
 0x159   : > { %v837_v5 = vadd.f32 %v4960_v56, %v6309_v39  ;;  %v742_v56 = vadd.f32 %v741_v20, %v6335_v35  ;;  %v869_v39 = vmax.f32 %v827_v53, 0.0  ;;  %v868_v21 = vmax.f32 %v822_v17, 0.0 }
 0x15a   : > { %v831_v54 = vpop.f32.mrf.mxu0  ;;  %v867_v53 = vmax.f32 %v817_v44, 0.0  ;;  %v722_v20 = vadd.f32 %v6341_v26, %v6363_v9  ;;  %v864_v17 = vmax.f32 %v802_v61, 0.0  ;;  %v712_v26 = vadd.f32 %v6333_v33, %v6377_v62 }
 0x15b   : > { %v832_v52 = vadd.f32 %v831_v54, %v6307_v38  ;;  %v871_v50 = vmax.f32 %v837_v5, 0.0  ;;  %v853_v5 = vmax.f32 %v747_v0, 0.0  ;;  %v6399_v54 = vpop.permute.xlu1 %327  ;;  %v727_v0 = vadd.f32 %v6339_v43, %v6353_v14 }
 0x15c   : > { %8554 = vst [vmem:[#allocation62_spill] sm:$0xff] %v6399_v54  ;;  %v717_v43 = vadd.f32 %v6331_v32, %v6371_v19  ;;  %v707_v32 = vadd.f32 %v6323_v51, %v6381_v59  ;;  %v702_v33 = vadd.f32 %v6329_v30, %v6388_v4  ;;  %v861_v51 = vmax.f32 %v787_v3, 0.0 }
 0x15d   : > { %v870_v45 = vmax.f32 %v832_v52, 0.0  ;;  %4265 = vmatprep.subr.mxu1 %v871_v50  ;;  %v732_v50 = vadd.f32 %v731_v37, %v6347_v34  ;;  %v852_v52 = vmax.f32 %v742_v56, 0.0  ;;  %v849_v44 = vmax.f32 %v727_v0, 0.0 }
 0x15e   : > { %4266 = vmatpush3.msra.mxu1 %v855_v36  ;;  %v848_v56 = vmax.f32 %v722_v20, 0.0  ;;  %v847_v10 = vmax.f32 %v717_v43, 0.0  ;;  %v844_v0 = vmax.f32 %v702_v33, 0.0  ;;  %v859_v61 = vmax.f32 %v777_v22, 0.0 }
 0x15f   : > { %4267 = vmatprep.subr.mxu1 %v870_v45  ;;  %v850_v36 = vmax.f32 %v732_v50, 0.0  ;;  %v6411_v37 = vpop.permute.xlu1 %322  ;;  %v6416_v45 = vpop.permute.xlu0 %402 }
 0x160   : > { %4268 = vmatpush3.msra.mxu1 %v854_v31  ;;  %8556 = vst [vmem:[#allocation64_spill] sm:$0xff] %v6411_v37  ;;  %8557 = vst [vmem:[#allocation65_spill] sm:$0xff] %v6416_v45  ;;  %v863_v31 = vmax.f32 %v797_v16, 0.0  ;;  %v772_v6 = vadd.f32 %v6361_v25, %v6416_v45  ;;  %v692_v30 = vadd.f32 %v6321_v48, %v6411_v37  ;;  %v6778_v37 = vld [vmem:[%s5813_s16 + $0x78] sm:$0xff] }
 0x161   : > { %4269 = vmatprep.subr.mxu1 %v869_v39  ;;  %v865_v39 = vmax.f32 %v807_v55, 0.0  ;;  %v845_v55 = vmax.f32 %v707_v32, 0.0 }
 0x162   : > { %4270 = vmatpush3.msra.mxu1 %v853_v5  ;;  %v858_v48 = vmax.f32 %v772_v6, 0.0  ;;  %v842_v16 = vmax.f32 %v692_v30, 0.0 }
 0x163   : > { %4271 = vmatprep.subr.mxu1 %v868_v21  ;;  %v6426_v5 = vpop.permute.xlu1 %317  ;;  %v846_v21 = vmax.f32 %v712_v26, 0.0  ;;  %v6432_v50 = vpop.permute.xlu0 %397 }
 0x164   : > { %4272 = vmatpush3.msra.mxu1 %v852_v52  ;;  %8558 = vst [vmem:[#allocation66_spill] sm:$0xff] %v6426_v5  ;;  %8559 = vst [vmem:[#allocation67_spill] sm:$0xff] %v6432_v50  ;;  %v697_v52 = vadd.f32 %v6319_v47, %v6399_v54  ;;  %v767_v11 = vadd.f32 %v6351_v15, %v6432_v50  ;;  %v687_v47 = vadd.f32 %v6311_v41, %v6426_v5 }
 0x165   : > { %4273 = vmatprep.subr.mxu1 %v867_v53  ;;  %v860_v53 = vmax.f32 %v782_v1, 0.0 }
 0x166   : > { %4274 = vmatpush3.msra.mxu1 %v851_v40  ;;  %v857_v15 = vmax.f32 %v767_v11, 0.0 }
 0x167   : > { %4275 = vmatprep.subr.mxu1 %v866_v60  ;;  %v6442_v40 = vpop.permute.xlu1 %312  ;;  %v843_v60 = vmax.f32 %v697_v52, 0.0  ;;  %v6448_v20 = vpop.permute.xlu0 %392 }
 0x168   : > { %4276 = vmatpush3.msra.mxu1 %v850_v36  ;;  %8560 = vst [vmem:[#allocation68_spill] sm:$0xff] %v6442_v40  ;;  %8561 = vst [vmem:[#allocation69_spill] sm:$0xff] %v6448_v20  ;;  %v762_v25 = vadd.f32 %v6357_v12, %v6448_v20  ;;  %v682_v36 = vadd.f32 %v6313_v42, %v6442_v40  ;;  %v8562_v12 = vld [vmem:[#allocation55_spill] sm:$0xff]  ;;  %v8629_v40 = vld [vmem:[#allocation57_spill] sm:$0xff] }
 0x169   : > { %4277 = vmatprep.subr.mxu1 %v865_v39  ;;  %v841_v39 = vmax.f32 %v687_v47, 0.0  ;;  %v8565_v47 = vld [vmem:[#allocation24_spill] sm:$0xff] }
 0x16a   : > { %4278 = vmatpush3.msra.mxu1 %v849_v44  ;;  %v856_v43 = vmax.f32 %v762_v25, 0.0  ;;  %v840_v41 = vmax.f32 %v682_v36, 0.0  ;;  %v8566_v25 = vld [vmem:[#allocation25_spill] sm:$0xff]  ;;  %v8568_v36 = vld [vmem:[#allocation7_spill] sm:$0xff] }
 0x16b   : > { %4279 = vmatprep.subr.mxu1 %v864_v17  ;;  %v986_v44 = vpop.permute.xlu0 %985  ;;  %v984_v63 = vpop.permute.xlu1 %983  ;;  %v8563_v17 = vld [vmem:[#allocation6_spill] sm:$0xff]  ;;  %1767 = vrot.lane.b32.xlu1 %v8568_v36, %s5713_s19  ;;  %v8592_v36 = vld [vmem:[#allocation15_spill] sm:$0xff] }
 0x16c   : > { %4280 = vmatpush3.msra.mxu1 %v848_v56 }
 0x16d   : > { %4281 = vmatprep.subr.mxu1 %v863_v31 }
 0x16e   : > { %4282 = vmatpush3.msra.mxu1 %v847_v10 }
 0x16f   : > { %4283 = vmatprep.subr.mxu1 %v862_v57  ;;  %v982_v42 = vpop.permute.xlu0 %981  ;;  %v980_v56 = vpop.permute.xlu1 %979 }
 0x170   : > { %4284 = vmatpush3.msra.mxu1 %v846_v21 }
 0x171   : > { %4285 = vmatprep.subr.mxu1 %v861_v51 }
 0x172   : > { %4286 = vmatpush3.msra.mxu1 %v845_v55 }
 0x173   : > { %4287 = vmatprep.subr.mxu1 %v860_v53  ;;  %v978_v26 = vpop.permute.xlu0 %977  ;;  %v976_v32 = vpop.permute.xlu1 %975 }
 0x174   : > { %4288 = vmatpush3.msra.mxu1 %v844_v0 }
 0x175   : > { %4289 = vmatprep.subr.mxu1 %v859_v61  ;;  %v8564_v61 = vld [vmem:[#allocation23_spill] sm:$0xff] }
 0x176   : > { %4290 = vmatpush3.msra.mxu1 %v843_v60 }
 0x177   : > { %4291 = vmatprep.subr.mxu1 %v858_v48  ;;  %v974_v3 = vpop.permute.xlu0 %973  ;;  %v972_v57 = vpop.permute.xlu1 %971  ;;  %v8567_v48 = vld [vmem:[#allocation26_spill] sm:$0xff] }
 0x178   : > { %4292 = vmatpush3.msra.mxu1 %v842_v16 }
 0x179   : > { %4293 = vmatprep.subr.mxu1 %v857_v15  ;;  %v8569_v15 = vld [vmem:[#allocation27_spill] sm:$0xff] }
 0x17a   : > { %4294 = vmatpush3.msra.mxu1 %v841_v39  ;;  %v8570_v39 = vld [vmem:[#allocation28_spill] sm:$0xff] }
 0x17b   : > { %4295 = vmatprep.subr.mxu1 %v856_v43  ;;  %v970_v31 = vpop.permute.xlu0 %969  ;;  %v968_v22 = vpop.permute.xlu1 %967  ;;  %v8571_v43 = vld [vmem:[#allocation8_spill] sm:$0xff] }
 0x17c   : > { %4296 = vmatpush3.msra.mxu1 %v840_v41  ;;  %1765 = vrot.lane.b32.xlu1 %v8571_v43, %s5713_s19  ;;  %v8572_v41 = vld [vmem:[#allocation29_spill] sm:$0xff]  ;;  %v8594_v43 = vld [vmem:[#allocation44_spill] sm:$0xff] }
 0x17d   : > { %950 = vmatmul.mubr.f32.vlgmr.msra.gmra.mxu1 %v8562_v12  ;;  %4961 = vmatprep.subr.msk.mxu1 %vm470_vm0, %v986_v44  ;;  %v8608_v12 = vld [vmem:[#allocation53_spill] sm:$0xff] }
 0x17e   : > { %4962 = vmatpush3.xpose.msk.msra.mxu1 %vm470_vm0, %v986_v44  ;;  %4993 = vmatprep.mubr.msk.f32.mxu1 %vm470_vm0, %v8563_v17  ;;  %v8573_v44 = vld [vmem:[#allocation30_spill] sm:$0xff]  ;;  %v8575_v17 = vld [vmem:[#allocation31_spill] sm:$0xff] }
 0x17f   : > { %4963 = vmatprep.subr.msk.mxu1 %vm470_vm0, %v984_v63  ;;  %v966_v10 = vpop.permute.xlu0 %965  ;;  %v964_v52 = vpop.permute.xlu1 %963 }
 0x182   : > { %4964 = vmatpush3.xpose.msk.msra.mxu1 %vm470_vm0, %v984_v63 }
 0x183   : > { %4965 = vmatprep.subr.msk.mxu1 %vm470_vm0, %v982_v42  ;;  %v962_v1 = vpop.permute.xlu0 %961  ;;  %v960_v6 = vpop.permute.xlu1 %959 }
 0x186   : > { %4966 = vmatpush3.xpose.msk.msra.mxu1 %vm470_vm0, %v982_v42  ;;  %v8574_v42 = vld [vmem:[#allocation9_spill] sm:$0xff] }
 0x187   : > { %4967 = vmatprep.subr.msk.mxu1 %vm470_vm0, %v980_v56  ;;  %v958_v33 = vpop.permute.xlu0 %957  ;;  %v956_v0 = vpop.permute.xlu1 %955  ;;  %1763 = vrot.lane.b32.xlu1 %v8574_v42, %s5713_s19 }
 0x18a   : > { %4968 = vmatpush3.xpose.msk.msra.mxu1 %vm470_vm0, %v980_v56  ;;  %v8577_v56 = vld [vmem:[#allocation10_spill] sm:$0xff] }
 0x18b   : > { %4969 = vmatprep.subr.msk.mxu1 %vm470_vm0, %v978_v26  ;;  %v1377_v21 = vpop.permute.xlu0 %1376  ;;  %1761 = vrot.lane.b32.xlu1 %v8577_v56, %s5713_s19  ;;  %v8596_v56 = vld [vmem:[#allocation45_spill] sm:$0xff] }
 0x18e   : > { %4970 = vmatpush3.xpose.msk.msra.mxu1 %vm470_vm0, %v978_v26  ;;  %v8576_v26 = vld [vmem:[#allocation32_spill] sm:$0xff] }
 0x18f   : > { %4971 = vmatprep.subr.msk.mxu1 %vm470_vm0, %v976_v32  ;;  %v1375_v51 = vpop.permute.xlu0 %1374 }
 0x192   : > { %4972 = vmatpush3.xpose.msk.msra.mxu1 %vm470_vm0, %v976_v32  ;;  %v8579_v32 = vld [vmem:[#allocation34_spill] sm:$0xff] }
 0x193   : > { %4973 = vmatprep.subr.msk.mxu1 %vm470_vm0, %v974_v3  ;;  %v1373_v55 = vpop.permute.xlu0 %1372 }
 0x196   : > { %4974 = vmatpush3.xpose.msk.msra.mxu1 %vm470_vm0, %v974_v3 }
 0x197   : > { %4975 = vmatprep.subr.msk.mxu1 %vm470_vm0, %v972_v57  ;;  %v1371_v53 = vpop.permute.xlu0 %1370 }
 0x19a   : > { %4976 = vmatpush3.xpose.msk.msra.mxu1 %vm470_vm0, %v972_v57  ;;  %v8582_v57 = vld [vmem:[#allocation36_spill] sm:$0xff] }
 0x19b   : > { %4977 = vmatprep.subr.msk.mxu1 %vm470_vm0, %v970_v31  ;;  %v1369_v30 = vpop.permute.xlu0 %1368 }
 0x19e   : > { %4978 = vmatpush3.xpose.msk.msra.mxu1 %vm470_vm0, %v970_v31  ;;  %v8578_v31 = vld [vmem:[#allocation33_spill] sm:$0xff] }
 0x19f   : > { %4979 = vmatprep.subr.msk.mxu1 %vm470_vm0, %v968_v22  ;;  %v1367_v11 = vpop.permute.xlu0 %1366 }
 0x1a2   : > { %4980 = vmatpush3.xpose.msk.msra.mxu1 %vm470_vm0, %v968_v22  ;;  %v8584_v22 = vld [vmem:[#allocation37_spill] sm:$0xff] }
 0x1a3   : > { %4981 = vmatprep.subr.msk.mxu1 %vm470_vm0, %v966_v10  ;;  %v1365_v60 = vpop.permute.xlu0 %1364 }
 0x1a6   : > { %4982 = vmatpush3.xpose.msk.msra.mxu1 %vm470_vm0, %v966_v10  ;;  %v8580_v10 = vld [vmem:[#allocation11_spill] sm:$0xff] }
 0x1a7   : > { %4983 = vmatprep.subr.msk.mxu1 %vm470_vm0, %v964_v52  ;;  %v1363_v16 = vpop.permute.xlu0 %1362  ;;  %1759 = vrot.lane.b32.xlu1 %v8580_v10, %s5713_s19  ;;  %v8598_v10 = vld [vmem:[#allocation17_spill] sm:$0xff]  ;;  %8632 = vst [vmem:[#allocation11_spill] sm:$0xff] %v6778_v37 }
 0x1aa   : > { %4984 = vmatpush3.xpose.msk.msra.mxu1 %vm470_vm0, %v964_v52  ;;  %v8586_v52 = vld [vmem:[#allocation13_spill] sm:$0xff] }
 0x1ab   : > { %4985 = vmatprep.subr.msk.mxu1 %vm470_vm0, %v962_v1  ;;  %v1361_v63 = vpop.permute.xlu0 %1360 }
 0x1ae   : > { %4986 = vmatpush3.xpose.msk.msra.mxu1 %vm470_vm0, %v962_v1  ;;  %v8581_v1 = vld [vmem:[#allocation35_spill] sm:$0xff] }
 0x1af   : > { %4987 = vmatprep.subr.msk.mxu1 %vm470_vm0, %v960_v6  ;;  %v1359_v3 = vpop.permute.xlu0 %1358 }
 0x1b2   : > { %4988 = vmatpush3.xpose.msk.msra.mxu1 %vm470_vm0, %v960_v6  ;;  %v8587_v6 = vld [vmem:[#allocation39_spill] sm:$0xff] }
 0x1b3   : > { %4989 = vmatprep.subr.msk.mxu1 %vm470_vm0, %v958_v33 }
 0x1b6   : > { %4990 = vmatpush3.xpose.msk.msra.mxu1 %vm470_vm0, %v958_v33  ;;  %v1357_v33 = vpop.permute.xlu0 %1356 }
 0x1b7   : > { %4991 = vmatprep.subr.msk.mxu1 %vm470_vm0, %v956_v0 }
 0x1ba   : > { %4992 = vmatpush3.xpose.msk.msra.mxu1 %vm470_vm0, %v956_v0  ;;  %v8590_v0 = vld [vmem:[#allocation41_spill] sm:$0xff] }
 0x1bb   : > { %5041 = vmatprep.subr.msk.mxu1 %vm470_vm0, %v1377_v21 }
 0x1bd   : > { %4994 = vmatmul.mubr.msk.f32.vlgmr.msra.gmra.mxu1 %vm470_vm0, %v8564_v61 }
 0x1be   : > { %5042 = vmatpush3.xpose.msk.msra.mxu1 %vm470_vm0, %v1377_v21  ;;  %4996 = vmatprep.mubr.msk.f32.mxu1 %vm470_vm0, %v8565_v47  ;;  %v8583_v21 = vld [vmem:[#allocation12_spill] sm:$0xff] }
 0x1bf   : > { %5043 = vmatprep.subr.msk.mxu1 %vm470_vm0, %v1375_v51  ;;  %1757 = vrot.lane.b32.xlu1 %v8583_v21, %s5713_s19  ;;  %v8600_v21 = vld [vmem:[#allocation48_spill] sm:$0xff] }
 0x1c1   : > { %4997 = vmatmul.mubr.msk.f32.gmra.mxu1 %vm470_vm0, %v8566_v25 }
 0x1c2   : > { %5044 = vmatpush3.xpose.msk.msra.mxu1 %vm470_vm0, %v1375_v51  ;;  %4999 = vmatprep.mubr.msk.f32.mxu1 %vm470_vm0, %v8567_v48  ;;  %v8585_v51 = vld [vmem:[#allocation38_spill] sm:$0xff] }
 0x1c3   : > { %5045 = vmatprep.subr.msk.mxu1 %vm470_vm0, %v1373_v55  ;;  %1755 = vrot.lane.b32.xlu1 %v8586_v52, %s5713_s19 }
 0x1c5   : > { %5000 = vmatmul.mubr.msk.f32.gmra.mxu1 %vm470_vm0, %v8569_v15 }
 0x1c6   : > { %5046 = vmatpush3.xpose.msk.msra.mxu1 %vm470_vm0, %v1373_v55  ;;  %5002 = vmatprep.mubr.msk.f32.mxu1 %vm470_vm0, %v8570_v39  ;;  %v1355_v55 = vpop.permute.xlu0 %1354 }
 0x1c7   : > { %5047 = vmatprep.subr.msk.mxu1 %vm470_vm0, %v1371_v53 }
 0x1c9   : > { %5003 = vmatmul.mubr.msk.f32.gmra.mxu1 %vm470_vm0, %v8572_v41 }
 0x1ca   : > { %5048 = vmatpush3.xpose.msk.msra.mxu1 %vm470_vm0, %v1371_v53  ;;  %5005 = vmatprep.mubr.msk.f32.mxu1 %vm470_vm0, %v8573_v44  ;;  %v8588_v53 = vld [vmem:[#allocation40_spill] sm:$0xff] }
 0x1cb   : > { %5049 = vmatprep.subr.msk.mxu1 %vm470_vm0, %v1369_v30 }
 0x1cd   : > { %5006 = vmatmul.mubr.msk.f32.gmra.mxu1 %vm470_vm0, %v8575_v17 }
 0x1ce   : > { %5050 = vmatpush3.xpose.msk.msra.mxu1 %vm470_vm0, %v1369_v30  ;;  %5008 = vmatprep.mubr.msk.f32.mxu1 %vm470_vm0, %v8576_v26  ;;  %v8589_v30 = vld [vmem:[#allocation14_spill] sm:$0xff] }
 0x1cf   : > { %5051 = vmatprep.subr.msk.mxu1 %vm470_vm0, %v1367_v11  ;;  %1753 = vrot.lane.b32.xlu1 %v8589_v30, %s5713_s19  ;;  %v8602_v30 = vld [vmem:[#allocation49_spill] sm:$0xff] }
 0x1d1   : > { %5009 = vmatmul.mubr.msk.f32.gmra.mxu1 %vm470_vm0, %v8578_v31 }
 0x1d2   : > { %5052 = vmatpush3.xpose.msk.msra.mxu1 %vm470_vm0, %v1367_v11  ;;  %5011 = vmatprep.mubr.msk.f32.mxu1 %vm470_vm0, %v8579_v32  ;;  %v8591_v11 = vld [vmem:[#allocation42_spill] sm:$0xff] }
 0x1d3   : > { %5053 = vmatprep.subr.msk.mxu1 %vm470_vm0, %v1365_v60  ;;  %1751 = vrot.lane.b32.xlu1 %v8592_v36, %s5713_s19  ;;  %v8603_v36 = vld [vmem:[#allocation50_spill] sm:$0xff] }
 0x1d5   : > { %5012 = vmatmul.mubr.msk.f32.gmra.mxu1 %vm470_vm0, %v8581_v1 }
 0x1d6   : > { %5054 = vmatpush3.xpose.msk.msra.mxu1 %vm470_vm0, %v1365_v60  ;;  %5014 = vmatprep.mubr.msk.f32.mxu1 %vm470_vm0, %v8582_v57  ;;  %v1353_v60 = vpop.permute.xlu0 %1352 }
 0x1d7   : > { %5055 = vmatprep.subr.msk.mxu1 %vm470_vm0, %v1363_v16 }
 0x1d9   : > { %5015 = vmatmul.mubr.msk.f32.gmra.mxu1 %vm470_vm0, %v8584_v22 }
 0x1da   : > { %5056 = vmatpush3.xpose.msk.msra.mxu1 %vm470_vm0, %v1363_v16  ;;  %5017 = vmatprep.mubr.msk.f32.mxu1 %vm470_vm0, %v8585_v51  ;;  %v8593_v16 = vld [vmem:[#allocation43_spill] sm:$0xff]  ;;  %v1351_v42 = vpop.permute.xlu0 %1350 }
 0x1db   : > { %5057 = vmatprep.subr.msk.mxu1 %vm470_vm0, %v1361_v63 }
 0x1dd   : > { %5018 = vmatmul.mubr.msk.f32.gmra.mxu1 %vm470_vm0, %v8587_v6  ;;  %v6770_v5 = vpop.permute.xlu1 %1767 }
 0x1de   : > { %5058 = vmatpush3.xpose.msk.msra.mxu1 %vm470_vm0, %v1361_v63  ;;  %5020 = vmatprep.mubr.msk.f32.mxu1 %vm470_vm0, %v8588_v53  ;;  %v8595_v63 = vld [vmem:[#allocation16_spill] sm:$0xff]  ;;  %v1349_v52 = vpop.permute.xlu0 %1348 }
 0x1df   : > { %5059 = vmatprep.subr.msk.mxu1 %vm470_vm0, %v1359_v3  ;;  %1749 = vrot.lane.b32.xlu1 %v8595_v63, %s5713_s19 }
 0x1e1   : > { %5021 = vmatmul.mubr.msk.f32.gmra.mxu1 %vm470_vm0, %v8590_v0 }
 0x1e2   : > { %5060 = vmatpush3.xpose.msk.msra.mxu1 %vm470_vm0, %v1359_v3  ;;  %5023 = vmatprep.mubr.msk.f32.mxu1 %vm470_vm0, %v8591_v11  ;;  %v8597_v3 = vld [vmem:[#allocation46_spill] sm:$0xff]  ;;  %v1347_v63 = vpop.permute.xlu0 %1346 }
 0x1e3   : > { %5061 = vmatprep.subr.msk.mxu1 %vm470_vm0, %v1357_v33  ;;  %1747 = vrot.lane.b32.xlu1 %v8598_v10, %s5713_s19  ;;  %v8605_v10 = vld [vmem:[#allocation51_spill] sm:$0xff] }
 0x1e5   : > { %5024 = vmatmul.mubr.msk.f32.gmra.mxu1 %vm470_vm0, %v8593_v16 }
 0x1e6   : > { %5062 = vmatpush3.xpose.msk.msra.mxu1 %vm470_vm0, %v1357_v33  ;;  %5026 = vmatprep.mubr.msk.f32.mxu1 %vm470_vm0, %v8594_v43  ;;  %v8599_v33 = vld [vmem:[#allocation47_spill] sm:$0xff] }
 0x1e7   : > { %5063 = vmatprep.subr.msk.mxu1 %vm470_vm0, %v1355_v55 }
 0x1e9   : > { %5027 = vmatmul.mubr.msk.f32.gmra.mxu1 %vm470_vm0, %v8596_v56 }
 0x1ea   : > { %5064 = vmatpush3.xpose.msk.msra.mxu1 %vm470_vm0, %v1355_v55  ;;  %5029 = vmatprep.mubr.msk.f32.mxu1 %vm470_vm0, %v8597_v3  ;;  %v8601_v55 = vld [vmem:[#allocation18_spill] sm:$0xff] }
 0x1eb   : > { %5065 = vmatprep.subr.msk.mxu1 %vm470_vm0, %v1353_v60  ;;  %1745 = vrot.lane.b32.xlu1 %v8601_v55, %s5713_s19  ;;  %v8606_v55 = vld [vmem:[#allocation52_spill] sm:$0xff] }
 0x1ed   : > { %5030 = vmatmul.mubr.msk.f32.gmra.mxu1 %vm470_vm0, %v8599_v33 }
 0x1ee   : > { %5066 = vmatpush3.xpose.msk.msra.mxu1 %vm470_vm0, %v1353_v60  ;;  %5032 = vmatprep.mubr.msk.f32.mxu1 %vm470_vm0, %v8600_v21  ;;  %v8604_v60 = vld [vmem:[#allocation19_spill] sm:$0xff] }
 0x1ef   : > { %5067 = vmatprep.subr.msk.mxu1 %vm470_vm0, %v1351_v42  ;;  %1743 = vrot.lane.b32.xlu1 %v8604_v60, %s5713_s19  ;;  %v6614_v60 = vld [vmem:[%s8276_s1] sm:$0xff] }
 0x1f0   : > { %8609 = vst [vmem:[#allocation6_spill] sm:$0xff] %v6614_v60 }
 0x1f1   : > { %5033 = vmatmul.mubr.msk.f32.gmra.mxu1 %vm470_vm0, %v8602_v30 }
 0x1f2   : > { %5068 = vmatpush3.xpose.msk.msra.mxu1 %vm470_vm0, %v1351_v42  ;;  %5035 = vmatprep.mubr.msk.f32.mxu1 %vm470_vm0, %v8603_v36  ;;  %v8607_v42 = vld [vmem:[#allocation20_spill] sm:$0xff] }
 0x1f3   : > { %5069 = vmatprep.subr.msk.mxu1 %vm470_vm0, %v1349_v52  ;;  %1741 = vrot.lane.b32.xlu1 %v8607_v42, %s5713_s19  ;;  %v8611_v42 = vld [vmem:[#allocation22_spill] sm:$0xff] }
 0x1f5   : > { %5036 = vmatmul.mubr.msk.f32.gmra.mxu1 %vm470_vm0, %v8605_v10 }
 0x1f6   : > { %5070 = vmatpush3.xpose.msk.msra.mxu1 %vm470_vm0, %v1349_v52  ;;  %5038 = vmatprep.mubr.msk.f32.mxu1 %vm470_vm0, %v8606_v55  ;;  %v8610_v52 = vld [vmem:[#allocation21_spill] sm:$0xff] }
 0x1f7   : > { %5071 = vmatprep.subr.msk.mxu1 %vm470_vm0, %v1347_v63  ;;  %1739 = vrot.lane.b32.xlu1 %v8610_v52, %s5713_s19  ;;  %v6748_v52 = vld [vmem:[%s5813_s16 + $0xb8] sm:$0xff] }
 0x1f8   : > { %8624 = vst [vmem:[#allocation31_spill] sm:$0xff] %v6748_v52 }
 0x1f9   : > { %5039 = vmatmul.mubr.msk.f32.gmra.mxu1 %vm470_vm0, %v8608_v12 }
 0x1fa   : > { %5072 = vmatpush3.xpose.msk.msra.mxu1 %vm470_vm0, %v1347_v63  ;;  %5073 = vmatprep.mubr.msk.f32.mxu1 %vm470_vm0, %v6614_v60  ;;  %v6741_v63 = vld [vmem:[%s5813_s16 + $0xc8] sm:$0xff]  ;;  %v8627_v60 = vld [vmem:[#allocation59_spill] sm:$0xff] }
 0x1fb   : > { %1737 = vrot.lane.b32.xlu1 %v8611_v42, %s5713_s19  ;;  %8623 = vst [vmem:[#allocation9_spill] sm:$0xff] %v6741_v63 }
 0x1fd   : > { %5074 = vmatmul.mubr.msk.f32.vlgmr.msra.gmra.mxu1 %vm470_vm0, %v8564_v61  ;;  %v8612_v61 = vld [vmem:[#allocation54_spill] sm:$0xff] }
 0x1fe   : > { %5076 = vmatprep.mubr.msk.f32.mxu1 %vm470_vm0, %v8565_v47 }
 0x201   : > { %5077 = vmatmul.mubr.msk.f32.gmra.mxu1 %vm470_vm0, %v8566_v25 }
 0x202   : > { %5079 = vmatprep.mubr.msk.f32.mxu1 %vm470_vm0, %v8567_v48 }
 0x205   : > { %5080 = vmatmul.mubr.msk.f32.gmra.mxu1 %vm470_vm0, %v8569_v15 }
 0x206   : > { %5082 = vmatprep.mubr.msk.f32.mxu1 %vm470_vm0, %v8570_v39 }
 0x209   : > { %5083 = vmatmul.mubr.msk.f32.gmra.mxu1 %vm470_vm0, %v8572_v41 }
 0x20a   : > { %5085 = vmatprep.mubr.msk.f32.mxu1 %vm470_vm0, %v8573_v44 }
 0x20d   : > { %5086 = vmatmul.mubr.msk.f32.gmra.mxu1 %vm470_vm0, %v8575_v17 }
 0x20e   : > { %5088 = vmatprep.mubr.msk.f32.mxu1 %vm470_vm0, %v8576_v26 }
 0x211   : > { %5089 = vmatmul.mubr.msk.f32.gmra.mxu1 %vm470_vm0, %v8578_v31 }
 0x212   : > { %5091 = vmatprep.mubr.msk.f32.mxu1 %vm470_vm0, %v8579_v32 }
 0x215   : > { %5092 = vmatmul.mubr.msk.f32.gmra.mxu1 %vm470_vm0, %v8581_v1 }
 0x216   : > { %5094 = vmatprep.mubr.msk.f32.mxu1 %vm470_vm0, %v8582_v57 }
 0x219   : > { %5095 = vmatmul.mubr.msk.f32.gmra.mxu1 %vm470_vm0, %v8584_v22 }
 0x21a   : > { %5097 = vmatprep.mubr.msk.f32.mxu1 %vm470_vm0, %v8585_v51 }
 0x21d   : > { %5098 = vmatmul.mubr.msk.f32.gmra.mxu1 %vm470_vm0, %v8587_v6 }
 0x21e   : > { %5100 = vmatprep.mubr.msk.f32.mxu1 %vm470_vm0, %v8588_v53 }
 0x221   : > { %5101 = vmatmul.mubr.msk.f32.gmra.mxu1 %vm470_vm0, %v8590_v0 }
 0x222   : > { %5103 = vmatprep.mubr.msk.f32.mxu1 %vm470_vm0, %v8591_v11  ;;  %v6714_v11 = vld [vmem:[%s5813_s16 + $0xf8] sm:$0xff] }
 0x223   : > { %8619 = vst [vmem:[#allocation28_spill] sm:$0xff] %v6714_v11  ;;  %2549 = vrot.lane.b32.xlu0 %v6714_v11, %s5711_s8 }
 0x225   : > { %5104 = vmatmul.mubr.msk.f32.gmra.mxu1 %vm470_vm0, %v8593_v16 }
 0x226   : > { %5106 = vmatprep.mubr.msk.f32.mxu1 %vm470_vm0, %v8594_v43 }
 0x229   : > { %5107 = vmatmul.mubr.msk.f32.gmra.mxu1 %vm470_vm0, %v8596_v56  ;;  %v6723_v56 = vld [vmem:[%s5813_s16 + $0xe8] sm:$0xff] }
 0x22a   : > { %5109 = vmatprep.mubr.msk.f32.mxu1 %vm470_vm0, %v8597_v3  ;;  %8621 = vst [vmem:[#allocation29_spill] sm:$0xff] %v6723_v56  ;;  %2547 = vrot.lane.b32.xlu1 %v6723_v56, %s5711_s8  ;;  %v6758_v56 = vld [vmem:[%s5813_s16 + $0x98] sm:$0xff] }
 0x22b   : > { %8626 = vst [vmem:[#allocation10_spill] sm:$0xff] %v6758_v56 }
 0x22d   : > { %5110 = vmatmul.mubr.msk.f32.gmra.mxu1 %vm470_vm0, %v8599_v33 }
 0x22e   : > { %5112 = vmatprep.mubr.msk.f32.mxu1 %vm470_vm0, %v8600_v21  ;;  %v6732_v21 = vld [vmem:[%s5813_s16 + $0xd8] sm:$0xff]  ;;  %2543 = vrot.lane.b32.xlu1 %v6741_v63, %s5711_s8 }
 0x22f   : > { %8622 = vst [vmem:[#allocation30_spill] sm:$0xff] %v6732_v21  ;;  %2545 = vrot.lane.b32.xlu0 %v6732_v21, %s5711_s8 }
 0x231   : > { %5113 = vmatmul.mubr.msk.f32.gmra.mxu1 %vm470_vm0, %v8602_v30 }
 0x232   : > { %5115 = vmatprep.mubr.msk.f32.mxu1 %vm470_vm0, %v8603_v36 }
 0x233   : > { %2541 = vrot.lane.b32.xlu0 %v6748_v52, %s5711_s8  ;;  %v6764_v52 = vld [vmem:[%s5813_s16 + $0x88] sm:$0xff] }
 0x234   : > { %8628 = vst [vmem:[#allocation33_spill] sm:$0xff] %v6764_v52 }
 0x235   : > { %5116 = vmatmul.mubr.msk.f32.gmra.mxu1 %vm470_vm0, %v8605_v10 }
 0x236   : > { %5118 = vmatprep.mubr.msk.f32.mxu1 %vm470_vm0, %v8606_v55 }
 0x237   : > { %2537 = vrot.lane.b32.xlu0 %v6758_v56, %s5711_s8 }
 0x239   : > { %5119 = vmatmul.mubr.msk.f32.gmra.mxu1 %vm470_vm0, %v8608_v12 }
 0x23a   : > { %1731 = vmatprep.mubr.f32.mxu1 %v8612_v61 }
 0x23b   : > { %2533 = vrot.lane.b32.xlu0 %v6778_v37, %s5711_s8 }
 0x23d   : > { %v6685_v47 = vpop.f32.mrf.mxu1 }
 0x23e   : > { %8613 = vst [vmem:[#allocation23_spill] sm:$0xff] %v6685_v47  ;;  %v6753_v47 = vld [vmem:[%s5813_s16 + $0xa8] sm:$0xff] }
 0x23f   : > { %v6687_v25 = vpop.f32.mrf.mxu1  ;;  %8625 = vst [vmem:[#allocation32_spill] sm:$0xff] %v6753_v47  ;;  %2539 = vrot.lane.b32.xlu1 %v6753_v47, %s5711_s8  ;;  %v8630_v47 = vld [vmem:[#allocation58_spill] sm:$0xff] }
 0x240   : > { %8614 = vst [vmem:[#allocation24_spill] sm:$0xff] %v6687_v25 }
 0x243   : > { %2535 = vrot.lane.b32.xlu1 %v6764_v52, %s5711_s8 }
 0x27d   : > { %v6689_v48 = vpop.f32.mrf.mxu1 }
 0x27e   : > { %8615 = vst [vmem:[#allocation25_spill] sm:$0xff] %v6689_v48 }
 0x27f   : > { %v6691_v15 = vpop.f32.mrf.mxu1 }
 0x280   : > { %8616 = vst [vmem:[#allocation26_spill] sm:$0xff] %v6691_v15 }
 0x281   : > { %v6693_v39 = vpop.f32.mrf.mxu1 }
 0x283   : > { %v6695_v41 = vpop.f32.mrf.mxu1 }
 0x284   : > { %8617 = vst [vmem:[#allocation7_spill] sm:$0xff] %v6695_v41 }
 0x285   : > { %v6697_v44 = vpop.f32.mrf.mxu1 }
 0x287   : > { %v6699_v17 = vpop.f32.mrf.mxu1 }
 0x289   : > { %v6701_v12 = vpop.f32.mrf.mxu1 }
 0x28b   : > { %v6703_v26 = vpop.f32.mrf.mxu1 }
 0x28d   : > { %v6705_v31 = vpop.f32.mrf.mxu1 }
 0x28f   : > { %v6707_v32 = vpop.f32.mrf.mxu1 }
 0x291   : > { %v5010_v1 = vpop.f32.mrf.mxu1 }
 0x293   : > { %v6709_v57 = vpop.f32.mrf.mxu1 }
 0x295   : > { %v5013_v22 = vpop.f32.mrf.mxu1 }
 0x297   : > { %v1145_v51 = vpop.f32.mrf.mxu1 }
 0x299   : > { %v5016_v6 = vpop.f32.mrf.mxu1 }
 0x29a   : > { %v1161_v11 = vadd.f32 %v5016_v6, %v8627_v60  ;;  %v1151_v6 = vadd.f32 %v5013_v22, %v6325_v27 }
 0x29b   : > { %v1155_v53 = vpop.f32.mrf.mxu1 }
 0x29c   : > { %v1156_v20 = vadd.f32 %v1155_v53, %v8630_v47  ;;  %v1259_v60 = vmax.f32 %v1161_v11, 0.0  ;;  %v1146_v53 = vadd.f32 %v1145_v51, %v6335_v35 }
 0x29d   : > { %v6711_v0 = vpop.f32.mrf.mxu1 }
 0x29e   : > { %8618 = vst [vmem:[#allocation27_spill] sm:$0xff] %v6711_v0 }
 0x29f   : > { %v6718_v16 = vpop.f32.mrf.mxu1 }
 0x2a0   : > { %8620 = vst [vmem:[#allocation8_spill] sm:$0xff] %v6718_v16 }
 0x2a1   : > { %v6720_v43 = vpop.f32.mrf.mxu1 }
 0x2a3   : > { %v6727_v3 = vpop.f32.mrf.mxu1 }
 0x2a5   : > { %v6729_v33 = vpop.f32.mrf.mxu1 }
 0x2a7   : > { %v6736_v30 = vpop.f32.mrf.mxu1 }
 0x2a9   : > { %v6738_v36 = vpop.f32.mrf.mxu1 }
 0x2ab   : > { %v6745_v10 = vpop.f32.mrf.mxu1 }
 0x2ad   : > { %v5031_v55 = vpop.f32.mrf.mxu1 }
 0x2ae   : > { %v1211_v51 = vadd.f32 %v5031_v55, %v6355_v28 }
 0x2af   : > { %v1205_v42 = vpop.f32.mrf.mxu1 }
 0x2b1   : > { %v5034_v25 = vpop.f32.mrf.mxu1 }
 0x2b2   : > { %v1221_v22 = vadd.f32 %v5034_v25, %v6345_v23  ;;  %v1256_v25 = vmax.f32 %v1146_v53, 0.0 }
 0x2b3   : > { %v1215_v61 = vpop.f32.mrf.mxu1 }
 0x2b5   : > { %v5037_v21 = vpop.f32.mrf.mxu1 }
 0x2b6   : > { %v1231_v0 = vadd.f32 %v5037_v21, %v6327_v29  ;;  %v1141_v21 = vadd.f32 %v5010_v1, %v6343_v24 }
 0x2b7   : > { %v1225_v63 = vpop.f32.mrf.mxu1 }
 0x2b8   : > { %v1273_v11 = vmax.f32 %v1231_v0, 0.0  ;;  %v1271_v0 = vmax.f32 %v1221_v22, 0.0  ;;  %v1201_v22 = vadd.f32 %v6738_v36, %v6373_v2  ;;  %v1116_v36 = vadd.f32 %v6703_v26, %v6377_v62 }
 0x2b9   : > { %v5040_v15 = vpop.f32.mrf.mxu1  ;;  %v1186_v26 = vadd.f32 %v6736_v30, %v6392_v49  ;;  %v1101_v30 = vadd.f32 %v6693_v39, %v6399_v54 }
 0x2ba   : > { %v1241_v16 = vadd.f32 %v5040_v15, %v8629_v40  ;;  %v1226_v15 = vadd.f32 %v1225_v63, %v6337_v46 }
 0x2bb   : > { %v1235_v48 = vpop.f32.mrf.mxu1 }
 0x2bc   : > { %v1275_v56 = vmax.f32 %v1241_v16, 0.0  ;;  %v1236_v50 = vadd.f32 %v1235_v48, %v6307_v38  ;;  %v1258_v16 = vmax.f32 %v1156_v20, 0.0  ;;  %v1216_v20 = vadd.f32 %v1215_v61, %v6349_v18 }
 0x2bd   : > { %v6775_v41 = vpop.f32.mrf.mxu1  ;;  %v1255_v61 = vmax.f32 %v1141_v21, 0.0  ;;  %v1269_v21 = vmax.f32 %v1211_v51, 0.0 }
 0x2be   : > { %8631 = vst [vmem:[#allocation34_spill] sm:$0xff] %v6775_v41  ;;  %v1274_v40 = vmax.f32 %v1236_v50, 0.0  ;;  %4348 = vmatprep.subr.mxu0 %v1275_v56  ;;  %v1257_v41 = vmax.f32 %v1151_v6, 0.0  ;;  %v6790_v50 = vpop.permute.xlu1 %1765  ;;  %v6793_v56 = vld [vmem:[%s5813_s16 + $0x68] sm:$0xff]  ;;  %v1131_v6 = vadd.f32 %v6705_v31, %v6353_v14 }
 0x2bf   : > { %4349 = vmatpush3.msra.mxu0 %v1259_v60  ;;  %v6784_v48 = vpop.f32.mrf.mxu1  ;;  %8635 = vst [vmem:[#allocation12_spill] sm:$0xff] %v6793_v56  ;;  %v1272_v60 = vmax.f32 %v1226_v15, 0.0  ;;  %2531 = vrot.lane.b32.xlu1 %v6793_v56, %s5711_s8 }
 0x2c0   : > { %8633 = vst [vmem:[#allocation35_spill] sm:$0xff] %v6784_v48  ;;  %4350 = vmatprep.subr.mxu0 %v1274_v40  ;;  %v1136_v40 = vadd.f32 %v6709_v57, %v6347_v34  ;;  %v1270_v57 = vmax.f32 %v1216_v20, 0.0  ;;  %v1253_v20 = vmax.f32 %v1131_v6, 0.0  ;;  %v1267_v6 = vmax.f32 %v1201_v22, 0.0 }
 0x2c1   : > { %4351 = vmatpush3.msra.mxu0 %v1258_v16  ;;  %v6788_v63 = vpop.f32.mrf.mxu1  ;;  %v6808_v16 = vld [vmem:[%s5813_s16 + $0x58] sm:$0xff] }
 0x2c2   : > { %8634 = vst [vmem:[#allocation36_spill] sm:$0xff] %v6788_v63  ;;  %4352 = vmatprep.subr.mxu0 %v1273_v11  ;;  %8637 = vst [vmem:[#allocation38_spill] sm:$0xff] %v6808_v16  ;;  %v1206_v11 = vadd.f32 %v1205_v42, %v6365_v8  ;;  %2529 = vrot.lane.b32.xlu0 %v6808_v16, %s5711_s8  ;;  %v1254_v55 = vmax.f32 %v1136_v40, 0.0  ;;  %v6817_v53 = vpop.permute.xlu1 %1763  ;;  %v1121_v42 = vadd.f32 %v6701_v12, %v6371_v19 }
 0x2c3   : > { %4353 = vmatpush3.msra.mxu0 %v1257_v41  ;;  %v6800_v1 = vpop.f32.mrf.mxu1  ;;  %v1126_v41 = vadd.f32 %v6707_v32, %v6363_v9  ;;  %v1196_v32 = vadd.f32 %v6745_v10, %v6379_v13  ;;  %v1111_v10 = vadd.f32 %v6697_v44, %v6381_v59  ;;  %v1106_v44 = vadd.f32 %v6699_v17, %v6388_v4 }
 0x2c4   : > { %8636 = vst [vmem:[#allocation37_spill] sm:$0xff] %v6800_v1  ;;  %4354 = vmatprep.subr.mxu0 %v1272_v60  ;;  %v1268_v40 = vmax.f32 %v1206_v11, 0.0  ;;  %v1176_v17 = vadd.f32 %v6727_v3, %v6416_v45  ;;  %v8645_v3 = vld [vmem:[#allocation66_spill] sm:$0xff]  ;;  %v1247_v1 = vmax.f32 %v1101_v30, 0.0 }
 0x2c5   : > { %4355 = vmatpush3.msra.mxu0 %v1256_v25  ;;  %v6805_v15 = vpop.f32.mrf.mxu1  ;;  %v6826_v25 = vld [vmem:[%s5813_s16 + $0x48] sm:$0xff]  ;;  %v1252_v51 = vmax.f32 %v1126_v41, 0.0  ;;  %v1266_v41 = vmax.f32 %v1196_v32, 0.0 }
 0x2c6   : > { %4356 = vmatprep.subr.mxu0 %v1271_v0  ;;  %8639 = vst [vmem:[#allocation39_spill] sm:$0xff] %v6826_v25  ;;  %2527 = vrot.lane.b32.xlu1 %v6826_v25, %s5711_s8  ;;  %v1191_v0 = vadd.f32 %v6729_v33, %v6383_v58  ;;  %v1250_v33 = vmax.f32 %v1116_v36, 0.0  ;;  %v1264_v36 = vmax.f32 %v1186_v26, 0.0  ;;  %v8646_v26 = vld [vmem:[#allocation25_spill] sm:$0xff]  ;;  %v1262_v63 = vmax.f32 %v1176_v17, 0.0 }
 0x2c7   : > { %4357 = vmatpush3.msra.mxu0 %v1255_v61  ;;  %v6815_v31 = vpop.f32.mrf.mxu1  ;;  %v1251_v61 = vmax.f32 %v1121_v42, 0.0 }
 0x2c8   : > { %8638 = vst [vmem:[#allocation13_spill] sm:$0xff] %v6815_v31  ;;  %4358 = vmatprep.subr.mxu0 %v1270_v57  ;;  %v6842_v57 = vpop.permute.xlu1 %1761  ;;  %v1265_v42 = vmax.f32 %v1191_v0, 0.0 }
 0x2c9   : > { %4359 = vmatpush3.msra.mxu0 %v1254_v55  ;;  %v6823_v60 = vpop.f32.mrf.mxu1  ;;  %v6845_v55 = vld [vmem:[%s5813_s16 + $0x38] sm:$0xff] }
 0x2ca   : > { %4360 = vmatprep.subr.mxu0 %v1269_v21  ;;  %8640 = vst [vmem:[#allocation40_spill] sm:$0xff] %v6845_v55  ;;  %2525 = vrot.lane.b32.xlu0 %v6845_v55, %s5711_s8  ;;  %v1181_v21 = vadd.f32 %v6720_v43, %v6402_v7  ;;  %v8641_v43 = vld [vmem:[#allocation64_spill] sm:$0xff]  ;;  %v6892_v7 = vld [vmem:[%s5813_s16 + $0x8] sm:$0xff] }
 0x2cb   : > { %4361 = vmatpush3.msra.mxu0 %v1253_v20  ;;  %v6834_v12 = vpop.f32.mrf.mxu1  ;;  %v1249_v20 = vmax.f32 %v1111_v10, 0.0 }
 0x2cc   : > { %4362 = vmatprep.subr.mxu0 %v1268_v40  ;;  %v6862_v40 = vld [vmem:[%s5813_s16 + $0x28] sm:$0xff]  ;;  %v6872_v10 = vpop.permute.xlu1 %1759  ;;  %v1263_v48 = vmax.f32 %v1181_v21, 0.0  ;;  %v8649_v21 = vld [vmem:[#allocation68_spill] sm:$0xff] }
 0x2cd   : > { %4363 = vmatpush3.msra.mxu0 %v1252_v51  ;;  %v6840_v11 = vpop.f32.mrf.mxu1  ;;  %2523 = vrot.lane.b32.xlu1 %v6862_v40, %s5711_s8  ;;  %v8642_v51 = vld [vmem:[#allocation7_spill] sm:$0xff] }
 0x2ce   : > { %4364 = vmatprep.subr.mxu0 %v1267_v6  ;;  %v1096_v0 = vadd.f32 %v8642_v51, %v8641_v43  ;;  %v1248_v6 = vmax.f32 %v1106_v44, 0.0  ;;  %v6881_v51 = vld [vmem:[%s5813_s16 + $0x18] sm:$0xff]  ;;  %v8647_v44 = vld [vmem:[#allocation69_spill] sm:$0xff]  ;;  %s5714_s16 = smov [#allocation3]  }
 0x2cf   : > { %4365 = vmatpush3.msra.mxu0 %v1251_v61  ;;  %v6853_v22 = vpop.f32.mrf.mxu1  ;;  %v8643_v61 = vld [vmem:[#allocation67_spill] sm:$0xff]  ;;  %2521 = vrot.lane.b32.xlu0 %v6881_v51, %s5711_s8 }
 0x2d0   : > { %4366 = vmatprep.subr.mxu0 %v1266_v41  ;;  %v8644_v41 = vld [vmem:[#allocation27_spill] sm:$0xff]  ;;  %v1758_v54 = vpop.permute.xlu1 %1757 }
 0x2d1   : > { %4367 = vmatpush3.msra.mxu0 %v1250_v33  ;;  %v6859_v32 = vpop.f32.mrf.mxu1  ;;  %v1171_v33 = vadd.f32 %v8644_v41, %v8643_v61  ;;  %v1246_v61 = vmax.f32 %v1096_v0, 0.0  ;;  %2519 = vrot.lane.b32.xlu1 %v6892_v7, %s5711_s8  ;;  %v8653_v0 = vld [vmem:[#allocation55_spill] sm:$0xff]  ;;  %s5652_s8 = sshll.u32 %s5714_s16, 4  ;;  %s5653_s8 = int_to_ptr.vmem [resolvable:$false] %s5652_s8 }
 0x2d2   : > { %4368 = vmatprep.subr.mxu0 %v1265_v42  ;;  %v1091_v42 = vadd.f32 %v8646_v26, %v8645_v3  ;;  %s5654_s27 = scalar_lea.vmem %s5653_s8, 256 }
 0x2d3   : > { %4369 = vmatpush3.msra.mxu0 %v1249_v20  ;;  %v6870_v39 = vpop.f32.mrf.mxu1  ;;  %v8648_v20 = vld [vmem:[#allocation8_spill] sm:$0xff] }
 0x2d4   : > { %4370 = vmatprep.subr.mxu0 %v1264_v36  ;;  %v1166_v43 = vadd.f32 %v8648_v20, %v8647_v44  ;;  %v8650_v36 = vld [vmem:[#allocation26_spill] sm:$0xff]  ;;  %v1245_v26 = vmax.f32 %v1091_v42, 0.0  ;;  %v8656_v42 = vld [vmem:[#allocation29_spill] sm:$0xff] }
 0x2d5   : > { %4371 = vmatpush3.msra.mxu0 %v1248_v6  ;;  %v6878_v45 = vpop.f32.mrf.mxu1  ;;  %v1086_v41 = vadd.f32 %v8650_v36, %v8649_v21  ;;  %v1261_v6 = vmax.f32 %v1171_v33, 0.0  ;;  %v8655_v33 = vld [vmem:[#allocation6_spill] sm:$0xff]  ;;  %2938 = vrot.lane.b32.xlu1 %v8656_v42, %s5712_s15 }
 0x2d6   : > { %4372 = vmatprep.subr.mxu0 %v1263_v48  ;;  %v1260_v17 = vmax.f32 %v1166_v43, 0.0  ;;  %v8664_v21 = vld [vmem:[#allocation10_spill] sm:$0xff] }
 0x2d7   : > { %4373 = vmatpush3.msra.mxu0 %v1247_v1  ;;  %v6889_v30 = vpop.f32.mrf.mxu1  ;;  %v1244_v48 = vmax.f32 %v1086_v41, 0.0  ;;  %v8651_v1 = vld [vmem:[#allocation28_spill] sm:$0xff]  ;;  %v8658_v41 = vld [vmem:[#allocation30_spill] sm:$0xff] }
 0x2d8   : > { %4374 = vmatprep.subr.mxu0 %v1262_v63  ;;  %2940 = vrot.lane.b32.xlu0 %v8651_v1, %s5712_s15 }
 0x2d9   : > { %4375 = vmatpush3.msra.mxu0 %v1246_v61  ;;  %v5096_v3 = vpop.f32.mrf.mxu1  ;;  %v1756_v61 = vpop.permute.xlu1 %1755 }
 0x2da   : > { %4376 = vmatprep.subr.mxu0 %v1261_v6 }
 0x2db   : > { %4377 = vmatpush3.msra.mxu0 %v1245_v26  ;;  %v1546_v20 = vpop.f32.mrf.mxu1 }
 0x2dc   : > { %4378 = vmatprep.subr.mxu0 %v1260_v17  ;;  %2936 = vrot.lane.b32.xlu0 %v8658_v41, %s5712_s15 }
 0x2dd   : > { %4379 = vmatpush3.msra.mxu0 %v1244_v48  ;;  %v6898_v63 = vpop.f32.mrf.mxu1  ;;  %v1754_v17 = vpop.permute.xlu1 %1753  ;;  %v8661_v48 = vld [vmem:[#allocation31_spill] sm:$0xff] }
 0x2de   : > { %8652 = vst [vmem:[#allocation14_spill] sm:$0xff] %v6898_v63  ;;  %1341 = vmatmul.mubr.f32.vlgmr.msra.gmra.mxu0 %v8653_v0  ;;  %5121 = vmatprep.subr.msk.mxu0 %vm470_vm0, %v6770_v5 }
 0x2df   : > { %v6903_v43 = vpop.f32.mrf.mxu1  ;;  %5122 = vmatpush3.xpose.msk.msra.mxu0 %vm470_vm0, %v6770_v5  ;;  %5153 = vmatprep.mubr.msk.f32.mxu0 %vm470_vm0, %v8655_v33  ;;  %v8660_v5 = vld [vmem:[#allocation9_spill] sm:$0xff] }
 0x2e0   : > { %8654 = vst [vmem:[#allocation41_spill] sm:$0xff] %v6903_v43  ;;  %5123 = vmatprep.subr.msk.mxu0 %vm470_vm0, %v6790_v50  ;;  %2934 = vrot.lane.b32.xlu1 %v8660_v5, %s5712_s15 }
 0x2e1   : > { %v6913_v36 = vpop.f32.mrf.mxu1  ;;  %2932 = vrot.lane.b32.xlu0 %v8661_v48, %s5712_s15  ;;  %v1752_v44 = vpop.permute.xlu1 %1751 }
 0x2e2   : > { %8657 = vst [vmem:[#allocation42_spill] sm:$0xff] %v6913_v36 }
 0x2e3   : > { %v6917_v6 = vpop.f32.mrf.mxu1  ;;  %5124 = vmatpush3.xpose.msk.msra.mxu0 %vm470_vm0, %v6790_v50  ;;  %v8663_v50 = vld [vmem:[#allocation32_spill] sm:$0xff] }
 0x2e4   : > { %8659 = vst [vmem:[#allocation15_spill] sm:$0xff] %v6917_v6  ;;  %5125 = vmatprep.subr.msk.mxu0 %vm470_vm0, %v6817_v53  ;;  %2930 = vrot.lane.b32.xlu1 %v8663_v50, %s5712_s15 }
 0x2e5   : > { %v6925_v26 = vpop.f32.mrf.mxu1  ;;  %2928 = vrot.lane.b32.xlu0 %v8664_v21, %s5712_s15  ;;  %v1750_v6 = vpop.permute.xlu1 %1749 }
 0x2e7   : > { %v6929_v33 = vpop.f32.mrf.mxu1  ;;  %5126 = vmatpush3.xpose.msk.msra.mxu0 %vm470_vm0, %v6817_v53 }
 0x2e8   : > { %8662 = vst [vmem:[#allocation43_spill] sm:$0xff] %v6929_v33  ;;  %5127 = vmatprep.subr.msk.mxu0 %vm470_vm0, %v6842_v57  ;;  %2926 = vrot.lane.b32.xlu1 %v6764_v52, %s5712_s15  ;;  %v1547_v33 = vadd.f32 %v1546_v20, %v8630_v47 }
 0x2e9   : > { %v6937_v0 = vpop.f32.mrf.mxu1  ;;  %2924 = vrot.lane.b32.xlu0 %v6778_v37, %s5712_s15 }
 0x2eb   : > { %v6941_v43 = vpop.f32.mrf.mxu1  ;;  %5128 = vmatpush3.xpose.msk.msra.mxu0 %vm470_vm0, %v6842_v57 }
 0x2ec   : > { %5129 = vmatprep.subr.msk.mxu0 %vm470_vm0, %v6872_v10  ;;  %2922 = vrot.lane.b32.xlu1 %v6793_v56, %s5712_s15  ;;  %v1748_v56 = vpop.permute.xlu1 %1747 }
 0x2ed   : > { %v5111_v53 = vpop.f32.mrf.mxu1  ;;  %2920 = vrot.lane.b32.xlu0 %v6808_v16, %s5712_s15  ;;  %v8665_v16 = vld [vmem:[#allocation59_spill] sm:$0xff] }
 0x2ef   : > { %v6951_v63 = vpop.f32.mrf.mxu1  ;;  %5130 = vmatpush3.xpose.msk.msra.mxu0 %vm470_vm0, %v6872_v10 }
 0x2f0   : > { %5131 = vmatprep.subr.msk.mxu0 %vm470_vm0, %v1758_v54  ;;  %2918 = vrot.lane.b32.xlu1 %v6826_v25, %s5712_s15  ;;  %v8666_v25 = vld [vmem:[#allocation57_spill] sm:$0xff] }
 0x2f1   : > { %v5114_v57 = vpop.f32.mrf.mxu1  ;;  %2916 = vrot.lane.b32.xlu0 %v6845_v55, %s5712_s15 }
 0x2f3   : > { %v1606_v36 = vpop.f32.mrf.mxu1  ;;  %5132 = vmatpush3.xpose.msk.msra.mxu0 %vm470_vm0, %v1758_v54  ;;  %v1552_v54 = vadd.f32 %v5096_v3, %v8665_v16  ;;  %v1542_v3 = vadd.f32 %v6878_v45, %v6325_v27  ;;  %v1532_v45 = vadd.f32 %v6859_v32, %v6343_v24 }
 0x2f4   : > { %5133 = vmatprep.subr.msk.mxu0 %vm470_vm0, %v1756_v61  ;;  %2914 = vrot.lane.b32.xlu1 %v6862_v40, %s5712_s15 }
 0x2f5   : > { %v5117_v31 = vpop.f32.mrf.mxu1  ;;  %2912 = vrot.lane.b32.xlu0 %v6881_v51, %s5712_s15  ;;  %v1650_v16 = vmax.f32 %v1552_v54, 0.0  ;;  %v1648_v54 = vmax.f32 %v1542_v3, 0.0 }
 0x2f7   : > { %v1616_v10 = vpop.f32.mrf.mxu1  ;;  %5134 = vmatpush3.xpose.msk.msra.mxu0 %vm470_vm0, %v1756_v61  ;;  %v1622_v61 = vadd.f32 %v5117_v31, %v6327_v29  ;;  %v1649_v31 = vmax.f32 %v1547_v33, 0.0 }
 0x2f8   : > { %5135 = vmatprep.subr.msk.mxu0 %vm470_vm0, %v1754_v17  ;;  %2910 = vrot.lane.b32.xlu1 %v6892_v7, %s5712_s15  ;;  %v1617_v20 = vadd.f32 %v1616_v10, %v6337_v46  ;;  %s229_s15 = sld [smem:[#allocation2]] }
 0x2f9   : > { %v5120_v4 = vpop.f32.mrf.mxu1  ;;  %3331 = vrot.lane.b32.xlu0 %v8651_v1, %s5713_s19 }
 0x2fa   : > { %v1632_v37 = vadd.f32 %v5120_v4, %v8666_v25  ;;  %v1746_v4 = vpop.permute.xlu1 %1745 }
 0x2fb   : > { %v1626_v55 = vpop.f32.mrf.mxu1  ;;  %5136 = vmatpush3.xpose.msk.msra.mxu0 %vm470_vm0, %v1754_v17 }
 0x2fc   : > { %v1666_v49 = vmax.f32 %v1632_v37, 0.0  ;;  %v1627_v52 = vadd.f32 %v1626_v55, %v6307_v38  ;;  %5137 = vmatprep.subr.msk.mxu0 %vm470_vm0, %v1752_v44  ;;  %v1537_v37 = vadd.f32 %v6889_v30, %v6335_v35  ;;  %v1612_v55 = vadd.f32 %v5114_v57, %v6345_v23  ;;  %3329 = vrot.lane.b32.xlu1 %v8656_v42, %s5713_s19 }
 0x2fd   : > { %v1664_v38 = vmax.f32 %v1622_v61, 0.0  ;;  %3327 = vrot.lane.b32.xlu0 %v8658_v41, %s5713_s19  ;;  %v1602_v30 = vadd.f32 %v5111_v53, %v6355_v28 }
 0x2fe   : > { %v1665_v17 = vmax.f32 %v1627_v52, 0.0  ;;  %4431 = vmatprep.subr.mxu1 %v1666_v49  ;;  %v1607_v49 = vadd.f32 %v1606_v36, %v6349_v18  ;;  %v1663_v52 = vmax.f32 %v1617_v20, 0.0  ;;  %v1744_v32 = vpop.permute.xlu1 %1743  ;;  %v1662_v33 = vmax.f32 %v1612_v55, 0.0  ;;  %v8669_v55 = vld [vmem:[#allocation43_spill] sm:$0xff] }
 0x2ff   : > { %4432 = vmatpush3.msra.mxu1 %v1650_v16  ;;  %5138 = vmatpush3.xpose.msk.msra.mxu0 %vm470_vm0, %v1752_v44  ;;  %v1527_v16 = vadd.f32 %v6870_v39, %v6347_v34  ;;  %v1647_v44 = vmax.f32 %v1537_v37, 0.0  ;;  %v1646_v36 = vmax.f32 %v1532_v45, 0.0  ;;  %v1597_v39 = vadd.f32 %v6951_v63, %v6365_v8 }
 0x300   : > { %4433 = vmatprep.subr.mxu1 %v1665_v17  ;;  %5139 = vmatprep.subr.msk.mxu0 %vm470_vm0, %v1750_v6  ;;  %v1661_v57 = vmax.f32 %v1607_v49, 0.0  ;;  %v1660_v10 = vmax.f32 %v1602_v30, 0.0  ;;  %v1512_v63 = vadd.f32 %v6823_v60, %v6371_v19  ;;  %v1582_v60 = vadd.f32 %v6925_v26, %v6383_v58  ;;  %v8671_v26 = vld [vmem:[#allocation60_spill] sm:$0xff]  ;;  %v8672_v49 = vld [vmem:[#allocation13_spill] sm:$0xff]  ;;  %v8674_v30 = vld [vmem:[#allocation42_spill] sm:$0xff] }
 0x301   : > { %4434 = vmatpush3.msra.mxu1 %v1649_v31  ;;  %3325 = vrot.lane.b32.xlu1 %v8660_v5, %s5713_s19  ;;  %v1645_v53 = vmax.f32 %v1527_v16, 0.0  ;;  %v8667_v31 = vld [vmem:[#allocation33_spill] sm:$0xff] }
 0x302   : > { %4435 = vmatprep.subr.mxu1 %v1664_v38  ;;  %v1522_v38 = vadd.f32 %v6840_v11, %v6353_v14  ;;  %3323 = vrot.lane.b32.xlu0 %v8661_v48, %s5713_s19  ;;  %v1592_v11 = vadd.f32 %v6937_v0, %v6373_v2  ;;  %v1742_v3 = vpop.permute.xlu1 %1741  ;;  %v1507_v0 = vadd.f32 %v6834_v12, %v6377_v62  ;;  %v1642_v37 = vmax.f32 %v1512_v63, 0.0  ;;  %v8668_v12 = vld [vmem:[#allocation61_spill] sm:$0xff] }
 0x303   : > { %4436 = vmatpush3.msra.mxu1 %v1648_v54  ;;  %5140 = vmatpush3.xpose.msk.msra.mxu0 %vm470_vm0, %v1750_v6  ;;  %v1517_v6 = vadd.f32 %v6853_v22, %v6363_v9  ;;  %v1587_v22 = vadd.f32 %v6941_v43, %v6379_v13  ;;  %v1502_v43 = vadd.f32 %v6805_v15, %v6381_v59 }
 0x304   : > { %4437 = vmatprep.subr.mxu1 %v1663_v52  ;;  %5141 = vmatprep.subr.msk.mxu0 %vm470_vm0, %v1748_v56  ;;  %v1644_v61 = vmax.f32 %v1522_v38, 0.0  ;;  %v1658_v17 = vmax.f32 %v1592_v11, 0.0  ;;  %v1577_v45 = vadd.f32 %v8669_v55, %v8668_v12  ;;  %v1497_v52 = vadd.f32 %v8672_v49, %v8671_v26  ;;  %v8678_v11 = vld [vmem:[#allocation65_spill] sm:$0xff]  ;;  %v8685_v55 = vld [vmem:[#allocation66_spill] sm:$0xff] }
 0x305   : > { %4438 = vmatpush3.msra.mxu1 %v1647_v44  ;;  %3321 = vrot.lane.b32.xlu1 %v8663_v50, %s5713_s19  ;;  %v1643_v20 = vmax.f32 %v1517_v6, 0.0  ;;  %v1657_v54 = vmax.f32 %v1587_v22, 0.0  ;;  %v1641_v16 = vmax.f32 %v1507_v0, 0.0  ;;  %v8673_v44 = vld [vmem:[#allocation63_spill] sm:$0xff]  ;;  %v1656_v38 = vmax.f32 %v1582_v60, 0.0  ;;  %v8681_v22 = vld [vmem:[#allocation64_spill] sm:$0xff] }
 0x306   : > { %4439 = vmatprep.subr.mxu1 %v1662_v33  ;;  %3319 = vrot.lane.b32.xlu0 %v8664_v21, %s5713_s19  ;;  %v1740_v15 = vpop.permute.xlu1 %1739  ;;  %v1572_v33 = vadd.f32 %v8674_v30, %v8673_v44  ;;  %v1640_v6 = vmax.f32 %v1502_v43, 0.0  ;;  %v8683_v60 = vld [vmem:[#allocation67_spill] sm:$0xff] }
 0x307   : > { %4440 = vmatpush3.msra.mxu1 %v1646_v36  ;;  %5142 = vmatpush3.xpose.msk.msra.mxu0 %vm470_vm0, %v1748_v56  ;;  %v1659_v56 = vmax.f32 %v1597_v39, 0.0  ;;  %v8675_v36 = vld [vmem:[#allocation62_spill] sm:$0xff]  ;;  %v8676_v39 = vld [vmem:[#allocation36_spill] sm:$0xff]  ;;  %v8687_v30 = vld [vmem:[#allocation39_spill] sm:$0xff] }
 0x308   : > { %4441 = vmatprep.subr.mxu1 %v1661_v57  ;;  %5143 = vmatprep.subr.msk.mxu0 %vm470_vm0, %v1746_v4  ;;  %v1492_v57 = vadd.f32 %v8676_v39, %v8675_v36 }
 0x309   : > { %4442 = vmatpush3.msra.mxu1 %v1645_v53  ;;  %3317 = vrot.lane.b32.xlu1 %v8667_v31, %s5713_s19  ;;  %v8677_v53 = vld [vmem:[#allocation12_spill] sm:$0xff] }
 0x30a   : > { %4443 = vmatprep.subr.mxu1 %v1660_v10  ;;  %v8679_v10 = vld [vmem:[#allocation15_spill] sm:$0xff]  ;;  %v1638_v49 = vmax.f32 %v1492_v57, 0.0 }
 0x30b   : > { %4444 = vmatpush3.msra.mxu1 %v1644_v61  ;;  %5144 = vmatpush3.xpose.msk.msra.mxu0 %vm470_vm0, %v1746_v4  ;;  %v8670_v4 = vld [vmem:[#allocation11_spill] sm:$0xff]  ;;  %v1567_v63 = vadd.f32 %v8679_v10, %v8678_v11  ;;  %v8680_v61 = vld [vmem:[#allocation38_spill] sm:$0xff] }
 0x30c   : > { %4445 = vmatprep.subr.mxu1 %v1659_v56  ;;  %5145 = vmatprep.subr.msk.mxu0 %vm470_vm0, %v1744_v32  ;;  %v8682_v56 = vld [vmem:[#allocation37_spill] sm:$0xff]  ;;  %v8692_v10 = vld [vmem:[#allocation35_spill] sm:$0xff] }
 0x30d   : > { %4446 = vmatpush3.msra.mxu1 %v1643_v20  ;;  %3315 = vrot.lane.b32.xlu0 %v8670_v4, %s5713_s19  ;;  %v1487_v0 = vadd.f32 %v8682_v56, %v8681_v22  ;;  %v1639_v20 = vmax.f32 %v1497_v52, 0.0  ;;  %v8688_v52 = vld [vmem:[#allocation69_spill] sm:$0xff] }
 0x30e   : > { %4447 = vmatprep.subr.mxu1 %v1658_v17  ;;  %3313 = vrot.lane.b32.xlu1 %v8677_v53, %s5713_s19  ;;  %v8684_v17 = vld [vmem:[#allocation14_spill] sm:$0xff] }
 0x30f   : > { %4448 = vmatpush3.msra.mxu1 %v1642_v37  ;;  %5146 = vmatpush3.xpose.msk.msra.mxu0 %vm470_vm0, %v1744_v32  ;;  %v1655_v32 = vmax.f32 %v1577_v45, 0.0  ;;  %v1562_v43 = vadd.f32 %v8684_v17, %v8683_v60  ;;  %v1654_v37 = vmax.f32 %v1572_v33, 0.0  ;;  %v8686_v45 = vld [vmem:[#allocation34_spill] sm:$0xff]  ;;  %v8691_v33 = vld [vmem:[#allocation68_spill] sm:$0xff]  ;;  %v1637_v56 = vmax.f32 %v1487_v0, 0.0  ;;  %v7084_v0 = vld [vmem:[%s8276_s1 + $0x8] sm:$0xff] }
 0x310   : > { %4449 = vmatprep.subr.mxu1 %v1657_v54  ;;  %5147 = vmatprep.subr.msk.mxu0 %vm470_vm0, %v1742_v3  ;;  %v1482_v54 = vadd.f32 %v8686_v45, %v8685_v55  ;;  %8694 = vst [vmem:[#allocation44_spill] sm:$0xff] %v7084_v0  ;;  %v7103_v45 = vld [vmem:[%s8276_s1 + $0x18] sm:$0xff] }
 0x311   : > { %4450 = vmatpush3.msra.mxu1 %v1641_v16  ;;  %3311 = vrot.lane.b32.xlu0 %v8680_v61, %s5713_s19  ;;  %v1738_v16 = vpop.permute.xlu1 %1737  ;;  %v1652_v57 = vmax.f32 %v1562_v43, 0.0  ;;  %v7093_v43 = vld [vmem:[%s8276_s1 + $0x10] sm:$0xff]  ;;  %8697 = vst [vmem:[#allocation45_spill] sm:$0xff] %v7103_v45 }
 0x312   : > { %4451 = vmatprep.subr.mxu1 %v1656_v38  ;;  %3309 = vrot.lane.b32.xlu1 %v8687_v30, %s5713_s19  ;;  %v8689_v38 = vld [vmem:[#allocation41_spill] sm:$0xff]  ;;  %8695 = vst [vmem:[#allocation16_spill] sm:$0xff] %v7093_v43 }
 0x313   : > { %4452 = vmatpush3.msra.mxu1 %v1640_v6  ;;  %5148 = vmatpush3.xpose.msk.msra.mxu0 %vm470_vm0, %v1742_v3  ;;  %v1557_v39 = vadd.f32 %v8689_v38, %v8688_v52  ;;  %v1653_v3 = vmax.f32 %v1567_v63, 0.0  ;;  %v8690_v6 = vld [vmem:[#allocation40_spill] sm:$0xff]  ;;  %v7175_v38 = vld [vmem:[%s8276_s1 + $0x58] sm:$0xff] }
 0x314   : > { %4453 = vmatprep.subr.mxu1 %v1655_v32  ;;  %5149 = vmatprep.subr.msk.mxu0 %vm470_vm0, %v1740_v15  ;;  %v1477_v32 = vadd.f32 %v8692_v10, %v8691_v33  ;;  %8705 = vst [vmem:[#allocation19_spill] sm:$0xff] %v7175_v38  ;;  %v7229_v10 = vld [vmem:[%s8276_s1 + $0x88] sm:$0xff] }
 0x315   : > { %4454 = vmatpush3.msra.mxu1 %v1639_v20  ;;  %3307 = vrot.lane.b32.xlu0 %v8690_v6, %s5713_s19  ;;  %v1636_v20 = vmax.f32 %v1482_v54, 0.0  ;;  %v1651_v63 = vmax.f32 %v1557_v39, 0.0  ;;  %v7121_v54 = vld [vmem:[%s8276_s1 + $0x28] sm:$0xff]  ;;  %8711 = vst [vmem:[#allocation22_spill] sm:$0xff] %v7229_v10 }
 0x316   : > { %4455 = vmatprep.subr.mxu1 %v1654_v37  ;;  %3305 = vrot.lane.b32.xlu1 %v6862_v40, %s5713_s19  ;;  %v1635_v17 = vmax.f32 %v1477_v32, 0.0  ;;  %v8696_v37 = vld [vmem:[#allocation54_spill] sm:$0xff]  ;;  %8699 = vst [vmem:[#allocation17_spill] sm:$0xff] %v7121_v54  ;;  %v7193_v39 = vld [vmem:[%s8276_s1 + $0x68] sm:$0xff]  ;;  %v7247_v32 = vld [vmem:[%s8276_s1 + $0x98] sm:$0xff] }
 0x317   : > { %4456 = vmatpush3.msra.mxu1 %v1638_v49  ;;  %5150 = vmatpush3.xpose.msk.msra.mxu0 %vm470_vm0, %v1740_v15  ;;  %v8693_v15 = vld [vmem:[#allocation55_spill] sm:$0xff]  ;;  %8707 = vst [vmem:[#allocation52_spill] sm:$0xff] %v7193_v39  ;;  %8713 = vst [vmem:[#allocation7_spill] sm:$0xff] %v7247_v32 }
 0x318   : > { %4457 = vmatprep.subr.mxu1 %v1653_v3  ;;  %5151 = vmatprep.subr.msk.mxu0 %vm470_vm0, %v1738_v16  ;;  %v7139_v49 = vld [vmem:[%s8276_s1 + $0x38] sm:$0xff] }
 0x319   : > { %4458 = vmatpush3.msra.mxu1 %v1637_v56  ;;  %3303 = vrot.lane.b32.xlu0 %v6881_v51, %s5713_s19  ;;  %8701 = vst [vmem:[#allocation48_spill] sm:$0xff] %v7139_v49  ;;  %v7211_v3 = vld [vmem:[%s8276_s1 + $0x78] sm:$0xff]  ;;  %v7265_v56 = vld [vmem:[%s8276_s1 + $0xa8] sm:$0xff] }
 0x31a   : > { %4459 = vmatprep.subr.mxu1 %v1652_v57  ;;  %3301 = vrot.lane.b32.xlu1 %v6892_v7, %s5713_s19  ;;  %8709 = vst [vmem:[#allocation53_spill] sm:$0xff] %v7211_v3  ;;  %8715 = vst [vmem:[#allocation25_spill] sm:$0xff] %v7265_v56  ;;  %v7283_v57 = vld [vmem:[%s8276_s1 + $0xb8] sm:$0xff] }
 0x31b   : > { %4460 = vmatpush3.msra.mxu1 %v1636_v20  ;;  %5152 = vmatpush3.xpose.msk.msra.mxu0 %vm470_vm0, %v1738_v16  ;;  %v7157_v16 = vld [vmem:[%s8276_s1 + $0x48] sm:$0xff]  ;;  %8717 = vst [vmem:[#allocation26_spill] sm:$0xff] %v7283_v57 }
 0x31c   : > { %4461 = vmatprep.subr.mxu1 %v1651_v63  ;;  %5201 = vmatprep.subr.msk.mxu0 %vm470_vm0, %v8651_v1  ;;  %8703 = vst [vmem:[#allocation49_spill] sm:$0xff] %v7157_v16  ;;  %v7301_v20 = vld [vmem:[%s8276_s1 + $0xc8] sm:$0xff]  ;;  %v7319_v63 = vld [vmem:[%s8276_s1 + $0xd8] sm:$0xff] }
 0x31d   : > { %4462 = vmatpush3.msra.mxu1 %v1635_v17  ;;  %8719 = vst [vmem:[#allocation29_spill] sm:$0xff] %v7301_v20  ;;  %8721 = vst [vmem:[#allocation9_spill] sm:$0xff] %v7319_v63  ;;  %v7337_v17 = vld [vmem:[%s8276_s1 + $0xe8] sm:$0xff] }
 0x31e   : > { %1732 = vmatmul.mubr.f32.vlgmr.msra.gmra.mxu1 %v8693_v15  ;;  %5154 = vmatmul.mubr.msk.f32.vlgmr.msra.gmra.mxu0 %vm470_vm0, %v7084_v0  ;;  %8723 = vst [vmem:[#allocation32_spill] sm:$0xff] %v7337_v17  ;;  %v7355_v15 = vld [vmem:[%s8276_s1 + $0xf8] sm:$0xff] }
 0x31f   : > { %5202 = vmatpush3.xpose.msk.msra.mxu0 %vm470_vm0, %v8651_v1  ;;  %5156 = vmatprep.mubr.msk.f32.mxu0 %vm470_vm0, %v7093_v43  ;;  %v7112_v1 = vld [vmem:[%s8276_s1 + $0x20] sm:$0xff]  ;;  %8725 = vst [vmem:[#allocation57_spill] sm:$0xff] %v7355_v15 }
 0x320   : > { %5203 = vmatprep.subr.msk.mxu0 %vm470_vm0, %v8656_v42  ;;  %2122 = vmatprep.mubr.f32.mxu1 %v8696_v37  ;;  %8698 = vst [vmem:[#allocation46_spill] sm:$0xff] %v7112_v1 }
 0x322   : > { %5157 = vmatmul.mubr.msk.f32.gmra.mxu0 %vm470_vm0, %v7103_v45 }
 0x323   : > { %5204 = vmatpush3.xpose.msk.msra.mxu0 %vm470_vm0, %v8656_v42  ;;  %5159 = vmatprep.mubr.msk.f32.mxu0 %vm470_vm0, %v7112_v1  ;;  %v7130_v42 = vld [vmem:[%s8276_s1 + $0x30] sm:$0xff] }
 0x324   : > { %5205 = vmatprep.subr.msk.mxu0 %vm470_vm0, %v8658_v41  ;;  %8700 = vst [vmem:[#allocation47_spill] sm:$0xff] %v7130_v42 }
 0x326   : > { %5160 = vmatmul.mubr.msk.f32.gmra.mxu0 %vm470_vm0, %v7121_v54 }
 0x327   : > { %5206 = vmatpush3.xpose.msk.msra.mxu0 %vm470_vm0, %v8658_v41  ;;  %5162 = vmatprep.mubr.msk.f32.mxu0 %vm470_vm0, %v7130_v42  ;;  %v7148_v41 = vld [vmem:[%s8276_s1 + $0x40] sm:$0xff] }
 0x328   : > { %5207 = vmatprep.subr.msk.mxu0 %vm470_vm0, %v8660_v5  ;;  %8702 = vst [vmem:[#allocation18_spill] sm:$0xff] %v7148_v41 }
 0x32a   : > { %5163 = vmatmul.mubr.msk.f32.gmra.mxu0 %vm470_vm0, %v7139_v49 }
 0x32b   : > { %5208 = vmatpush3.xpose.msk.msra.mxu0 %vm470_vm0, %v8660_v5  ;;  %5165 = vmatprep.mubr.msk.f32.mxu0 %vm470_vm0, %v7148_v41  ;;  %v7166_v5 = vld [vmem:[%s8276_s1 + $0x50] sm:$0xff] }
 0x32c   : > { %5209 = vmatprep.subr.msk.mxu0 %vm470_vm0, %v8661_v48  ;;  %8704 = vst [vmem:[#allocation50_spill] sm:$0xff] %v7166_v5 }
 0x32e   : > { %5166 = vmatmul.mubr.msk.f32.gmra.mxu0 %vm470_vm0, %v7157_v16 }
 0x32f   : > { %5210 = vmatpush3.xpose.msk.msra.mxu0 %vm470_vm0, %v8661_v48  ;;  %5168 = vmatprep.mubr.msk.f32.mxu0 %vm470_vm0, %v7166_v5  ;;  %v7184_v48 = vld [vmem:[%s8276_s1 + $0x60] sm:$0xff] }
 0x330   : > { %5211 = vmatprep.subr.msk.mxu0 %vm470_vm0, %v8663_v50  ;;  %8706 = vst [vmem:[#allocation51_spill] sm:$0xff] %v7184_v48 }
 0x332   : > { %5169 = vmatmul.mubr.msk.f32.gmra.mxu0 %vm470_vm0, %v7175_v38 }
 0x333   : > { %5212 = vmatpush3.xpose.msk.msra.mxu0 %vm470_vm0, %v8663_v50  ;;  %5171 = vmatprep.mubr.msk.f32.mxu0 %vm470_vm0, %v7184_v48  ;;  %v7202_v50 = vld [vmem:[%s8276_s1 + $0x70] sm:$0xff] }
 0x334   : > { %5213 = vmatprep.subr.msk.mxu0 %vm470_vm0, %v8664_v21  ;;  %8708 = vst [vmem:[#allocation20_spill] sm:$0xff] %v7202_v50 }
 0x336   : > { %5172 = vmatmul.mubr.msk.f32.gmra.mxu0 %vm470_vm0, %v7193_v39 }
 0x337   : > { %5214 = vmatpush3.xpose.msk.msra.mxu0 %vm470_vm0, %v8664_v21  ;;  %5174 = vmatprep.mubr.msk.f32.mxu0 %vm470_vm0, %v7202_v50  ;;  %v7220_v21 = vld [vmem:[%s8276_s1 + $0x80] sm:$0xff] }
 0x338   : > { %5215 = vmatprep.subr.msk.mxu0 %vm470_vm0, %v8667_v31  ;;  %8710 = vst [vmem:[#allocation21_spill] sm:$0xff] %v7220_v21 }
 0x33a   : > { %5175 = vmatmul.mubr.msk.f32.gmra.mxu0 %vm470_vm0, %v7211_v3 }
 0x33b   : > { %5216 = vmatpush3.xpose.msk.msra.mxu0 %vm470_vm0, %v8667_v31  ;;  %5177 = vmatprep.mubr.msk.f32.mxu0 %vm470_vm0, %v7220_v21  ;;  %v7238_v31 = vld [vmem:[%s8276_s1 + $0x90] sm:$0xff] }
 0x33c   : > { %5217 = vmatprep.subr.msk.mxu0 %vm470_vm0, %v8670_v4  ;;  %8712 = vst [vmem:[#allocation58_spill] sm:$0xff] %v7238_v31 }
 0x33e   : > { %5178 = vmatmul.mubr.msk.f32.gmra.mxu0 %vm470_vm0, %v7229_v10 }
 0x33f   : > { %5218 = vmatpush3.xpose.msk.msra.mxu0 %vm470_vm0, %v8670_v4  ;;  %5180 = vmatprep.mubr.msk.f32.mxu0 %vm470_vm0, %v7238_v31  ;;  %v7256_v4 = vld [vmem:[%s8276_s1 + $0xa0] sm:$0xff] }
 0x340   : > { %5219 = vmatprep.subr.msk.mxu0 %vm470_vm0, %v8677_v53  ;;  %8714 = vst [vmem:[#allocation27_spill] sm:$0xff] %v7256_v4 }
 0x342   : > { %5181 = vmatmul.mubr.msk.f32.gmra.mxu0 %vm470_vm0, %v7247_v32 }
 0x343   : > { %5220 = vmatpush3.xpose.msk.msra.mxu0 %vm470_vm0, %v8677_v53  ;;  %5183 = vmatprep.mubr.msk.f32.mxu0 %vm470_vm0, %v7256_v4  ;;  %v7274_v53 = vld [vmem:[%s8276_s1 + $0xb0] sm:$0xff] }
 0x344   : > { %5221 = vmatprep.subr.msk.mxu0 %vm470_vm0, %v8680_v61  ;;  %8716 = vst [vmem:[#allocation8_spill] sm:$0xff] %v7274_v53 }
 0x346   : > { %5184 = vmatmul.mubr.msk.f32.gmra.mxu0 %vm470_vm0, %v7265_v56 }
 0x347   : > { %5222 = vmatpush3.xpose.msk.msra.mxu0 %vm470_vm0, %v8680_v61  ;;  %5186 = vmatprep.mubr.msk.f32.mxu0 %vm470_vm0, %v7274_v53  ;;  %v7292_v61 = vld [vmem:[%s8276_s1 + $0xc0] sm:$0xff] }
 0x348   : > { %5223 = vmatprep.subr.msk.mxu0 %vm470_vm0, %v8687_v30  ;;  %8718 = vst [vmem:[#allocation28_spill] sm:$0xff] %v7292_v61 }
 0x34a   : > { %5187 = vmatmul.mubr.msk.f32.gmra.mxu0 %vm470_vm0, %v7283_v57 }
 0x34b   : > { %5224 = vmatpush3.xpose.msk.msra.mxu0 %vm470_vm0, %v8687_v30  ;;  %5189 = vmatprep.mubr.msk.f32.mxu0 %vm470_vm0, %v7292_v61  ;;  %v7310_v30 = vld [vmem:[%s8276_s1 + $0xd0] sm:$0xff] }
 0x34c   : > { %5225 = vmatprep.subr.msk.mxu0 %vm470_vm0, %v8690_v6  ;;  %8720 = vst [vmem:[#allocation30_spill] sm:$0xff] %v7310_v30 }
 0x34e   : > { %5190 = vmatmul.mubr.msk.f32.gmra.mxu0 %vm470_vm0, %v7301_v20 }
 0x34f   : > { %5226 = vmatpush3.xpose.msk.msra.mxu0 %vm470_vm0, %v8690_v6  ;;  %5192 = vmatprep.mubr.msk.f32.mxu0 %vm470_vm0, %v7310_v30  ;;  %v7328_v6 = vld [vmem:[%s8276_s1 + $0xe0] sm:$0xff] }
 0x350   : > { %5227 = vmatprep.subr.msk.mxu0 %vm470_vm0, %v6862_v40  ;;  %8722 = vst [vmem:[#allocation31_spill] sm:$0xff] %v7328_v6 }
 0x352   : > { %5193 = vmatmul.mubr.msk.f32.gmra.mxu0 %vm470_vm0, %v7319_v63 }
 0x353   : > { %5228 = vmatpush3.xpose.msk.msra.mxu0 %vm470_vm0, %v6862_v40  ;;  %5195 = vmatprep.mubr.msk.f32.mxu0 %vm470_vm0, %v7328_v6  ;;  %v7346_v40 = vld [vmem:[%s8276_s1 + $0xf0] sm:$0xff] }
 0x354   : > { %5229 = vmatprep.subr.msk.mxu0 %vm470_vm0, %v6881_v51  ;;  %8724 = vst [vmem:[#allocation10_spill] sm:$0xff] %v7346_v40 }
 0x356   : > { %5196 = vmatmul.mubr.msk.f32.gmra.mxu0 %vm470_vm0, %v7337_v17 }
 0x357   : > { %5230 = vmatpush3.xpose.msk.msra.mxu0 %vm470_vm0, %v6881_v51  ;;  %5198 = vmatprep.mubr.msk.f32.mxu0 %vm470_vm0, %v7346_v40  ;;  %v8726_v51 = vld [vmem:[#allocation6_spill] sm:$0xff] }
 0x358   : > { %5231 = vmatprep.subr.msk.mxu0 %vm470_vm0, %v6892_v7 }
 0x35a   : > { %5199 = vmatmul.mubr.msk.f32.gmra.mxu0 %vm470_vm0, %v7355_v15 }
 0x35b   : > { %5232 = vmatpush3.xpose.msk.msra.mxu0 %vm470_vm0, %v6892_v7  ;;  %5233 = vmatprep.mubr.msk.f32.mxu0 %vm470_vm0, %v8726_v51  ;;  %v8727_v51 = vld [vmem:[#allocation23_spill] sm:$0xff] }
 0x35e   : > { %5234 = vmatmul.mubr.msk.f32.vlgmr.msra.gmra.mxu0 %vm470_vm0, %v7084_v0 }
 0x35f   : > { %5236 = vmatprep.mubr.msk.f32.mxu0 %vm470_vm0, %v7093_v43 }
 0x362   : > { %5237 = vmatmul.mubr.msk.f32.gmra.mxu0 %vm470_vm0, %v7103_v45  ;;  %v8740_v45 = vld [vmem:[#allocation59_spill] sm:$0xff] }
 0x363   : > { %5239 = vmatprep.mubr.msk.f32.mxu0 %vm470_vm0, %v7112_v1 }
 0x366   : > { %5240 = vmatmul.mubr.msk.f32.gmra.mxu0 %vm470_vm0, %v7121_v54 }
 0x367   : > { %5242 = vmatprep.mubr.msk.f32.mxu0 %vm470_vm0, %v7130_v42 }
 0x36a   : > { %5243 = vmatmul.mubr.msk.f32.gmra.mxu0 %vm470_vm0, %v7139_v49 }
 0x36b   : > { %5245 = vmatprep.mubr.msk.f32.mxu0 %vm470_vm0, %v7148_v41 }
 0x36e   : > { %5246 = vmatmul.mubr.msk.f32.gmra.mxu0 %vm470_vm0, %v7157_v16 }
 0x36f   : > { %5248 = vmatprep.mubr.msk.f32.mxu0 %vm470_vm0, %v7166_v5 }
 0x372   : > { %5249 = vmatmul.mubr.msk.f32.gmra.mxu0 %vm470_vm0, %v7175_v38 }
 0x373   : > { %5251 = vmatprep.mubr.msk.f32.mxu0 %vm470_vm0, %v7184_v48 }
 0x376   : > { %5252 = vmatmul.mubr.msk.f32.gmra.mxu0 %vm470_vm0, %v7193_v39 }
 0x377   : > { %5254 = vmatprep.mubr.msk.f32.mxu0 %vm470_vm0, %v7202_v50 }
 0x37a   : > { %5255 = vmatmul.mubr.msk.f32.gmra.mxu0 %vm470_vm0, %v7211_v3 }
 0x37b   : > { %5257 = vmatprep.mubr.msk.f32.mxu0 %vm470_vm0, %v7220_v21 }
 0x37e   : > { %5258 = vmatmul.mubr.msk.f32.gmra.mxu0 %vm470_vm0, %v7229_v10 }
 0x37f   : > { %5260 = vmatprep.mubr.msk.f32.mxu0 %vm470_vm0, %v7238_v31 }
 0x382   : > { %5261 = vmatmul.mubr.msk.f32.gmra.mxu0 %vm470_vm0, %v7247_v32 }
 0x383   : > { %5263 = vmatprep.mubr.msk.f32.mxu0 %vm470_vm0, %v7256_v4 }
 0x386   : > { %5264 = vmatmul.mubr.msk.f32.gmra.mxu0 %vm470_vm0, %v7265_v56 }
 0x387   : > { %5266 = vmatprep.mubr.msk.f32.mxu0 %vm470_vm0, %v7274_v53 }
 0x38a   : > { %5267 = vmatmul.mubr.msk.f32.gmra.mxu0 %vm470_vm0, %v7283_v57 }
 0x38b   : > { %5269 = vmatprep.mubr.msk.f32.mxu0 %vm470_vm0, %v7292_v61 }
 0x38e   : > { %5270 = vmatmul.mubr.msk.f32.gmra.mxu0 %vm470_vm0, %v7301_v20 }
 0x38f   : > { %5272 = vmatprep.mubr.msk.f32.mxu0 %vm470_vm0, %v7310_v30  ;;  %v8728_v30 = vld [vmem:[#allocation24_spill] sm:$0xff] }
 0x390   : > { %v4299_v20 = vadd.f32 %v8728_v30, %v8727_v51 }
 0x392   : > { %5273 = vmatmul.mubr.msk.f32.gmra.mxu0 %vm470_vm0, %v7319_v63  ;;  %v7428_v63 = vstv %s229_s15  ;;  %s221_s15 = scalar_lea.vmem [#allocation3], %s3824_s13 }
 0x393   : > { %5275 = vmatprep.mubr.msk.f32.mxu0 %vm470_vm0, %v7328_v6  ;;  %8729 = vst [vmem:[#allocation33_spill] sm:$0xff] %v7428_v63  ;;  %v7431_v57 = vadd.f32 %v4299_v20, %v7428_v63  ;;  %s3761_s17 = sshll.u32 %s221_s15, 4  ;;  %s8236_s17 = int_to_ptr.vmem [resolvable:$true] %s3761_s17 }
 0x394   : > { %s5648_s26 = scalar_lea.vmem %s8236_s17, 128  ;;  %p5655_p0 = scmp.lt.s32.totalorder %s8236_s17, %s5653_s8 }
 0x395   : > { %8730 = vst [vmem:[#allocation61_spill] sm:$0xff] %v7431_v57  ;;  %p5649_p11 = scmp.ne.s32.totalorder %s8236_s17, %s5648_s26  ;;  %p5656_p1 = scmp.lt.s32.totalorder %s5654_s27, %s5648_s26 }
 0x396   : > { %5276 = vmatmul.mubr.msk.f32.gmra.mxu0 %vm470_vm0, %v7337_v17 }
 0x397   : > { %5278 = vmatprep.mubr.msk.f32.mxu0 %vm470_vm0, %v7346_v40  ;;  %p5650_p12 = pnand %p5649_p11, %p5786_p5  ;;  %p5657_p2 = por %p5656_p1, %p5655_p0 }
 0x399   : > { %p5651_p13 = pneg %p5650_p12 }
 0x39a   : > { %5279 = vmatmul.mubr.msk.f32.gmra.mxu0 %vm470_vm0, %v7355_v15 }
 0x39b   : > { %2904 = vmatprep.mubr.f32.mxu0 %v8696_v37  ;;  %p5658_p3 = pnand %p5657_p2, %p5651_p13 }
 0x39e   : > { %v4380_v7 = vpop.f32.mrf.mxu0 }
 0x3a0   : > { %v4381_v61 = vpop.f32.mrf.mxu0 }
 0x3a1   : > { %v4382_v6 = vadd.f32 %v4381_v61, %v4380_v7 }
 0x3a3   : > { %v7434_v17 = vadd.f32 %v4382_v6, %v7428_v63 }
 0x3a5   : > { %8731 = vst [vmem:[#allocation43_spill] sm:$0xff] %v7434_v17  ;;  %v3692_v40 = vmax.f32 %v7431_v57, %v7434_v17 }
 0x3de   : > { %v4463_v15 = vpop.f32.mrf.mxu1  ;;  %v7438_v53 = vpop.f32.mrf.mxu0 }
 0x3df   : > { %8732 = vst [vmem:[#allocation11_spill] sm:$0xff] %v7438_v53  ;;  %v8741_v53 = vld [vmem:[#allocation56_spill] sm:$0xff] }
 0x3e0   : > { %v4464_v56 = vpop.f32.mrf.mxu1  ;;  %v7440_v4 = vpop.f32.mrf.mxu0 }
 0x3e1   : > { %8733 = vst [vmem:[#allocation60_spill] sm:$0xff] %v7440_v4  ;;  %v4465_v30 = vadd.f32 %v4464_v56, %v4463_v15 }
 0x3e2   : > { %v7442_v51 = vpop.f32.mrf.mxu0 }
 0x3e3   : > { %v7445_v61 = vadd.f32 %v4465_v30, %v7428_v63 }
 0x3e4   : > { %v7447_v20 = vpop.f32.mrf.mxu0 }
 0x3e5   : > { %8734 = vst [vmem:[#allocation13_spill] sm:$0xff] %v7445_v61  ;;  %8735 = vst [vmem:[#allocation63_spill] sm:$0xff] %v7447_v20  ;;  %v7450_v6 = vmax.f32 %v3692_v40, %v7445_v61 }
 0x3e6   : > { %v7452_v7 = vpop.f32.mrf.mxu0 }
 0x3e7   : > { %8736 = vst [vmem:[#allocation42_spill] sm:$0xff] %v7450_v6 }
 0x3e8   : > { %v7454_v17 = vpop.f32.mrf.mxu0 }
 0x3ea   : > { %v7456_v57 = vpop.f32.mrf.mxu0 }
 0x3ec   : > { %v7458_v32 = vpop.f32.mrf.mxu0 }
 0x3ee   : > { %v5167_v31 = vpop.f32.mrf.mxu0 }
 0x3f0   : > { %v7460_v15 = vpop.f32.mrf.mxu0 }
 0x3f2   : > { %v5170_v56 = vpop.f32.mrf.mxu0 }
 0x3f4   : > { %v1917_v10 = vpop.f32.mrf.mxu0 }
 0x3f6   : > { %v5173_v30 = vpop.f32.mrf.mxu0 }
 0x3f8   : > { %v1927_v63 = vpop.f32.mrf.mxu0 }
 0x3fa   : > { %v5176_v21 = vpop.f32.mrf.mxu0 }
 0x3fb   : > { %v1943_v43 = vadd.f32 %v5176_v21, %v8740_v45  ;;  %v1928_v21 = vadd.f32 %v1927_v63, %v6335_v35 }
 0x3fc   : > { %v1937_v3 = vpop.f32.mrf.mxu0 }
 0x3fd   : > { %v1938_v4 = vadd.f32 %v1937_v3, %v8630_v47  ;;  %v2041_v60 = vmax.f32 %v1943_v43, 0.0 }
 0x3fe   : > { %v7462_v50 = vpop.f32.mrf.mxu0 }
 0x3ff   : > { %8737 = vst [vmem:[#allocation62_spill] sm:$0xff] %v7462_v50  ;;  %v1933_v50 = vadd.f32 %v5173_v30, %v6325_v27 }
 0x400   : > { %v7464_v40 = vpop.f32.mrf.mxu0 }
 0x401   : > { %8738 = vst [vmem:[#allocation36_spill] sm:$0xff] %v7464_v40  ;;  %v2039_v30 = vmax.f32 %v1933_v50, 0.0 }
 0x402   : > { %v7466_v61 = vpop.f32.mrf.mxu0 }
 0x404   : > { %v7468_v6 = vpop.f32.mrf.mxu0 }
 0x405   : > { %8739 = vst [vmem:[#allocation12_spill] sm:$0xff] %v7468_v6 }
 0x406   : > { %v7470_v39 = vpop.f32.mrf.mxu0 }
 0x408   : > { %v7472_v48 = vpop.f32.mrf.mxu0 }
 0x40a   : > { %v5188_v38 = vpop.f32.mrf.mxu0 }
 0x40c   : > { %v1977_v5 = vpop.f32.mrf.mxu0 }
 0x40e   : > { %v5191_v16 = vpop.f32.mrf.mxu0 }
 0x410   : > { %v1987_v41 = vpop.f32.mrf.mxu0 }
 0x412   : > { %v5194_v49 = vpop.f32.mrf.mxu0 }
 0x414   : > { %v1997_v42 = vpop.f32.mrf.mxu0 }
 0x416   : > { %v5197_v54 = vpop.f32.mrf.mxu0 }
 0x417   : > { %v2013_v40 = vadd.f32 %v5197_v54, %v6327_v29  ;;  %v2003_v54 = vadd.f32 %v5194_v49, %v6345_v23  ;;  %v1993_v49 = vadd.f32 %v5191_v16, %v6355_v28  ;;  %v1983_v16 = vadd.f32 %v5188_v38, %v6373_v2 }
 0x418   : > { %v2007_v1 = vpop.f32.mrf.mxu0  ;;  %v1973_v38 = vadd.f32 %v7470_v39, %v6383_v58 }
 0x419   : > { %v2008_v22 = vadd.f32 %v2007_v1, %v6337_v46  ;;  %v1998_v1 = vadd.f32 %v1997_v42, %v6349_v18  ;;  %v2053_v63 = vmax.f32 %v2003_v54, 0.0  ;;  %v1988_v42 = vadd.f32 %v1987_v41, %v6365_v8 }
 0x41a   : > { %v5200_v0 = vpop.f32.mrf.mxu0  ;;  %v1978_v41 = vadd.f32 %v1977_v5, %v6379_v13 }
 0x41b   : > { %v2023_v37 = vadd.f32 %v5200_v0, %v8666_v25  ;;  %v2040_v0 = vmax.f32 %v1938_v4, 0.0  ;;  %v2038_v4 = vmax.f32 %v1928_v21, 0.0 }
 0x41c   : > { %v2017_v33 = vpop.f32.mrf.mxu0 }
 0x41d   : > { %v2057_v52 = vmax.f32 %v2023_v37, 0.0  ;;  %v2018_v55 = vadd.f32 %v2017_v33, %v8741_v53  ;;  %v2055_v37 = vmax.f32 %v2013_v40, 0.0  ;;  %v1923_v33 = vadd.f32 %v5170_v56, %v6343_v24 }
 0x41e   : > { %v7480_v20 = vpop.f32.mrf.mxu0 }
 0x41f   : > { %8742 = vst [vmem:[#allocation65_spill] sm:$0xff] %v7480_v20  ;;  %v2056_v6 = vmax.f32 %v2018_v55, 0.0  ;;  %4514 = vmatprep.subr.mxu1 %v2057_v52  ;;  %v2054_v55 = vmax.f32 %v2008_v22, 0.0  ;;  %v1918_v52 = vadd.f32 %v1917_v10, %v6347_v34  ;;  %v2037_v50 = vmax.f32 %v1923_v33, 0.0 }
 0x420   : > { %4515 = vmatpush3.msra.mxu1 %v2041_v60  ;;  %v7484_v3 = vpop.f32.mrf.mxu0  ;;  %v2052_v22 = vmax.f32 %v1998_v1, 0.0  ;;  %v1908_v10 = vadd.f32 %v7460_v15, %v6363_v9  ;;  %v2050_v33 = vmax.f32 %v1988_v42, 0.0  ;;  %v1898_v15 = vadd.f32 %v7458_v32, %v6377_v62 }
 0x421   : > { %8743 = vst [vmem:[#allocation15_spill] sm:$0xff] %v7484_v3  ;;  %4516 = vmatprep.subr.mxu1 %v2056_v6  ;;  %v1913_v6 = vadd.f32 %v5167_v31, %v6353_v14  ;;  %v2036_v40 = vmax.f32 %v1918_v52, 0.0  ;;  %v1903_v31 = vadd.f32 %v7456_v57, %v6371_v19  ;;  %v1893_v57 = vadd.f32 %v7452_v7, %v6381_v59 }
 0x422   : > { %4517 = vmatpush3.msra.mxu1 %v2040_v0  ;;  %v7488_v43 = vpop.f32.mrf.mxu0  ;;  %v2051_v0 = vmax.f32 %v1993_v49, 0.0  ;;  %v2048_v32 = vmax.f32 %v1978_v41, 0.0  ;;  %v1888_v49 = vadd.f32 %v7454_v17, %v8671_v26  ;;  %v2047_v7 = vmax.f32 %v1973_v38, 0.0  ;;  %v8749_v41 = vld [vmem:[#allocation62_spill] sm:$0xff] }
 0x423   : > { %4518 = vmatprep.subr.mxu1 %v2055_v37  ;;  %v2035_v54 = vmax.f32 %v1913_v6, 0.0  ;;  %v2033_v52 = vmax.f32 %v1903_v31, 0.0  ;;  %v1963_v6 = vadd.f32 %v7466_v61, %v8673_v44  ;;  %v2031_v42 = vmax.f32 %v1893_v57, 0.0 }
 0x424   : > { %4519 = vmatpush3.msra.mxu1 %v2039_v30  ;;  %v7492_v60 = vpop.f32.mrf.mxu0  ;;  %v2034_v30 = vmax.f32 %v1908_v10, 0.0  ;;  %v2030_v31 = vmax.f32 %v1888_v49, 0.0  ;;  %v8754_v49 = vld [vmem:[#allocation68_spill] sm:$0xff] }
 0x425   : > { %8744 = vst [vmem:[#allocation38_spill] sm:$0xff] %v7492_v60  ;;  %4520 = vmatprep.subr.mxu1 %v2054_v55  ;;  %v2049_v55 = vmax.f32 %v1983_v16, 0.0  ;;  %v8747_v16 = vld [vmem:[#allocation63_spill] sm:$0xff] }
 0x426   : > { %4521 = vmatpush3.msra.mxu1 %v2038_v4  ;;  %v7496_v56 = vpop.f32.mrf.mxu0  ;;  %v1968_v4 = vadd.f32 %v7472_v48, %v8668_v12 }
 0x427   : > { %4522 = vmatprep.subr.mxu1 %v2053_v63  ;;  %v2032_v63 = vmax.f32 %v1898_v15, 0.0  ;;  %v8750_v15 = vld [vmem:[#allocation66_spill] sm:$0xff] }
 0x428   : > { %4523 = vmatpush3.msra.mxu1 %v2037_v50  ;;  %v7501_v21 = vpop.f32.mrf.mxu0  ;;  %v1883_v50 = vadd.f32 %v7442_v51, %v8675_v36  ;;  %v2046_v17 = vmax.f32 %v1968_v4, 0.0  ;;  %v2045_v51 = vmax.f32 %v1963_v6, 0.0  ;;  %v8753_v4 = vld [vmem:[#allocation36_spill] sm:$0xff] }
 0x429   : > { %4524 = vmatprep.subr.mxu1 %v2052_v22  ;;  %v8745_v22 = vld [vmem:[#allocation12_spill] sm:$0xff] }
 0x42a   : > { %4525 = vmatpush3.msra.mxu1 %v2036_v40  ;;  %v7506_v37 = vpop.f32.mrf.mxu0  ;;  %v1958_v10 = vadd.f32 %v8745_v22, %v8678_v11  ;;  %v8746_v40 = vld [vmem:[#allocation64_spill] sm:$0xff] }
 0x42b   : > { %4526 = vmatprep.subr.mxu1 %v2051_v0  ;;  %v1878_v0 = vadd.f32 %v8747_v16, %v8746_v40 }
 0x42c   : > { %4527 = vmatpush3.msra.mxu1 %v2035_v54  ;;  %v7511_v1 = vpop.f32.mrf.mxu0  ;;  %v8748_v54 = vld [vmem:[#allocation67_spill] sm:$0xff] }
 0x42d   : > { %4528 = vmatprep.subr.mxu1 %v2050_v33  ;;  %v1953_v33 = vadd.f32 %v8749_v41, %v8748_v54  ;;  %v2028_v22 = vmax.f32 %v1878_v0, 0.0  ;;  %v8759_v0 = vld [vmem:[#allocation54_spill] sm:$0xff] }
 0x42e   : > { %4529 = vmatpush3.msra.mxu1 %v2034_v30  ;;  %v7517_v5 = vpop.f32.mrf.mxu0  ;;  %v8751_v30 = vld [vmem:[#allocation11_spill] sm:$0xff] }
 0x42f   : > { %4530 = vmatprep.subr.mxu1 %v2049_v55  ;;  %v1873_v38 = vadd.f32 %v8751_v30, %v8750_v15  ;;  %v2029_v55 = vmax.f32 %v1883_v50, 0.0  ;;  %v2043_v41 = vmax.f32 %v1953_v33, 0.0 }
 0x430   : > { %4531 = vmatpush3.msra.mxu1 %v2033_v52  ;;  %v7523_v39 = vpop.f32.mrf.mxu0  ;;  %v8752_v52 = vld [vmem:[#allocation69_spill] sm:$0xff] }
 0x431   : > { %4532 = vmatprep.subr.mxu1 %v2048_v32  ;;  %v1948_v32 = vadd.f32 %v8753_v4, %v8752_v52  ;;  %v2027_v6 = vmax.f32 %v1873_v38, 0.0 }
 0x432   : > { %4533 = vmatpush3.msra.mxu1 %v2032_v63  ;;  %v7529_v48 = vpop.f32.mrf.mxu0  ;;  %v2044_v63 = vmax.f32 %v1958_v10, 0.0 }
 0x433   : > { %4534 = vmatprep.subr.mxu1 %v2047_v7  ;;  %v8755_v7 = vld [vmem:[#allocation60_spill] sm:$0xff]  ;;  %v2042_v30 = vmax.f32 %v1948_v32, 0.0 }
 0x434   : > { %4535 = vmatpush3.msra.mxu1 %v2031_v42  ;;  %v7535_v61 = vpop.f32.mrf.mxu0  ;;  %v1868_v42 = vadd.f32 %v8755_v7, %v8754_v49 }
 0x435   : > { %4536 = vmatprep.subr.mxu1 %v2046_v17 }
 0x436   : > { %4537 = vmatpush3.msra.mxu1 %v2030_v31  ;;  %v5253_v57 = vpop.f32.mrf.mxu0  ;;  %v2026_v50 = vmax.f32 %v1868_v42, 0.0 }
 0x437   : > { %4538 = vmatprep.subr.mxu1 %v2045_v51  ;;  %v8757_v51 = vld [vmem:[#allocation55_spill] sm:$0xff] }
 0x438   : > { %4539 = vmatpush3.msra.mxu1 %v2029_v55  ;;  %v2318_v16 = vpop.f32.mrf.mxu0 }
 0x439   : > { %4540 = vmatprep.subr.mxu1 %v2044_v63 }
 0x43a   : > { %4541 = vmatpush3.msra.mxu1 %v2028_v22  ;;  %v5256_v17 = vpop.f32.mrf.mxu0 }
 0x43b   : > { %4542 = vmatprep.subr.mxu1 %v2043_v41 }
 0x43c   : > { %4543 = vmatpush3.msra.mxu1 %v2027_v6  ;;  %v2328_v31 = vpop.f32.mrf.mxu0 }
 0x43d   : > { %4544 = vmatprep.subr.mxu1 %v2042_v30  ;;  %v2329_v49 = vadd.f32 %v2328_v31, %v8630_v47 }
 0x43e   : > { %4545 = vmatpush3.msra.mxu1 %v2026_v50  ;;  %v7545_v10 = vpop.f32.mrf.mxu0 }
 0x43f   : > { %8756 = vst [vmem:[#allocation37_spill] sm:$0xff] %v7545_v10  ;;  %2123 = vmatmul.mubr.f32.vlgmr.msra.gmra.mxu1 %v8757_v51  ;;  %v2334_v51 = vadd.f32 %v5256_v17, %v8740_v45  ;;  %v2324_v10 = vadd.f32 %v5253_v57, %v6325_v27  ;;  %v2319_v17 = vadd.f32 %v2318_v16, %v6335_v35  ;;  %v2431_v45 = vmax.f32 %v2329_v49, 0.0 }
 0x440   : > { %v7548_v4 = vpop.f32.mrf.mxu0  ;;  %2513 = vmatprep.mubr.f32.mxu1 %v8759_v0 }
 0x441   : > { %8758 = vst [vmem:[#allocation14_spill] sm:$0xff] %v7548_v4  ;;  %v2432_v54 = vmax.f32 %v2334_v51, 0.0 }
 0x442   : > { %v7551_v33 = vpop.f32.mrf.mxu0 }
 0x444   : > { %v7553_v38 = vpop.f32.mrf.mxu0 }
 0x446   : > { %v5265_v55 = vpop.f32.mrf.mxu0 }
 0x448   : > { %v7555_v32 = vpop.f32.mrf.mxu0 }
 0x44a   : > { %v5268_v63 = vpop.f32.mrf.mxu0 }
 0x44c   : > { %v2368_v7 = vpop.f32.mrf.mxu0 }
 0x44e   : > { %v5271_v42 = vpop.f32.mrf.mxu0 }
 0x450   : > { %v2378_v22 = vpop.f32.mrf.mxu0 }
 0x452   : > { %v5274_v41 = vpop.f32.mrf.mxu0 }
 0x454   : > { %v2388_v6 = vpop.f32.mrf.mxu0 }
 0x455   : > { %v2389_v57 = vadd.f32 %v2388_v6, %v6349_v18 }
 0x456   : > { %v5277_v30 = vpop.f32.mrf.mxu0 }
 0x457   : > { %v2404_v52 = vadd.f32 %v5277_v30, %v6327_v29  ;;  %v2430_v30 = vmax.f32 %v2324_v10, 0.0 }
 0x458   : > { %v2398_v50 = vpop.f32.mrf.mxu0 }
 0x459   : > { %v2399_v60 = vadd.f32 %v2398_v50, %v6337_v46  ;;  %v2446_v31 = vmax.f32 %v2404_v52, 0.0 }
 0x45a   : > { %v5280_v3 = vpop.f32.mrf.mxu0 }
 0x45b   : > { %v2414_v0 = vadd.f32 %v5280_v3, %v8666_v25  ;;  %v2394_v3 = vadd.f32 %v5274_v41, %v6345_v23  ;;  %v2445_v51 = vmax.f32 %v2399_v60, 0.0  ;;  %v2299_v60 = vadd.f32 %v7523_v39, %v6363_v9 }
 0x45c   : > { %v2408_v4 = vpop.f32.mrf.mxu0  ;;  %v2364_v39 = vadd.f32 %v5265_v55, %v6383_v58  ;;  %v2354_v55 = vadd.f32 %v7551_v33, %v8673_v44 }
 0x45d   : > { %v2448_v20 = vmax.f32 %v2414_v0, 0.0  ;;  %v2409_v15 = vadd.f32 %v2408_v4, %v8741_v53  ;;  %v2314_v0 = vadd.f32 %v7529_v48, %v6343_v24  ;;  %v2444_v49 = vmax.f32 %v2394_v3, 0.0 }
 0x45e   : > { %v2443_v48 = vmax.f32 %v2389_v57, 0.0  ;;  %v2294_v4 = vadd.f32 %v7506_v37, %v6371_v19  ;;  %v2425_v6 = vmax.f32 %v2299_v60, 0.0  ;;  %v2359_v37 = vadd.f32 %v7555_v32, %v8668_v12  ;;  %v8760_v57 = vld [vmem:[#allocation64_spill] sm:$0xff]  ;;  %v8767_v60 = vld [vmem:[#allocation14_spill] sm:$0xff] }
 0x45f   : > { %v2447_v40 = vmax.f32 %v2409_v15, 0.0  ;;  %4597 = vmatprep.subr.mxu1 %v2448_v20  ;;  %v2309_v20 = vadd.f32 %v7535_v61, %v6347_v34  ;;  %v2429_v15 = vmax.f32 %v2319_v17, 0.0  ;;  %v2428_v52 = vmax.f32 %v2314_v0, 0.0 }
 0x460   : > { %4598 = vmatpush3.msra.mxu1 %v2432_v54  ;;  %v2384_v54 = vadd.f32 %v5271_v42, %v6355_v28  ;;  %v2374_v61 = vadd.f32 %v5268_v63, %v6373_v2  ;;  %v2284_v63 = vadd.f32 %v7496_v56, %v6381_v59  ;;  %v2424_v17 = vmax.f32 %v2294_v4, 0.0 }
 0x461   : > { %4599 = vmatprep.subr.mxu1 %v2447_v40  ;;  %v2304_v40 = vadd.f32 %v7517_v5, %v6353_v14  ;;  %v2427_v16 = vmax.f32 %v2309_v20, 0.0  ;;  %v2369_v5 = vadd.f32 %v2368_v7, %v6379_v13  ;;  %v2279_v3 = vadd.f32 %v7501_v21, %v8671_v26 }
 0x462   : > { %4600 = vmatpush3.msra.mxu1 %v2431_v45  ;;  %v2379_v45 = vadd.f32 %v2378_v22, %v6365_v8  ;;  %v2442_v10 = vmax.f32 %v2384_v54, 0.0  ;;  %v2289_v22 = vadd.f32 %v7511_v1, %v6377_v62  ;;  %v2440_v50 = vmax.f32 %v2374_v61, 0.0  ;;  %v8763_v54 = vld [vmem:[#allocation37_spill] sm:$0xff]  ;;  %v8768_v61 = vld [vmem:[#allocation68_spill] sm:$0xff] }
 0x463   : > { %4601 = vmatprep.subr.mxu1 %v2446_v31  ;;  %v2426_v42 = vmax.f32 %v2304_v40, 0.0  ;;  %v2439_v7 = vmax.f32 %v2369_v5, 0.0  ;;  %v2438_v31 = vmax.f32 %v2364_v39, 0.0  ;;  %v2274_v56 = vadd.f32 %v7488_v43, %v8675_v36  ;;  %v8764_v40 = vld [vmem:[#allocation66_spill] sm:$0xff]  ;;  %v2550_v39 = vpop.permute.xlu0 %2549 }
 0x464   : > { %4602 = vmatpush3.msra.mxu1 %v2430_v30  ;;  %v2441_v41 = vmax.f32 %v2379_v45, 0.0  ;;  %v2423_v1 = vmax.f32 %v2289_v22, 0.0  ;;  %v2422_v0 = vmax.f32 %v2284_v63, 0.0  ;;  %v2349_v32 = vadd.f32 %v7553_v38, %v8678_v11  ;;  %v8770_v63 = vld [vmem:[#allocation55_spill] sm:$0xff] }
 0x465   : > { %4603 = vmatprep.subr.mxu1 %v2445_v51  ;;  %v2437_v30 = vmax.f32 %v2359_v37, 0.0  ;;  %v8761_v51 = vld [vmem:[#allocation38_spill] sm:$0xff]  ;;  %v2421_v20 = vmax.f32 %v2279_v3, 0.0  ;;  %v2420_v45 = vmax.f32 %v2274_v56, 0.0 }
 0x466   : > { %4604 = vmatpush3.msra.mxu1 %v2429_v15  ;;  %v2269_v21 = vadd.f32 %v8761_v51, %v8760_v57  ;;  %v8762_v15 = vld [vmem:[#allocation67_spill] sm:$0xff] }
 0x467   : > { %4605 = vmatprep.subr.mxu1 %v2444_v49  ;;  %v2344_v33 = vadd.f32 %v8763_v54, %v8762_v15  ;;  %v2436_v49 = vmax.f32 %v2354_v55, 0.0  ;;  %v2546_v37 = vpop.permute.xlu0 %2545  ;;  %v8803_v15 = vld [vmem:[#allocation33_spill] sm:$0xff] }
 0x468   : > { %4606 = vmatpush3.msra.mxu1 %v2428_v52  ;;  %v8765_v52 = vld [vmem:[#allocation65_spill] sm:$0xff] }
 0x469   : > { %4607 = vmatprep.subr.mxu1 %v2443_v48  ;;  %v2264_v43 = vadd.f32 %v8765_v52, %v8764_v40  ;;  %v8766_v48 = vld [vmem:[#allocation69_spill] sm:$0xff]  ;;  %v2434_v5 = vmax.f32 %v2344_v33, 0.0  ;;  %v8772_v52 = vld [vmem:[#allocation44_spill] sm:$0xff] }
 0x46a   : > { %4608 = vmatpush3.msra.mxu1 %v2427_v16  ;;  %v2339_v38 = vadd.f32 %v8767_v60, %v8766_v48  ;;  %v2435_v16 = vmax.f32 %v2349_v32, 0.0  ;;  %v8774_v60 = vld [vmem:[#allocation45_spill] sm:$0xff] }
 0x46b   : > { %4609 = vmatprep.subr.mxu1 %v2442_v10  ;;  %v8769_v10 = vld [vmem:[#allocation15_spill] sm:$0xff]  ;;  %v2542_v3 = vpop.permute.xlu0 %2541  ;;  %v8802_v48 = vld [vmem:[#allocation57_spill] sm:$0xff] }
 0x46c   : > { %4610 = vmatpush3.msra.mxu1 %v2426_v42  ;;  %v2259_v4 = vadd.f32 %v8769_v10, %v8768_v61  ;;  %v2419_v42 = vmax.f32 %v2269_v21, 0.0  ;;  %v2433_v22 = vmax.f32 %v2339_v38, 0.0  ;;  %v8775_v38 = vld [vmem:[#allocation46_spill] sm:$0xff]  ;;  %v8776_v10 = vld [vmem:[#allocation17_spill] sm:$0xff]  ;;  %v8800_v61 = vld [vmem:[#allocation32_spill] sm:$0xff] }
 0x46d   : > { %4611 = vmatprep.subr.mxu1 %v2441_v41  ;;  %v2418_v41 = vmax.f32 %v2264_v43, 0.0  ;;  %v8773_v43 = vld [vmem:[#allocation16_spill] sm:$0xff] }
 0x46e   : > { %4612 = vmatpush3.msra.mxu1 %v2425_v6  ;;  %v2417_v6 = vmax.f32 %v2259_v4, 0.0  ;;  %v8777_v4 = vld [vmem:[#allocation47_spill] sm:$0xff] }
 0x46f   : > { %4613 = vmatprep.subr.mxu1 %v2440_v50  ;;  %v2548_v50 = vpop.permute.xlu1 %2547  ;;  %v2538_v55 = vpop.permute.xlu0 %2537 }
 0x470   : > { %4614 = vmatpush3.msra.mxu1 %v2424_v17  ;;  %v7612_v17 = vld [vmem:[%s8276_s1] sm:$0xff] }
 0x471   : > { %4615 = vmatprep.subr.mxu1 %v2439_v7  ;;  %8771 = vst [vmem:[#allocation34_spill] sm:$0xff] %v7612_v17 }
 0x472   : > { %4616 = vmatpush3.msra.mxu1 %v2423_v1 }
 0x473   : > { %4617 = vmatprep.subr.mxu1 %v2438_v31  ;;  %v2544_v7 = vpop.permute.xlu1 %2543  ;;  %v2534_v56 = vpop.permute.xlu0 %2533 }
 0x474   : > { %4618 = vmatpush3.msra.mxu1 %v2422_v0 }
 0x475   : > { %4619 = vmatprep.subr.mxu1 %v2437_v30 }
 0x476   : > { %4620 = vmatpush3.msra.mxu1 %v2421_v20 }
 0x477   : > { %4621 = vmatprep.subr.mxu1 %v2436_v49  ;;  %v2540_v1 = vpop.permute.xlu1 %2539  ;;  %v2530_v32 = vpop.permute.xlu0 %2529 }
 0x478   : > { %4622 = vmatpush3.msra.mxu1 %v2420_v45 }
 0x479   : > { %4623 = vmatprep.subr.mxu1 %v2435_v16 }
 0x47a   : > { %4624 = vmatpush3.msra.mxu1 %v2419_v42 }
 0x47b   : > { %4625 = vmatprep.subr.mxu1 %v2434_v5  ;;  %v2536_v31 = vpop.permute.xlu1 %2535  ;;  %v2526_v51 = vpop.permute.xlu0 %2525  ;;  %v8778_v5 = vld [vmem:[#allocation48_spill] sm:$0xff] }
 0x47c   : > { %4626 = vmatpush3.msra.mxu1 %v2418_v41  ;;  %v8779_v41 = vld [vmem:[#allocation18_spill] sm:$0xff] }
 0x47d   : > { %4627 = vmatprep.subr.mxu1 %v2433_v22 }
 0x47e   : > { %4628 = vmatpush3.msra.mxu1 %v2417_v6  ;;  %v8780_v6 = vld [vmem:[#allocation49_spill] sm:$0xff] }
 0x47f   : > { %2514 = vmatmul.mubr.f32.vlgmr.msra.gmra.mxu1 %v8770_v63  ;;  %5281 = vmatprep.subr.msk.mxu1 %vm470_vm0, %v2550_v39  ;;  %v2532_v0 = vpop.permute.xlu1 %2531  ;;  %v2522_v20 = vpop.permute.xlu0 %2521 }
 0x480   : > { %5282 = vmatpush3.xpose.msk.msra.mxu1 %vm470_vm0, %v2550_v39  ;;  %5313 = vmatprep.mubr.msk.f32.mxu1 %vm470_vm0, %v7612_v17  ;;  %v8781_v39 = vld [vmem:[#allocation50_spill] sm:$0xff] }
 0x481   : > { %5283 = vmatprep.subr.msk.mxu1 %vm470_vm0, %v2548_v50 }
 0x483   : > { %v2528_v30 = vpop.permute.xlu1 %2527  ;;  %v2941_v33 = vpop.permute.xlu0 %2940 }
 0x484   : > { %5284 = vmatpush3.xpose.msk.msra.mxu1 %vm470_vm0, %v2548_v50 }
 0x485   : > { %5285 = vmatprep.subr.msk.mxu1 %vm470_vm0, %v2546_v37 }
 0x487   : > { %v2524_v21 = vpop.permute.xlu1 %2523  ;;  %v2937_v45 = vpop.permute.xlu0 %2936 }
 0x488   : > { %5286 = vmatpush3.xpose.msk.msra.mxu1 %vm470_vm0, %v2546_v37  ;;  %v8782_v37 = vld [vmem:[#allocation19_spill] sm:$0xff] }
 0x489   : > { %5287 = vmatprep.subr.msk.mxu1 %vm470_vm0, %v2544_v7 }
 0x48b   : > { %v2520_v54 = vpop.permute.xlu1 %2519  ;;  %v2933_v42 = vpop.permute.xlu0 %2932 }
 0x48c   : > { %5288 = vmatpush3.xpose.msk.msra.mxu1 %vm470_vm0, %v2544_v7  ;;  %v8783_v7 = vld [vmem:[#allocation51_spill] sm:$0xff] }
 0x48d   : > { %5289 = vmatprep.subr.msk.mxu1 %vm470_vm0, %v2542_v3 }
 0x48f   : > { %v2939_v49 = vpop.permute.xlu1 %2938  ;;  %v2929_v50 = vpop.permute.xlu0 %2928 }
 0x490   : > { %5290 = vmatpush3.xpose.msk.msra.mxu1 %vm470_vm0, %v2542_v3 }
 0x491   : > { %5291 = vmatprep.subr.msk.mxu1 %vm470_vm0, %v2540_v1 }
 0x493   : > { %v2935_v16 = vpop.permute.xlu1 %2934 }
 0x494   : > { %5292 = vmatpush3.xpose.msk.msra.mxu1 %vm470_vm0, %v2540_v1  ;;  %v8784_v1 = vld [vmem:[#allocation52_spill] sm:$0xff] }
 0x495   : > { %5293 = vmatprep.subr.msk.mxu1 %vm470_vm0, %v2538_v55 }
 0x497   : > { %v2931_v22 = vpop.permute.xlu1 %2930 }
 0x498   : > { %5294 = vmatpush3.xpose.msk.msra.mxu1 %vm470_vm0, %v2538_v55  ;;  %v8785_v55 = vld [vmem:[#allocation20_spill] sm:$0xff] }
 0x499   : > { %5295 = vmatprep.subr.msk.mxu1 %vm470_vm0, %v2536_v31 }
 0x49b   : > { %v2927_v3 = vpop.permute.xlu1 %2926 }
 0x49c   : > { %5296 = vmatpush3.xpose.msk.msra.mxu1 %vm470_vm0, %v2536_v31  ;;  %v2925_v31 = vpop.permute.xlu0 %2924 }
 0x49d   : > { %5297 = vmatprep.subr.msk.mxu1 %vm470_vm0, %v2534_v56 }
 0x4a0   : > { %5298 = vmatpush3.xpose.msk.msra.mxu1 %vm470_vm0, %v2534_v56  ;;  %v8786_v56 = vld [vmem:[#allocation53_spill] sm:$0xff] }
 0x4a1   : > { %5299 = vmatprep.subr.msk.mxu1 %vm470_vm0, %v2532_v0 }
 0x4a4   : > { %5300 = vmatpush3.xpose.msk.msra.mxu1 %vm470_vm0, %v2532_v0  ;;  %v8787_v0 = vld [vmem:[#allocation21_spill] sm:$0xff] }
 0x4a5   : > { %5301 = vmatprep.subr.msk.mxu1 %vm470_vm0, %v2530_v32 }
 0x4a8   : > { %5302 = vmatpush3.xpose.msk.msra.mxu1 %vm470_vm0, %v2530_v32  ;;  %v2923_v32 = vpop.permute.xlu1 %2922 }
 0x4a9   : > { %5303 = vmatprep.subr.msk.mxu1 %vm470_vm0, %v2528_v30 }
 0x4ac   : > { %5304 = vmatpush3.xpose.msk.msra.mxu1 %vm470_vm0, %v2528_v30  ;;  %v8788_v30 = vld [vmem:[#allocation22_spill] sm:$0xff] }
 0x4ad   : > { %5305 = vmatprep.subr.msk.mxu1 %vm470_vm0, %v2526_v51 }
 0x4b0   : > { %5306 = vmatpush3.xpose.msk.msra.mxu1 %vm470_vm0, %v2526_v51  ;;  %v8789_v51 = vld [vmem:[#allocation58_spill] sm:$0xff] }
 0x4b1   : > { %5307 = vmatprep.subr.msk.mxu1 %vm470_vm0, %v2524_v21 }
 0x4b4   : > { %5308 = vmatpush3.xpose.msk.msra.mxu1 %vm470_vm0, %v2524_v21  ;;  %v2921_v21 = vpop.permute.xlu0 %2920 }
 0x4b5   : > { %5309 = vmatprep.subr.msk.mxu1 %vm470_vm0, %v2522_v20 }
 0x4b8   : > { %5310 = vmatpush3.xpose.msk.msra.mxu1 %vm470_vm0, %v2522_v20  ;;  %v8790_v20 = vld [vmem:[#allocation7_spill] sm:$0xff] }
 0x4b9   : > { %5311 = vmatprep.subr.msk.mxu1 %vm470_vm0, %v2520_v54 }
 0x4bc   : > { %5312 = vmatpush3.xpose.msk.msra.mxu1 %vm470_vm0, %v2520_v54  ;;  %v8791_v54 = vld [vmem:[#allocation27_spill] sm:$0xff] }
 0x4bd   : > { %5361 = vmatprep.subr.msk.mxu1 %vm470_vm0, %v2941_v33 }
 0x4bf   : > { %5314 = vmatmul.mubr.msk.f32.vlgmr.msra.gmra.mxu1 %vm470_vm0, %v8772_v52 }
 0x4c0   : > { %5362 = vmatpush3.xpose.msk.msra.mxu1 %vm470_vm0, %v2941_v33  ;;  %5316 = vmatprep.mubr.msk.f32.mxu1 %vm470_vm0, %v8773_v43  ;;  %v2919_v33 = vpop.permute.xlu1 %2918 }
 0x4c1   : > { %5363 = vmatprep.subr.msk.mxu1 %vm470_vm0, %v2939_v49 }
 0x4c3   : > { %5317 = vmatmul.mubr.msk.f32.gmra.mxu1 %vm470_vm0, %v8774_v60 }
 0x4c4   : > { %5364 = vmatpush3.xpose.msk.msra.mxu1 %vm470_vm0, %v2939_v49  ;;  %5319 = vmatprep.mubr.msk.f32.mxu1 %vm470_vm0, %v8775_v38  ;;  %v8792_v49 = vld [vmem:[#allocation25_spill] sm:$0xff] }
 0x4c5   : > { %5365 = vmatprep.subr.msk.mxu1 %vm470_vm0, %v2937_v45 }
 0x4c7   : > { %5320 = vmatmul.mubr.msk.f32.gmra.mxu1 %vm470_vm0, %v8776_v10 }
 0x4c8   : > { %5366 = vmatpush3.xpose.msk.msra.mxu1 %vm470_vm0, %v2937_v45  ;;  %5322 = vmatprep.mubr.msk.f32.mxu1 %vm470_vm0, %v8777_v4  ;;  %v8793_v45 = vld [vmem:[#allocation8_spill] sm:$0xff] }
 0x4c9   : > { %5367 = vmatprep.subr.msk.mxu1 %vm470_vm0, %v2935_v16 }
 0x4cb   : > { %5323 = vmatmul.mubr.msk.f32.gmra.mxu1 %vm470_vm0, %v8778_v5 }
 0x4cc   : > { %5368 = vmatpush3.xpose.msk.msra.mxu1 %vm470_vm0, %v2935_v16  ;;  %5325 = vmatprep.mubr.msk.f32.mxu1 %vm470_vm0, %v8779_v41  ;;  %v2917_v16 = vpop.permute.xlu0 %2916 }
 0x4cd   : > { %5369 = vmatprep.subr.msk.mxu1 %vm470_vm0, %v2933_v42 }
 0x4cf   : > { %5326 = vmatmul.mubr.msk.f32.gmra.mxu1 %vm470_vm0, %v8780_v6 }
 0x4d0   : > { %5370 = vmatpush3.xpose.msk.msra.mxu1 %vm470_vm0, %v2933_v42  ;;  %5328 = vmatprep.mubr.msk.f32.mxu1 %vm470_vm0, %v8781_v39  ;;  %v8794_v42 = vld [vmem:[#allocation26_spill] sm:$0xff] }
 0x4d1   : > { %5371 = vmatprep.subr.msk.mxu1 %vm470_vm0, %v2931_v22 }
 0x4d3   : > { %5329 = vmatmul.mubr.msk.f32.gmra.mxu1 %vm470_vm0, %v8782_v37 }
 0x4d4   : > { %5372 = vmatpush3.xpose.msk.msra.mxu1 %vm470_vm0, %v2931_v22  ;;  %5331 = vmatprep.mubr.msk.f32.mxu1 %vm470_vm0, %v8783_v7  ;;  %v8795_v22 = vld [vmem:[#allocation28_spill] sm:$0xff] }
 0x4d5   : > { %5373 = vmatprep.subr.msk.mxu1 %vm470_vm0, %v2929_v50 }
 0x4d7   : > { %5332 = vmatmul.mubr.msk.f32.gmra.mxu1 %vm470_vm0, %v8784_v1 }
 0x4d8   : > { %5374 = vmatpush3.xpose.msk.msra.mxu1 %vm470_vm0, %v2929_v50  ;;  %5334 = vmatprep.mubr.msk.f32.mxu1 %vm470_vm0, %v8785_v55  ;;  %v2915_v50 = vpop.permute.xlu1 %2914 }
 0x4d9   : > { %5375 = vmatprep.subr.msk.mxu1 %vm470_vm0, %v2927_v3 }
 0x4db   : > { %5335 = vmatmul.mubr.msk.f32.gmra.mxu1 %vm470_vm0, %v8786_v56 }
 0x4dc   : > { %5376 = vmatpush3.xpose.msk.msra.mxu1 %vm470_vm0, %v2927_v3  ;;  %5337 = vmatprep.mubr.msk.f32.mxu1 %vm470_vm0, %v8787_v0  ;;  %v8796_v3 = vld [vmem:[#allocation29_spill] sm:$0xff]  ;;  %v2911_v63 = vpop.permute.xlu1 %2910 }
 0x4dd   : > { %5377 = vmatprep.subr.msk.mxu1 %vm470_vm0, %v2925_v31 }
 0x4df   : > { %5338 = vmatmul.mubr.msk.f32.gmra.mxu1 %vm470_vm0, %v8788_v30 }
 0x4e0   : > { %5378 = vmatpush3.xpose.msk.msra.mxu1 %vm470_vm0, %v2925_v31  ;;  %5340 = vmatprep.mubr.msk.f32.mxu1 %vm470_vm0, %v8789_v51  ;;  %v8797_v31 = vld [vmem:[#allocation30_spill] sm:$0xff] }
 0x4e1   : > { %5379 = vmatprep.subr.msk.mxu1 %vm470_vm0, %v2923_v32 }
 0x4e3   : > { %5341 = vmatmul.mubr.msk.f32.gmra.mxu1 %vm470_vm0, %v8790_v20 }
 0x4e4   : > { %5380 = vmatpush3.xpose.msk.msra.mxu1 %vm470_vm0, %v2923_v32  ;;  %5343 = vmatprep.mubr.msk.f32.mxu1 %vm470_vm0, %v8791_v54  ;;  %v2913_v32 = vpop.permute.xlu0 %2912 }
 0x4e5   : > { %5381 = vmatprep.subr.msk.mxu1 %vm470_vm0, %v2921_v21 }
 0x4e7   : > { %5344 = vmatmul.mubr.msk.f32.gmra.mxu1 %vm470_vm0, %v8792_v49 }
 0x4e8   : > { %5382 = vmatpush3.xpose.msk.msra.mxu1 %vm470_vm0, %v2921_v21  ;;  %5346 = vmatprep.mubr.msk.f32.mxu1 %vm470_vm0, %v8793_v45  ;;  %v8798_v21 = vld [vmem:[#allocation9_spill] sm:$0xff] }
 0x4e9   : > { %5383 = vmatprep.subr.msk.mxu1 %vm470_vm0, %v2919_v33 }
 0x4eb   : > { %5347 = vmatmul.mubr.msk.f32.gmra.mxu1 %vm470_vm0, %v8794_v42 }
 0x4ec   : > { %5384 = vmatpush3.xpose.msk.msra.mxu1 %vm470_vm0, %v2919_v33  ;;  %5349 = vmatprep.mubr.msk.f32.mxu1 %vm470_vm0, %v8795_v22  ;;  %v8799_v33 = vld [vmem:[#allocation31_spill] sm:$0xff] }
 0x4ed   : > { %5385 = vmatprep.subr.msk.mxu1 %vm470_vm0, %v2917_v16 }
 0x4ef   : > { %5350 = vmatmul.mubr.msk.f32.gmra.mxu1 %vm470_vm0, %v8796_v3 }
 0x4f0   : > { %5386 = vmatpush3.xpose.msk.msra.mxu1 %vm470_vm0, %v2917_v16  ;;  %5352 = vmatprep.mubr.msk.f32.mxu1 %vm470_vm0, %v8797_v31  ;;  %v8801_v16 = vld [vmem:[#allocation10_spill] sm:$0xff] }
 0x4f1   : > { %5387 = vmatprep.subr.msk.mxu1 %vm470_vm0, %v2915_v50 }
 0x4f3   : > { %5353 = vmatmul.mubr.msk.f32.gmra.mxu1 %vm470_vm0, %v8798_v21 }
 0x4f4   : > { %5388 = vmatpush3.xpose.msk.msra.mxu1 %vm470_vm0, %v2915_v50  ;;  %5355 = vmatprep.mubr.msk.f32.mxu1 %vm470_vm0, %v8799_v33 }
 0x4f5   : > { %5389 = vmatprep.subr.msk.mxu1 %vm470_vm0, %v2913_v32 }
 0x4f7   : > { %5356 = vmatmul.mubr.msk.f32.gmra.mxu1 %vm470_vm0, %v8800_v61 }
 0x4f8   : > { %5390 = vmatpush3.xpose.msk.msra.mxu1 %vm470_vm0, %v2913_v32  ;;  %5358 = vmatprep.mubr.msk.f32.mxu1 %vm470_vm0, %v8801_v16 }
 0x4f9   : > { %5391 = vmatprep.subr.msk.mxu1 %vm470_vm0, %v2911_v63 }
 0x4fb   : > { %5359 = vmatmul.mubr.msk.f32.gmra.mxu1 %vm470_vm0, %v8802_v48 }
 0x4fc   : > { %5392 = vmatpush3.xpose.msk.msra.mxu1 %vm470_vm0, %v2911_v63  ;;  %5393 = vmatprep.mubr.msk.f32.mxu1 %vm470_vm0, %v7612_v17  ;;  %v8805_v63 = vld [vmem:[#allocation42_spill] sm:$0xff] }
 0x4ff   : > { %v4546_v50 = vpop.f32.mrf.mxu1  ;;  %5394 = vmatmul.mubr.msk.f32.vlgmr.msra.gmra.mxu1 %vm470_vm0, %v8772_v52 }
 0x500   : > { %5396 = vmatprep.mubr.msk.f32.mxu1 %vm470_vm0, %v8773_v43 }
 0x501   : > { %v4547_v32 = vpop.f32.mrf.mxu1 }
 0x502   : > { %v4548_v40 = vadd.f32 %v4547_v32, %v4546_v50 }
 0x503   : > { %5397 = vmatmul.mubr.msk.f32.gmra.mxu1 %vm470_vm0, %v8774_v60 }
 0x504   : > { %v7749_v57 = vadd.f32 %v4548_v40, %v8803_v15  ;;  %5399 = vmatprep.mubr.msk.f32.mxu1 %vm470_vm0, %v8775_v38  ;;  %v8806_v40 = vld [vmem:[#allocation54_spill] sm:$0xff] }
 0x506   : > { %8804 = vst [vmem:[#allocation39_spill] sm:$0xff] %v7749_v57  ;;  %v3694_v17 = vmax.f32 %v8805_v63, %v7749_v57 }
 0x507   : > { %5400 = vmatmul.mubr.msk.f32.gmra.mxu1 %vm470_vm0, %v8776_v10 }
 0x508   : > { %5402 = vmatprep.mubr.msk.f32.mxu1 %vm470_vm0, %v8777_v4 }
 0x50b   : > { %5403 = vmatmul.mubr.msk.f32.gmra.mxu1 %vm470_vm0, %v8778_v5 }
 0x50c   : > { %5405 = vmatprep.mubr.msk.f32.mxu1 %vm470_vm0, %v8779_v41 }
 0x50f   : > { %5406 = vmatmul.mubr.msk.f32.gmra.mxu1 %vm470_vm0, %v8780_v6 }
 0x510   : > { %5408 = vmatprep.mubr.msk.f32.mxu1 %vm470_vm0, %v8781_v39 }
 0x513   : > { %5409 = vmatmul.mubr.msk.f32.gmra.mxu1 %vm470_vm0, %v8782_v37 }
 0x514   : > { %5411 = vmatprep.mubr.msk.f32.mxu1 %vm470_vm0, %v8783_v7 }
 0x517   : > { %5412 = vmatmul.mubr.msk.f32.gmra.mxu1 %vm470_vm0, %v8784_v1 }
 0x518   : > { %5414 = vmatprep.mubr.msk.f32.mxu1 %vm470_vm0, %v8785_v55 }
 0x51b   : > { %5415 = vmatmul.mubr.msk.f32.gmra.mxu1 %vm470_vm0, %v8786_v56 }
 0x51c   : > { %5417 = vmatprep.mubr.msk.f32.mxu1 %vm470_vm0, %v8787_v0 }
 0x51f   : > { %5418 = vmatmul.mubr.msk.f32.gmra.mxu1 %vm470_vm0, %v8788_v30 }
 0x520   : > { %5420 = vmatprep.mubr.msk.f32.mxu1 %vm470_vm0, %v8789_v51 }
 0x523   : > { %5421 = vmatmul.mubr.msk.f32.gmra.mxu1 %vm470_vm0, %v8790_v20 }
 0x524   : > { %5423 = vmatprep.mubr.msk.f32.mxu1 %vm470_vm0, %v8791_v54 }
 0x527   : > { %5424 = vmatmul.mubr.msk.f32.gmra.mxu1 %vm470_vm0, %v8792_v49 }
 0x528   : > { %5426 = vmatprep.mubr.msk.f32.mxu1 %vm470_vm0, %v8793_v45 }
 0x52b   : > { %5427 = vmatmul.mubr.msk.f32.gmra.mxu1 %vm470_vm0, %v8794_v42 }
 0x52c   : > { %5429 = vmatprep.mubr.msk.f32.mxu1 %vm470_vm0, %v8795_v22 }
 0x52f   : > { %5430 = vmatmul.mubr.msk.f32.gmra.mxu1 %vm470_vm0, %v8796_v3 }
 0x530   : > { %5432 = vmatprep.mubr.msk.f32.mxu1 %vm470_vm0, %v8797_v31 }
 0x533   : > { %5433 = vmatmul.mubr.msk.f32.gmra.mxu1 %vm470_vm0, %v8798_v21 }
 0x534   : > { %5435 = vmatprep.mubr.msk.f32.mxu1 %vm470_vm0, %v8799_v33 }
 0x537   : > { %5436 = vmatmul.mubr.msk.f32.gmra.mxu1 %vm470_vm0, %v8800_v61 }
 0x538   : > { %5438 = vmatprep.mubr.msk.f32.mxu1 %vm470_vm0, %v8801_v16 }
 0x53b   : > { %5439 = vmatmul.mubr.msk.f32.gmra.mxu1 %vm470_vm0, %v8802_v48 }
 0x53c   : > { %3686 = vmatprep.mubr.f32.mxu1 %v8806_v40 }
 0x53f   : > { %v4629_v52 = vpop.f32.mrf.mxu1 }
 0x541   : > { %v4630_v43 = vpop.f32.mrf.mxu1 }
 0x542   : > { %v4631_v60 = vadd.f32 %v4630_v43, %v4629_v52  ;;  %v8815_v52 = vld [vmem:[#allocation59_spill] sm:$0xff] }
 0x544   : > { %v7811_v38 = vadd.f32 %v4631_v60, %v8803_v15 }
 0x546   : > { %8807 = vst [vmem:[#allocation41_spill] sm:$0xff] %v7811_v38  ;;  %v7814_v10 = vmax.f32 %v3694_v17, %v7811_v38 }
 0x548   : > { %8808 = vst [vmem:[#allocation40_spill] sm:$0xff] %v7814_v10 }
 0x57f   : > { %v7816_v4 = vpop.f32.mrf.mxu1 }
 0x580   : > { %8809 = vst [vmem:[#allocation35_spill] sm:$0xff] %v7816_v4 }
 0x581   : > { %v7818_v61 = vpop.f32.mrf.mxu1 }
 0x582   : > { %8810 = vst [vmem:[#allocation6_spill] sm:$0xff] %v7818_v61 }
 0x583   : > { %v7820_v5 = vpop.f32.mrf.mxu1 }
 0x585   : > { %v7822_v41 = vpop.f32.mrf.mxu1 }
 0x586   : > { %8811 = vst [vmem:[#allocation23_spill] sm:$0xff] %v7822_v41 }
 0x587   : > { %v7824_v48 = vpop.f32.mrf.mxu1 }
 0x589   : > { %v7826_v6 = vpop.f32.mrf.mxu1 }
 0x58b   : > { %v7828_v39 = vpop.f32.mrf.mxu1 }
 0x58d   : > { %v7830_v37 = vpop.f32.mrf.mxu1 }
 0x58f   : > { %v5327_v7 = vpop.f32.mrf.mxu1 }
 0x591   : > { %v7832_v1 = vpop.f32.mrf.mxu1 }
 0x593   : > { %v5330_v17 = vpop.f32.mrf.mxu1 }
 0x595   : > { %v2699_v55 = vpop.f32.mrf.mxu1 }
 0x597   : > { %v5333_v56 = vpop.f32.mrf.mxu1 }
 0x599   : > { %v2709_v0 = vpop.f32.mrf.mxu1 }
 0x59b   : > { %v5336_v30 = vpop.f32.mrf.mxu1 }
 0x59c   : > { %v2725_v43 = vadd.f32 %v5336_v30, %v8815_v52  ;;  %v2710_v30 = vadd.f32 %v2709_v0, %v6335_v35 }
 0x59d   : > { %v2719_v51 = vpop.f32.mrf.mxu1 }
 0x59e   : > { %v2720_v57 = vadd.f32 %v2719_v51, %v8630_v47  ;;  %v2823_v4 = vmax.f32 %v2725_v43, 0.0 }
 0x59f   : > { %v7834_v20 = vpop.f32.mrf.mxu1 }
 0x5a0   : > { %8812 = vst [vmem:[#allocation24_spill] sm:$0xff] %v7834_v20 }
 0x5a1   : > { %v7836_v54 = vpop.f32.mrf.mxu1 }
 0x5a2   : > { %8813 = vst [vmem:[#allocation56_spill] sm:$0xff] %v7836_v54  ;;  %v2715_v54 = vadd.f32 %v5333_v56, %v6325_v27 }
 0x5a3   : > { %v7838_v49 = vpop.f32.mrf.mxu1 }
 0x5a4   : > { %v2821_v56 = vmax.f32 %v2715_v54, 0.0 }
 0x5a5   : > { %v7840_v45 = vpop.f32.mrf.mxu1 }
 0x5a6   : > { %8814 = vst [vmem:[#allocation12_spill] sm:$0xff] %v7840_v45 }
 0x5a7   : > { %v7842_v42 = vpop.f32.mrf.mxu1 }
 0x5a9   : > { %v7844_v22 = vpop.f32.mrf.mxu1 }
 0x5ab   : > { %v5348_v3 = vpop.f32.mrf.mxu1 }
 0x5ad   : > { %v2759_v31 = vpop.f32.mrf.mxu1 }
 0x5af   : > { %v5351_v21 = vpop.f32.mrf.mxu1 }
 0x5b0   : > { %v2775_v0 = vadd.f32 %v5351_v21, %v6355_v28  ;;  %v2765_v21 = vadd.f32 %v5348_v3, %v6373_v2  ;;  %v2755_v3 = vadd.f32 %v7842_v42, %v6383_v58 }
 0x5b1   : > { %v2769_v33 = vpop.f32.mrf.mxu1 }
 0x5b3   : > { %v5354_v16 = vpop.f32.mrf.mxu1 }
 0x5b5   : > { %v2779_v50 = vpop.f32.mrf.mxu1 }
 0x5b7   : > { %v5357_v32 = vpop.f32.mrf.mxu1 }
 0x5b8   : > { %v2795_v15 = vadd.f32 %v5357_v32, %v6327_v29  ;;  %v2785_v32 = vadd.f32 %v5354_v16, %v6345_v23  ;;  %v2770_v16 = vadd.f32 %v2769_v33, %v6365_v8  ;;  %v2760_v33 = vadd.f32 %v2759_v31, %v6379_v13 }
 0x5b9   : > { %v2789_v63 = vpop.f32.mrf.mxu1 }
 0x5ba   : > { %v2790_v41 = vadd.f32 %v2789_v63, %v6337_v46  ;;  %v2780_v63 = vadd.f32 %v2779_v50, %v6349_v18 }
 0x5bb   : > { %v5360_v60 = vpop.f32.mrf.mxu1 }
 0x5bc   : > { %v2805_v38 = vadd.f32 %v5360_v60, %v8666_v25  ;;  %v2822_v60 = vmax.f32 %v2720_v57, 0.0  ;;  %v2820_v57 = vmax.f32 %v2710_v30, 0.0 }
 0x5bd   : > { %v2799_v10 = vpop.f32.mrf.mxu1 }
 0x5be   : > { %v2839_v40 = vmax.f32 %v2805_v38, 0.0  ;;  %v2800_v61 = vadd.f32 %v2799_v10, %v8741_v53  ;;  %v2837_v38 = vmax.f32 %v2795_v15, 0.0  ;;  %v2705_v10 = vadd.f32 %v5330_v17, %v6343_v24 }
 0x5bf   : > { %v7852_v20 = vpop.f32.mrf.mxu1  ;;  %v2835_v15 = vmax.f32 %v2785_v32, 0.0  ;;  %v2695_v17 = vadd.f32 %v5327_v7, %v6353_v14  ;;  %v2685_v7 = vadd.f32 %v7828_v39, %v6371_v19  ;;  %v2675_v39 = vadd.f32 %v7824_v48, %v6381_v59 }
 0x5c0   : > { %8816 = vst [vmem:[#allocation63_spill] sm:$0xff] %v7852_v20  ;;  %v2838_v45 = vmax.f32 %v2800_v61, 0.0  ;;  %4680 = vmatprep.subr.mxu0 %v2839_v40  ;;  %v2836_v61 = vmax.f32 %v2790_v41, 0.0  ;;  %v2700_v40 = vadd.f32 %v2699_v55, %v6347_v34  ;;  %v2819_v54 = vmax.f32 %v2705_v10, 0.0 }
 0x5c1   : > { %4681 = vmatpush3.msra.mxu0 %v2823_v4  ;;  %v7856_v51 = vpop.f32.mrf.mxu1  ;;  %v2834_v41 = vmax.f32 %v2780_v63, 0.0  ;;  %v2690_v55 = vadd.f32 %v7832_v1, %v6363_v9  ;;  %v2817_v32 = vmax.f32 %v2695_v17, 0.0  ;;  %v2832_v10 = vmax.f32 %v2770_v16, 0.0 }
 0x5c2   : > { %8817 = vst [vmem:[#allocation62_spill] sm:$0xff] %v7856_v51  ;;  %4682 = vmatprep.subr.mxu0 %v2838_v45  ;;  %v2818_v50 = vmax.f32 %v2700_v40, 0.0  ;;  %v2680_v1 = vadd.f32 %v7830_v37, %v6377_v62  ;;  %v2815_v40 = vmax.f32 %v2685_v7, 0.0  ;;  %v2830_v37 = vmax.f32 %v2760_v33, 0.0  ;;  %v8823_v33 = vld [vmem:[#allocation24_spill] sm:$0xff] }
 0x5c3   : > { %4683 = vmatpush3.msra.mxu0 %v2822_v60  ;;  %v7860_v43 = vpop.f32.mrf.mxu1  ;;  %v2833_v60 = vmax.f32 %v2775_v0, 0.0  ;;  %v2670_v0 = vadd.f32 %v7826_v6, %v8671_v26  ;;  %v2745_v17 = vadd.f32 %v7838_v49, %v8673_v44  ;;  %v2829_v48 = vmax.f32 %v2755_v3, 0.0 }
 0x5c4   : > { %4684 = vmatprep.subr.mxu0 %v2837_v38  ;;  %v2813_v16 = vmax.f32 %v2675_v39, 0.0 }
 0x5c5   : > { %4685 = vmatpush3.msra.mxu0 %v2821_v56  ;;  %v7864_v4 = vpop.f32.mrf.mxu1  ;;  %v2816_v56 = vmax.f32 %v2690_v55, 0.0  ;;  %v2812_v7 = vmax.f32 %v2670_v0, 0.0  ;;  %v8828_v0 = vld [vmem:[#allocation68_spill] sm:$0xff] }
 0x5c6   : > { %8818 = vst [vmem:[#allocation11_spill] sm:$0xff] %v7864_v4  ;;  %4686 = vmatprep.subr.mxu0 %v2836_v61  ;;  %v2831_v61 = vmax.f32 %v2765_v21, 0.0  ;;  %v8821_v21 = vld [vmem:[#allocation23_spill] sm:$0xff] }
 0x5c7   : > { %4687 = vmatpush3.msra.mxu0 %v2820_v57  ;;  %v7868_v45 = vpop.f32.mrf.mxu1  ;;  %v2750_v57 = vadd.f32 %v7844_v22, %v8668_v12 }
 0x5c8   : > { %4688 = vmatprep.subr.mxu0 %v2835_v15  ;;  %v2814_v15 = vmax.f32 %v2680_v1, 0.0  ;;  %v8824_v1 = vld [vmem:[#allocation66_spill] sm:$0xff] }
 0x5c9   : > { %4689 = vmatpush3.msra.mxu0 %v2819_v54  ;;  %v7873_v30 = vpop.f32.mrf.mxu1  ;;  %v2665_v54 = vadd.f32 %v7820_v5, %v8675_v36  ;;  %v2828_v6 = vmax.f32 %v2750_v57, 0.0  ;;  %v2827_v5 = vmax.f32 %v2745_v17, 0.0  ;;  %v8827_v57 = vld [vmem:[#allocation56_spill] sm:$0xff] }
 0x5ca   : > { %4690 = vmatprep.subr.mxu0 %v2834_v41  ;;  %v8819_v41 = vld [vmem:[#allocation12_spill] sm:$0xff] }
 0x5cb   : > { %4691 = vmatpush3.msra.mxu0 %v2818_v50  ;;  %v7878_v38 = vpop.f32.mrf.mxu1  ;;  %v2740_v55 = vadd.f32 %v8819_v41, %v8678_v11  ;;  %v8820_v50 = vld [vmem:[#allocation64_spill] sm:$0xff] }
 0x5cc   : > { %4692 = vmatprep.subr.mxu0 %v2833_v60  ;;  %v2660_v60 = vadd.f32 %v8821_v21, %v8820_v50 }
 0x5cd   : > { %4693 = vmatpush3.msra.mxu0 %v2817_v32  ;;  %v7883_v63 = vpop.f32.mrf.mxu1  ;;  %v8822_v32 = vld [vmem:[#allocation67_spill] sm:$0xff] }
 0x5ce   : > { %4694 = vmatprep.subr.mxu0 %v2832_v10  ;;  %v2735_v10 = vadd.f32 %v8823_v33, %v8822_v32  ;;  %v2810_v41 = vmax.f32 %v2660_v60, 0.0  ;;  %v8833_v60 = vld [vmem:[#allocation54_spill] sm:$0xff] }
 0x5cf   : > { %4695 = vmatpush3.msra.mxu0 %v2816_v56  ;;  %v7889_v31 = vpop.f32.mrf.mxu1  ;;  %v8825_v56 = vld [vmem:[#allocation35_spill] sm:$0xff] }
 0x5d0   : > { %4696 = vmatprep.subr.mxu0 %v2831_v61  ;;  %v2655_v3 = vadd.f32 %v8825_v56, %v8824_v1  ;;  %v2811_v61 = vmax.f32 %v2665_v54, 0.0  ;;  %v2825_v33 = vmax.f32 %v2735_v10, 0.0 }
 0x5d1   : > { %4697 = vmatpush3.msra.mxu0 %v2815_v40  ;;  %v7895_v42 = vpop.f32.mrf.mxu1  ;;  %v8826_v40 = vld [vmem:[#allocation69_spill] sm:$0xff] }
 0x5d2   : > { %4698 = vmatprep.subr.mxu0 %v2830_v37  ;;  %v2730_v37 = vadd.f32 %v8827_v57, %v8826_v40  ;;  %v2809_v17 = vmax.f32 %v2655_v3, 0.0 }
 0x5d3   : > { %4699 = vmatpush3.msra.mxu0 %v2814_v15  ;;  %v7901_v22 = vpop.f32.mrf.mxu1  ;;  %v2826_v15 = vmax.f32 %v2740_v55, 0.0 }
 0x5d4   : > { %4700 = vmatprep.subr.mxu0 %v2829_v48  ;;  %v8829_v48 = vld [vmem:[#allocation6_spill] sm:$0xff]  ;;  %v2824_v56 = vmax.f32 %v2730_v37, 0.0 }
 0x5d5   : > { %4701 = vmatpush3.msra.mxu0 %v2813_v16  ;;  %v7907_v49 = vpop.f32.mrf.mxu1  ;;  %v2650_v16 = vadd.f32 %v8829_v48, %v8828_v0 }
 0x5d6   : > { %4702 = vmatprep.subr.mxu0 %v2828_v6 }
 0x5d7   : > { %4703 = vmatpush3.msra.mxu0 %v2812_v7  ;;  %v5413_v39 = vpop.f32.mrf.mxu1  ;;  %v2808_v54 = vmax.f32 %v2650_v16, 0.0 }
 0x5d8   : > { %4704 = vmatprep.subr.mxu0 %v2827_v5  ;;  %v8831_v5 = vld [vmem:[#allocation55_spill] sm:$0xff] }
 0x5d9   : > { %4705 = vmatpush3.msra.mxu0 %v2811_v61  ;;  %v3100_v21 = vpop.f32.mrf.mxu1 }
 0x5da   : > { %4706 = vmatprep.subr.mxu0 %v2826_v15 }
 0x5db   : > { %4707 = vmatpush3.msra.mxu0 %v2810_v41  ;;  %v5416_v6 = vpop.f32.mrf.mxu1 }
 0x5dc   : > { %4708 = vmatprep.subr.mxu0 %v2825_v33 }
 0x5dd   : > { %4709 = vmatpush3.msra.mxu0 %v2809_v17  ;;  %v3110_v7 = vpop.f32.mrf.mxu1 }
 0x5de   : > { %4710 = vmatprep.subr.mxu0 %v2824_v56  ;;  %v3111_v0 = vadd.f32 %v3110_v7, %v8630_v47 }
 0x5df   : > { %4711 = vmatpush3.msra.mxu0 %v2808_v54  ;;  %v7917_v55 = vpop.f32.mrf.mxu1 }
 0x5e0   : > { %8830 = vst [vmem:[#allocation36_spill] sm:$0xff] %v7917_v55  ;;  %2905 = vmatmul.mubr.f32.vlgmr.msra.gmra.mxu0 %v8831_v5  ;;  %v3116_v5 = vadd.f32 %v5416_v6, %v8815_v52  ;;  %v3106_v55 = vadd.f32 %v5413_v39, %v6325_v27  ;;  %v3101_v6 = vadd.f32 %v3100_v21, %v6335_v35  ;;  %v3213_v52 = vmax.f32 %v3111_v0, 0.0 }
 0x5e1   : > { %v7920_v57 = vpop.f32.mrf.mxu1  ;;  %3295 = vmatprep.mubr.f32.mxu0 %v8833_v60 }
 0x5e2   : > { %8832 = vst [vmem:[#allocation60_spill] sm:$0xff] %v7920_v57  ;;  %v3214_v32 = vmax.f32 %v3116_v5, 0.0 }
 0x5e3   : > { %v7923_v10 = vpop.f32.mrf.mxu1 }
 0x5e5   : > { %v7925_v3 = vpop.f32.mrf.mxu1 }
 0x5e7   : > { %v5425_v61 = vpop.f32.mrf.mxu1 }
 0x5e9   : > { %v7927_v37 = vpop.f32.mrf.mxu1 }
 0x5eb   : > { %v5428_v15 = vpop.f32.mrf.mxu1 }
 0x5ed   : > { %v3150_v48 = vpop.f32.mrf.mxu1 }
 0x5ef   : > { %v5431_v16 = vpop.f32.mrf.mxu1 }
 0x5f1   : > { %v3160_v41 = vpop.f32.mrf.mxu1 }
 0x5f3   : > { %v5434_v33 = vpop.f32.mrf.mxu1 }
 0x5f5   : > { %v3170_v17 = vpop.f32.mrf.mxu1 }
 0x5f6   : > { %v3171_v39 = vadd.f32 %v3170_v17, %v6349_v18 }
 0x5f7   : > { %v5437_v56 = vpop.f32.mrf.mxu1 }
 0x5f8   : > { %v3186_v40 = vadd.f32 %v5437_v56, %v6327_v29  ;;  %v3096_v56 = vadd.f32 %v7901_v22, %v6343_v24  ;;  %v3225_v22 = vmax.f32 %v3171_v39, 0.0  ;;  %v8834_v39 = vld [vmem:[#allocation64_spill] sm:$0xff] }
 0x5f9   : > { %v3180_v54 = vpop.f32.mrf.mxu1 }
 0x5fa   : > { %v3181_v4 = vadd.f32 %v3180_v54, %v6337_v46  ;;  %v3228_v7 = vmax.f32 %v3186_v40, 0.0  ;;  %v3210_v40 = vmax.f32 %v3096_v56, 0.0 }
 0x5fb   : > { %v5440_v51 = vpop.f32.mrf.mxu1 }
 0x5fc   : > { %v3196_v60 = vadd.f32 %v5440_v51, %v8666_v25  ;;  %v3176_v51 = vadd.f32 %v5434_v33, %v6345_v23  ;;  %v3227_v5 = vmax.f32 %v3181_v4, 0.0  ;;  %v3081_v4 = vadd.f32 %v7895_v42, %v6363_v9 }
 0x5fd   : > { %v3190_v57 = vpop.f32.mrf.mxu1  ;;  %v3146_v42 = vadd.f32 %v5425_v61, %v6383_v58  ;;  %v3136_v61 = vadd.f32 %v7923_v10, %v8673_v44 }
 0x5fe   : > { %v3230_v20 = vmax.f32 %v3196_v60, 0.0  ;;  %v3191_v1 = vadd.f32 %v3190_v57, %v8741_v53  ;;  %v3212_v60 = vmax.f32 %v3106_v55, 0.0  ;;  %v3226_v0 = vmax.f32 %v3176_v51, 0.0 }
 0x5ff   : > { %v3076_v57 = vadd.f32 %v7878_v38, %v6371_v19  ;;  %v3207_v17 = vmax.f32 %v3081_v4, 0.0  ;;  %v3141_v38 = vadd.f32 %v7927_v37, %v8668_v12  ;;  %v3061_v51 = vadd.f32 %v7873_v30, %v8671_v26  ;;  %v8841_v4 = vld [vmem:[#allocation60_spill] sm:$0xff] }
 0x600   : > { %v3229_v50 = vmax.f32 %v3191_v1, 0.0  ;;  %4763 = vmatprep.subr.mxu0 %v3230_v20  ;;  %v3091_v20 = vadd.f32 %v7907_v49, %v6347_v34  ;;  %v3211_v1 = vmax.f32 %v3101_v6, 0.0  ;;  %v3156_v49 = vadd.f32 %v5428_v15, %v6373_v2 }
 0x601   : > { %4764 = vmatpush3.msra.mxu0 %v3214_v32  ;;  %v3166_v32 = vadd.f32 %v5431_v16, %v6355_v28  ;;  %v3066_v15 = vadd.f32 %v7868_v45, %v6381_v59  ;;  %v3206_v6 = vmax.f32 %v3076_v57, 0.0  ;;  %v3056_v45 = vadd.f32 %v7860_v43, %v8675_v36 }
 0x602   : > { %4765 = vmatprep.subr.mxu0 %v3229_v50  ;;  %v3086_v50 = vadd.f32 %v7889_v31, %v6353_v14  ;;  %v3209_v21 = vmax.f32 %v3091_v20, 0.0  ;;  %v3151_v31 = vadd.f32 %v3150_v48, %v6379_v13  ;;  %v3222_v54 = vmax.f32 %v3156_v49, 0.0  ;;  %v8842_v49 = vld [vmem:[#allocation68_spill] sm:$0xff] }
 0x603   : > { %4766 = vmatpush3.msra.mxu0 %v3213_v52  ;;  %v3161_v52 = vadd.f32 %v3160_v41, %v6365_v8  ;;  %v3224_v55 = vmax.f32 %v3166_v32, 0.0  ;;  %v3071_v41 = vadd.f32 %v7883_v63, %v6377_v62  ;;  %v3204_v56 = vmax.f32 %v3066_v15, 0.0  ;;  %v8837_v32 = vld [vmem:[#allocation36_spill] sm:$0xff]  ;;  %v8844_v15 = vld [vmem:[#allocation55_spill] sm:$0xff] }
 0x604   : > { %4767 = vmatprep.subr.mxu0 %v3228_v7  ;;  %v3208_v16 = vmax.f32 %v3086_v50, 0.0  ;;  %v3221_v48 = vmax.f32 %v3151_v31, 0.0  ;;  %v3220_v7 = vmax.f32 %v3146_v42, 0.0  ;;  %v3131_v37 = vadd.f32 %v7925_v3, %v8678_v11  ;;  %v8838_v50 = vld [vmem:[#allocation66_spill] sm:$0xff]  ;;  %v3332_v42 = vpop.permute.xlu0 %3331 }
 0x605   : > { %4768 = vmatpush3.msra.mxu0 %v3212_v60  ;;  %v3223_v33 = vmax.f32 %v3161_v52, 0.0  ;;  %v3205_v63 = vmax.f32 %v3071_v41, 0.0  ;;  %v3219_v60 = vmax.f32 %v3141_v38, 0.0  ;;  %v3203_v20 = vmax.f32 %v3061_v51, 0.0 }
 0x606   : > { %4769 = vmatprep.subr.mxu0 %v3227_v5  ;;  %v8835_v5 = vld [vmem:[#allocation11_spill] sm:$0xff]  ;;  %v3202_v52 = vmax.f32 %v3056_v45, 0.0 }
 0x607   : > { %4770 = vmatpush3.msra.mxu0 %v3211_v1  ;;  %v3051_v30 = vadd.f32 %v8835_v5, %v8834_v39  ;;  %v8836_v1 = vld [vmem:[#allocation67_spill] sm:$0xff] }
 0x608   : > { %4771 = vmatprep.subr.mxu0 %v3226_v0  ;;  %v3126_v10 = vadd.f32 %v8837_v32, %v8836_v1  ;;  %v3218_v0 = vmax.f32 %v3136_v61, 0.0  ;;  %v3328_v38 = vpop.permute.xlu0 %3327 }
 0x609   : > { %4772 = vmatpush3.msra.mxu0 %v3210_v40  ;;  %v8839_v40 = vld [vmem:[#allocation63_spill] sm:$0xff] }
 0x60a   : > { %4773 = vmatprep.subr.mxu0 %v3225_v22  ;;  %v3046_v43 = vadd.f32 %v8839_v40, %v8838_v50  ;;  %v8840_v22 = vld [vmem:[#allocation69_spill] sm:$0xff]  ;;  %v3216_v31 = vmax.f32 %v3126_v10, 0.0  ;;  %v5619_v40 = vld [vmem:[%s8276_s1 + $0x18] sm:$0xff] }
 0x60b   : > { %4774 = vmatpush3.msra.mxu0 %v3209_v21  ;;  %v3121_v3 = vadd.f32 %v8841_v4, %v8840_v22  ;;  %v3217_v21 = vmax.f32 %v3131_v37, 0.0  ;;  %v5617_v10 = vld [vmem:[%s8276_s1 + $0x8] sm:$0xff]  ;;  %v5622_v4 = vld [vmem:[%s8276_s1 + $0x30] sm:$0xff] }
 0x60c   : > { %4775 = vmatprep.subr.mxu0 %v3224_v55  ;;  %v8843_v55 = vld [vmem:[#allocation62_spill] sm:$0xff]  ;;  %v3324_v51 = vpop.permute.xlu0 %3323 }
 0x60d   : > { %4776 = vmatpush3.msra.mxu0 %v3208_v16  ;;  %v3041_v57 = vadd.f32 %v8843_v55, %v8842_v49  ;;  %v3201_v16 = vmax.f32 %v3051_v30, 0.0  ;;  %v3215_v41 = vmax.f32 %v3121_v3, 0.0  ;;  %v5623_v3 = vld [vmem:[%s8276_s1 + $0x38] sm:$0xff]  ;;  %v5625_v55 = vld [vmem:[%s8276_s1 + $0x48] sm:$0xff] }
 0x60e   : > { %4777 = vmatprep.subr.mxu0 %v3223_v33  ;;  %v3200_v33 = vmax.f32 %v3046_v43, 0.0  ;;  %v5620_v43 = vld [vmem:[%s8276_s1 + $0x20] sm:$0xff] }
 0x60f   : > { %4778 = vmatpush3.msra.mxu0 %v3207_v17  ;;  %v3199_v17 = vmax.f32 %v3041_v57, 0.0  ;;  %v5626_v57 = vld [vmem:[%s8276_s1 + $0x50] sm:$0xff] }
 0x610   : > { %4779 = vmatprep.subr.mxu0 %v3222_v54  ;;  %v3330_v54 = vpop.permute.xlu1 %3329  ;;  %v3320_v61 = vpop.permute.xlu0 %3319 }
 0x611   : > { %4780 = vmatpush3.msra.mxu0 %v3206_v6  ;;  %v8845_v6 = vld [vmem:[#allocation34_spill] sm:$0xff] }
 0x612   : > { %4781 = vmatprep.subr.mxu0 %v3221_v48 }
 0x613   : > { %4782 = vmatpush3.msra.mxu0 %v3205_v63 }
 0x614   : > { %4783 = vmatprep.subr.mxu0 %v3220_v7  ;;  %v3326_v48 = vpop.permute.xlu1 %3325  ;;  %v3316_v45 = vpop.permute.xlu0 %3315 }
 0x615   : > { %4784 = vmatpush3.msra.mxu0 %v3204_v56 }
 0x616   : > { %4785 = vmatprep.subr.mxu0 %v3219_v60 }
 0x617   : > { %4786 = vmatpush3.msra.mxu0 %v3203_v20 }
 0x618   : > { %4787 = vmatprep.subr.mxu0 %v3218_v0  ;;  %v3322_v63 = vpop.permute.xlu1 %3321  ;;  %v3312_v37 = vpop.permute.xlu0 %3311  ;;  %v5618_v0 = vld [vmem:[%s8276_s1 + $0x10] sm:$0xff] }
 0x619   : > { %4788 = vmatpush3.msra.mxu0 %v3202_v52  ;;  %v5621_v52 = vld [vmem:[%s8276_s1 + $0x28] sm:$0xff] }
 0x61a   : > { %4789 = vmatprep.subr.mxu0 %v3217_v21  ;;  %v5624_v21 = vld [vmem:[%s8276_s1 + $0x40] sm:$0xff] }
 0x61b   : > { %4790 = vmatpush3.msra.mxu0 %v3201_v16  ;;  %v5627_v16 = vld [vmem:[%s8276_s1 + $0x58] sm:$0xff] }
 0x61c   : > { %4791 = vmatprep.subr.mxu0 %v3216_v31  ;;  %v3318_v7 = vpop.permute.xlu1 %3317  ;;  %v3308_v5 = vpop.permute.xlu0 %3307  ;;  %v5628_v31 = vld [vmem:[%s8276_s1 + $0x60] sm:$0xff] }
 0x61d   : > { %4792 = vmatpush3.msra.mxu0 %v3200_v33  ;;  %v5629_v33 = vld [vmem:[%s8276_s1 + $0x68] sm:$0xff] }
 0x61e   : > { %4793 = vmatprep.subr.mxu0 %v3215_v41  ;;  %v5630_v41 = vld [vmem:[%s8276_s1 + $0x70] sm:$0xff] }
 0x61f   : > { %4794 = vmatpush3.msra.mxu0 %v3199_v17  ;;  %v5631_v17 = vld [vmem:[%s8276_s1 + $0x78] sm:$0xff] }
 0x620   : > { %3296 = vmatmul.mubr.f32.vlgmr.msra.gmra.mxu0 %v8844_v15  ;;  %5441 = vmatprep.subr.msk.mxu0 %vm470_vm0, %v3332_v42  ;;  %v3314_v56 = vpop.permute.xlu1 %3313  ;;  %v3304_v20 = vpop.permute.xlu0 %3303 }
 0x621   : > { %5442 = vmatpush3.xpose.msk.msra.mxu0 %vm470_vm0, %v3332_v42  ;;  %5473 = vmatprep.mubr.msk.f32.mxu0 %vm470_vm0, %v8845_v6  ;;  %v5632_v42 = vld [vmem:[%s8276_s1 + $0x80] sm:$0xff]  ;;  %v5634_v6 = vld [vmem:[%s8276_s1 + $0x90] sm:$0xff] }
 0x622   : > { %5443 = vmatprep.subr.msk.mxu0 %vm470_vm0, %v3330_v54 }
 0x624   : > { %v3310_v60 = vpop.permute.xlu1 %3309 }
 0x625   : > { %5444 = vmatpush3.xpose.msk.msra.mxu0 %vm470_vm0, %v3330_v54  ;;  %v5633_v54 = vld [vmem:[%s8276_s1 + $0x88] sm:$0xff] }
 0x626   : > { %5445 = vmatprep.subr.msk.mxu0 %vm470_vm0, %v3328_v38 }
 0x628   : > { %v3306_v30 = vpop.permute.xlu1 %3305 }
 0x629   : > { %5446 = vmatpush3.xpose.msk.msra.mxu0 %vm470_vm0, %v3328_v38  ;;  %v5635_v38 = vld [vmem:[%s8276_s1 + $0x98] sm:$0xff] }
 0x62a   : > { %5447 = vmatprep.subr.msk.mxu0 %vm470_vm0, %v3326_v48 }
 0x62c   : > { %v3302_v32 = vpop.permute.xlu1 %3301 }
 0x62d   : > { %5448 = vmatpush3.xpose.msk.msra.mxu0 %vm470_vm0, %v3326_v48  ;;  %v5636_v48 = vld [vmem:[%s8276_s1 + $0xa0] sm:$0xff] }
 0x62e   : > { %5449 = vmatprep.subr.msk.mxu0 %vm470_vm0, %v3324_v51 }
 0x631   : > { %5450 = vmatpush3.xpose.msk.msra.mxu0 %vm470_vm0, %v3324_v51  ;;  %v5637_v51 = vld [vmem:[%s8276_s1 + $0xa8] sm:$0xff] }
 0x632   : > { %5451 = vmatprep.subr.msk.mxu0 %vm470_vm0, %v3322_v63 }
 0x635   : > { %5452 = vmatpush3.xpose.msk.msra.mxu0 %vm470_vm0, %v3322_v63  ;;  %v5638_v63 = vld [vmem:[%s8276_s1 + $0xb0] sm:$0xff] }
 0x636   : > { %5453 = vmatprep.subr.msk.mxu0 %vm470_vm0, %v3320_v61 }
 0x639   : > { %5454 = vmatpush3.xpose.msk.msra.mxu0 %vm470_vm0, %v3320_v61  ;;  %v5639_v61 = vld [vmem:[%s8276_s1 + $0xb8] sm:$0xff] }
 0x63a   : > { %5455 = vmatprep.subr.msk.mxu0 %vm470_vm0, %v3318_v7 }
 0x63d   : > { %5456 = vmatpush3.xpose.msk.msra.mxu0 %vm470_vm0, %v3318_v7  ;;  %v5640_v7 = vld [vmem:[%s8276_s1 + $0xc0] sm:$0xff] }
 0x63e   : > { %5457 = vmatprep.subr.msk.mxu0 %vm470_vm0, %v3316_v45 }
 0x641   : > { %5458 = vmatpush3.xpose.msk.msra.mxu0 %vm470_vm0, %v3316_v45  ;;  %v5641_v45 = vld [vmem:[%s8276_s1 + $0xc8] sm:$0xff] }
 0x642   : > { %5459 = vmatprep.subr.msk.mxu0 %vm470_vm0, %v3314_v56 }
 0x645   : > { %5460 = vmatpush3.xpose.msk.msra.mxu0 %vm470_vm0, %v3314_v56  ;;  %v5642_v56 = vld [vmem:[%s8276_s1 + $0xd0] sm:$0xff] }
 0x646   : > { %5461 = vmatprep.subr.msk.mxu0 %vm470_vm0, %v3312_v37 }
 0x649   : > { %5462 = vmatpush3.xpose.msk.msra.mxu0 %vm470_vm0, %v3312_v37  ;;  %v5643_v37 = vld [vmem:[%s8276_s1 + $0xd8] sm:$0xff] }
 0x64a   : > { %5463 = vmatprep.subr.msk.mxu0 %vm470_vm0, %v3310_v60 }
 0x64d   : > { %5464 = vmatpush3.xpose.msk.msra.mxu0 %vm470_vm0, %v3310_v60  ;;  %v5644_v60 = vld [vmem:[%s8276_s1 + $0xe0] sm:$0xff] }
 0x64e   : > { %5465 = vmatprep.subr.msk.mxu0 %vm470_vm0, %v3308_v5 }
 0x651   : > { %5466 = vmatpush3.xpose.msk.msra.mxu0 %vm470_vm0, %v3308_v5  ;;  %v5645_v5 = vld [vmem:[%s8276_s1 + $0xe8] sm:$0xff] }
 0x652   : > { %5467 = vmatprep.subr.msk.mxu0 %vm470_vm0, %v3306_v30 }
 0x655   : > { %5468 = vmatpush3.xpose.msk.msra.mxu0 %vm470_vm0, %v3306_v30  ;;  %v5646_v30 = vld [vmem:[%s8276_s1 + $0xf0] sm:$0xff] }
 0x656   : > { %5469 = vmatprep.subr.msk.mxu0 %vm470_vm0, %v3304_v20 }
 0x659   : > { %5470 = vmatpush3.xpose.msk.msra.mxu0 %vm470_vm0, %v3304_v20  ;;  %v5647_v20 = vld [vmem:[%s8276_s1 + $0xf8] sm:$0xff] }
 0x65a   : > { %5471 = vmatprep.subr.msk.mxu0 %vm470_vm0, %v3302_v32 }
 0x65d   : > { %5472 = vmatpush3.xpose.msk.msra.mxu0 %vm470_vm0, %v3302_v32 }
 0x660   : > { %5474 = vmatmul.mubr.msk.f32.vlgmr.msra.gmra.mxu0 %vm470_vm0, %v5617_v10 }
 0x661   : > { %5476 = vmatprep.mubr.msk.f32.mxu0 %vm470_vm0, %v5618_v0 }
 0x664   : > { %5477 = vmatmul.mubr.msk.f32.gmra.mxu0 %vm470_vm0, %v5619_v40  ;;  %v8846_v40 = vld [vmem:[#allocation33_spill] sm:$0xff] }
 0x665   : > { %5479 = vmatprep.mubr.msk.f32.mxu0 %vm470_vm0, %v5620_v43 }
 0x668   : > { %5480 = vmatmul.mubr.msk.f32.gmra.mxu0 %vm470_vm0, %v5621_v52  ;;  %v8848_v52 = vld [vmem:[#allocation40_spill] sm:$0xff] }
 0x669   : > { %5482 = vmatprep.mubr.msk.f32.mxu0 %vm470_vm0, %v5622_v4 }
 0x66c   : > { %5483 = vmatmul.mubr.msk.f32.gmra.mxu0 %vm470_vm0, %v5623_v3 }
 0x66d   : > { %5485 = vmatprep.mubr.msk.f32.mxu0 %vm470_vm0, %v5624_v21 }
 0x670   : > { %5486 = vmatmul.mubr.msk.f32.gmra.mxu0 %vm470_vm0, %v5625_v55 }
 0x671   : > { %5488 = vmatprep.mubr.msk.f32.mxu0 %vm470_vm0, %v5626_v57 }
 0x674   : > { %5489 = vmatmul.mubr.msk.f32.gmra.mxu0 %vm470_vm0, %v5627_v16 }
 0x675   : > { %5491 = vmatprep.mubr.msk.f32.mxu0 %vm470_vm0, %v5628_v31 }
 0x678   : > { %5492 = vmatmul.mubr.msk.f32.gmra.mxu0 %vm470_vm0, %v5629_v33 }
 0x679   : > { %5494 = vmatprep.mubr.msk.f32.mxu0 %vm470_vm0, %v5630_v41 }
 0x67c   : > { %5495 = vmatmul.mubr.msk.f32.gmra.mxu0 %vm470_vm0, %v5631_v17 }
 0x67d   : > { %5497 = vmatprep.mubr.msk.f32.mxu0 %vm470_vm0, %v5632_v42 }
 0x680   : > { %5498 = vmatmul.mubr.msk.f32.gmra.mxu0 %vm470_vm0, %v5633_v54 }
 0x681   : > { %5500 = vmatprep.mubr.msk.f32.mxu0 %vm470_vm0, %v5634_v6 }
 0x684   : > { %5501 = vmatmul.mubr.msk.f32.gmra.mxu0 %vm470_vm0, %v5635_v38 }
 0x685   : > { %5503 = vmatprep.mubr.msk.f32.mxu0 %vm470_vm0, %v5636_v48 }
 0x688   : > { %5504 = vmatmul.mubr.msk.f32.gmra.mxu0 %vm470_vm0, %v5637_v51 }
 0x689   : > { %5506 = vmatprep.mubr.msk.f32.mxu0 %vm470_vm0, %v5638_v63 }
 0x68c   : > { %5507 = vmatmul.mubr.msk.f32.gmra.mxu0 %vm470_vm0, %v5639_v61 }
 0x68d   : > { %5509 = vmatprep.mubr.msk.f32.mxu0 %vm470_vm0, %v5640_v7 }
 0x690   : > { %5510 = vmatmul.mubr.msk.f32.gmra.mxu0 %vm470_vm0, %v5641_v45 }
 0x691   : > { %5512 = vmatprep.mubr.msk.f32.mxu0 %vm470_vm0, %v5642_v56 }
 0x694   : > { %5513 = vmatmul.mubr.msk.f32.gmra.mxu0 %vm470_vm0, %v5643_v37 }
 0x695   : > { %5515 = vmatprep.mubr.msk.f32.mxu0 %vm470_vm0, %v5644_v60 }
 0x698   : > { %5516 = vmatmul.mubr.msk.f32.gmra.mxu0 %vm470_vm0, %v5645_v5 }
 0x699   : > { %5518 = vmatprep.mubr.msk.f32.mxu0 %vm470_vm0, %v5646_v30 }
 0x69c   : > { %5519 = vmatmul.mubr.msk.f32.gmra.mxu0 %vm470_vm0, %v5647_v20 }
 0x6a0   : > { %v4712_v32 = vpop.f32.mrf.mxu0 }
 0x6a2   : > { %v4713_v10 = vpop.f32.mrf.mxu0 }
 0x6a3   : > { %v4714_v0 = vadd.f32 %v4713_v10, %v4712_v32 }
 0x6a5   : > { %v8138_v43 = vadd.f32 %v4714_v0, %v8846_v40 }
 0x6a7   : > { %8847 = vst [vmem:[#allocation38_spill] sm:$0xff] %v8138_v43  ;;  %v3696_v4 = vmax.f32 %v8848_v52, %v8138_v43 }
 0x6e0   : > { %v4795_v3 = vpop.f32.mrf.mxu0 }
 0x6e2   : > { %v4796_v21 = vpop.f32.mrf.mxu0 }
 0x6e3   : > { %v4797_v55 = vadd.f32 %v4796_v21, %v4795_v3 }
 0x6e5   : > { %v8143_v57 = vadd.f32 %v4797_v55, %v8846_v40 }
 0x6e7   : > { %8849 = vst [vmem:[#allocation37_spill] sm:$0xff] %v8143_v57  ;;  %v8146_v16 = vmax.f32 %v3696_v4, %v8143_v57 }
 0x6e9   : > { %8850 = vst [vmem:[#allocation65_spill] sm:$0xff] %v8146_v16  ;;  %v8856_v16 = vld [vmem:[#allocation59_spill] sm:$0xff] }
 0x720   : > { %v8148_v31 = vpop.f32.mrf.mxu0 }
 0x721   : > { %8851 = vst [vmem:[#allocation14_spill] sm:$0xff] %v8148_v31 }
 0x722   : > { %v8150_v33 = vpop.f32.mrf.mxu0 }
 0x723   : > { %8852 = vst [vmem:[#allocation15_spill] sm:$0xff] %v8150_v33 }
 0x724   : > { %v8152_v41 = vpop.f32.mrf.mxu0 }
 0x726   : > { %v8154_v17 = vpop.f32.mrf.mxu0 }
 0x727   : > { %8853 = vst [vmem:[#allocation44_spill] sm:$0xff] %v8154_v17 }
 0x728   : > { %v8156_v42 = vpop.f32.mrf.mxu0 }
 0x72a   : > { %v8158_v54 = vpop.f32.mrf.mxu0 }
 0x72c   : > { %v8160_v6 = vpop.f32.mrf.mxu0 }
 0x72e   : > { %v8162_v38 = vpop.f32.mrf.mxu0 }
 0x730   : > { %v5487_v48 = vpop.f32.mrf.mxu0 }
 0x732   : > { %v3471_v51 = vpop.f32.mrf.mxu0 }
 0x734   : > { %v5490_v63 = vpop.f32.mrf.mxu0 }
 0x736   : > { %v3481_v61 = vpop.f32.mrf.mxu0 }
 0x738   : > { %v5493_v7 = vpop.f32.mrf.mxu0 }
 0x73a   : > { %v3491_v45 = vpop.f32.mrf.mxu0 }
 0x73c   : > { %v5496_v56 = vpop.f32.mrf.mxu0 }
 0x73d   : > { %v3507_v40 = vadd.f32 %v5496_v56, %v8856_v16  ;;  %v3492_v16 = vadd.f32 %v3491_v45, %v6335_v35 }
 0x73e   : > { %v3501_v37 = vpop.f32.mrf.mxu0 }
 0x73f   : > { %v3502_v49 = vadd.f32 %v3501_v37, %v8630_v47  ;;  %v3605_v1 = vmax.f32 %v3507_v40, 0.0  ;;  %v8861_v37 = vld [vmem:[#allocation66_spill] sm:$0xff] }
 0x740   : > { %v8164_v60 = vpop.f32.mrf.mxu0 }
 0x741   : > { %8854 = vst [vmem:[#allocation16_spill] sm:$0xff] %v8164_v60  ;;  %v3497_v60 = vadd.f32 %v5493_v7, %v6325_v27  ;;  %v3604_v56 = vmax.f32 %v3502_v49, 0.0 }
 0x742   : > { %v8166_v5 = vpop.f32.mrf.mxu0 }
 0x743   : > { %8855 = vst [vmem:[#allocation45_spill] sm:$0xff] %v8166_v5 }
 0x744   : > { %v8168_v30 = vpop.f32.mrf.mxu0 }
 0x746   : > { %v8170_v20 = vpop.f32.mrf.mxu0 }
 0x748   : > { %v5505_v32 = vpop.f32.mrf.mxu0  ;;  %v8860_v7 = vld [vmem:[#allocation16_spill] sm:$0xff] }
 0x74a   : > { %v8172_v10 = vpop.f32.mrf.mxu0 }
 0x74c   : > { %v5508_v0 = vpop.f32.mrf.mxu0 }
 0x74e   : > { %v3541_v52 = vpop.f32.mrf.mxu0 }
 0x750   : > { %v5511_v4 = vpop.f32.mrf.mxu0 }
 0x751   : > { %v3557_v35 = vadd.f32 %v5511_v4, %v6355_v28  ;;  %v3467_v28 = vadd.f32 %v8160_v6, %v6371_v19  ;;  %v3532_v19 = vadd.f32 %v8172_v10, %v8668_v12  ;;  %v3452_v6 = vadd.f32 %v8158_v54, %v8671_v26  ;;  %v8866_v10 = vld [vmem:[#allocation15_spill] sm:$0xff] }
 0x752   : > { %v3551_v3 = vpop.f32.mrf.mxu0  ;;  %v3522_v12 = vadd.f32 %v8170_v20, %v8678_v11 }
 0x753   : > { %v3615_v40 = vmax.f32 %v3557_v35, 0.0  ;;  %v3594_v54 = vmax.f32 %v3452_v6, 0.0  ;;  %v8871_v35 = vld [vmem:[#allocation43_spill] sm:$0xff] }
 0x754   : > { %v5514_v21 = vpop.f32.mrf.mxu0  ;;  %v3608_v20 = vmax.f32 %v3522_v12, 0.0 }
 0x756   : > { %v3561_v55 = vpop.f32.mrf.mxu0 }
 0x758   : > { %v5517_v57 = vpop.f32.mrf.mxu0 }
 0x759   : > { %v3577_v22 = vadd.f32 %v5517_v57, %v6327_v29  ;;  %v3487_v29 = vadd.f32 %v5490_v63, %v6343_v24  ;;  %v3552_v24 = vadd.f32 %v3551_v3, %v6365_v8  ;;  %v3462_v8 = vadd.f32 %v8162_v38, %v6377_v62  ;;  %v8858_v63 = vld [vmem:[#allocation44_spill] sm:$0xff] }
 0x75a   : > { %v3571_v43 = vpop.f32.mrf.mxu0 }
 0x75b   : > { %v3572_v17 = vadd.f32 %v3571_v43, %v6337_v46  ;;  %v3619_v47 = vmax.f32 %v3577_v22, 0.0  ;;  %v3482_v46 = vadd.f32 %v3481_v61, %v6347_v34  ;;  %v3547_v34 = vadd.f32 %v5508_v0, %v6373_v2  ;;  %v8859_v61 = vld [vmem:[#allocation67_spill] sm:$0xff] }
 0x75c   : > { %v5520_v15 = vpop.f32.mrf.mxu0  ;;  %v3614_v57 = vmax.f32 %v3552_v24, 0.0  ;;  %v3457_v2 = vadd.f32 %v8156_v42, %v6381_v59  ;;  %v3596_v62 = vmax.f32 %v3462_v8, 0.0  ;;  %v3447_v59 = vadd.f32 %v8152_v41, %v8675_v36  ;;  %v8873_v24 = vld [vmem:[#allocation39_spill] sm:$0xff] }
 0x75d   : > { %v3587_v33 = vadd.f32 %v5520_v15, %v8666_v25  ;;  %v3567_v25 = vadd.f32 %v5514_v21, %v6345_v23  ;;  %v3603_v15 = vmax.f32 %v3497_v60, 0.0  ;;  %v3618_v27 = vmax.f32 %v3572_v17, 0.0  ;;  %v8862_v60 = vld [vmem:[#allocation14_spill] sm:$0xff] }
 0x75e   : > { %v3581_v5 = vpop.f32.mrf.mxu0  ;;  %v3477_v23 = vadd.f32 %v5487_v48, %v6353_v14  ;;  %v3600_v22 = vmax.f32 %v3482_v46, 0.0  ;;  %v3542_v14 = vadd.f32 %v3541_v52, %v6379_v13  ;;  %v3597_v17 = vmax.f32 %v3467_v28, 0.0  ;;  %v8870_v46 = vld [vmem:[#allocation61_spill] sm:$0xff] }
 0x75f   : > { %v3621_v31 = vmax.f32 %v3587_v33, 0.0  ;;  %v3582_v50 = vadd.f32 %v3581_v5, %v8741_v53  ;;  %v3562_v53 = vadd.f32 %v3561_v55, %v6349_v18  ;;  %v3617_v49 = vmax.f32 %v3567_v25, 0.0  ;;  %v8863_v5 = vld [vmem:[#allocation69_spill] sm:$0xff] }
 0x760   : > { %v3472_v18 = vadd.f32 %v3471_v51, %v6363_v9  ;;  %v3599_v43 = vmax.f32 %v3477_v23, 0.0  ;;  %v3537_v9 = vadd.f32 %v5505_v32, %v6383_v58  ;;  %v3613_v33 = vmax.f32 %v3547_v34, 0.0  ;;  %v8857_v51 = vld [vmem:[#allocation64_spill] sm:$0xff]  ;;  %v8872_v23 = vld [vmem:[#allocation13_spill] sm:$0xff]  ;;  %v8875_v34 = vld [vmem:[#allocation38_spill] sm:$0xff] }
 0x761   : > { %v3620_v39 = vmax.f32 %v3582_v50, 0.0  ;;  %4846 = vmatprep.subr.mxu1 %v3621_v31  ;;  %v3602_v50 = vmax.f32 %v3492_v16, 0.0  ;;  %v3612_v13 = vmax.f32 %v3542_v14, 0.0  ;;  %v3527_v58 = vadd.f32 %v8168_v30, %v8673_v44  ;;  %v8864_v30 = vld [vmem:[#allocation45_spill] sm:$0xff]  ;;  %v8865_v32 = vld [vmem:[#allocation68_spill] sm:$0xff]  ;;  %v8867_v16 = vld [vmem:[#allocation55_spill] sm:$0xff] }
 0x762   : > { %4847 = vmatpush3.msra.mxu1 %v3605_v1  ;;  %v3601_v1 = vmax.f32 %v3487_v29, 0.0  ;;  %v3598_v31 = vmax.f32 %v3472_v18, 0.0  ;;  %v3611_v38 = vmax.f32 %v3537_v9, 0.0  ;;  %v3595_v42 = vmax.f32 %v3457_v2, 0.0  ;;  %v8868_v29 = vld [vmem:[#allocation33_spill] sm:$0xff] }
 0x763   : > { %4848 = vmatprep.subr.mxu1 %v3620_v39  ;;  %v3616_v39 = vmax.f32 %v3562_v53, 0.0  ;;  %v3610_v48 = vmax.f32 %v3532_v19, 0.0  ;;  %v3442_v26 = vadd.f32 %v8858_v63, %v8857_v51  ;;  %v3517_v44 = vadd.f32 %v8860_v7, %v8859_v61  ;;  %v8869_v53 = vld [vmem:[#allocation65_spill] sm:$0xff] }
 0x764   : > { %4849 = vmatpush3.msra.mxu1 %v3604_v56  ;;  %v3609_v45 = vmax.f32 %v3527_v58, 0.0  ;;  %v3437_v36 = vadd.f32 %v8862_v60, %v8861_v37  ;;  %v3593_v41 = vmax.f32 %v3447_v59, 0.0  ;;  %v3512_v11 = vadd.f32 %v8864_v30, %v8863_v5  ;;  %v8874_v18 = vld [vmem:[#allocation41_spill] sm:$0xff] }
 0x765   : > { %4850 = vmatprep.subr.mxu1 %v3619_v47  ;;  %v3432_v0 = vadd.f32 %v8866_v10, %v8865_v32  ;;  %v3592_v52 = vmax.f32 %v3442_v26, 0.0  ;;  %v3607_v4 = vmax.f32 %v3517_v44, 0.0  ;;  %v8876_v28 = vld [vmem:[#allocation37_spill] sm:$0xff] }
 0x766   : > { %4851 = vmatpush3.msra.mxu1 %v3603_v15  ;;  %v3591_v3 = vmax.f32 %v3437_v36, 0.0  ;;  %v3606_v21 = vmax.f32 %v3512_v11, 0.0 }
 0x767   : > { %4852 = vmatprep.subr.mxu1 %v3618_v27  ;;  %v3590_v55 = vmax.f32 %v3432_v0, 0.0 }
 0x768   : > { %4853 = vmatpush3.msra.mxu1 %v3602_v50 }
 0x769   : > { %4854 = vmatprep.subr.mxu1 %v3617_v49 }
 0x76a   : > { %4855 = vmatpush3.msra.mxu1 %v3601_v1 }
 0x76b   : > { %4856 = vmatprep.subr.mxu1 %v3616_v39 }
 0x76c   : > { %4857 = vmatpush3.msra.mxu1 %v3600_v22 }
 0x76d   : > { %4858 = vmatprep.subr.mxu1 %v3615_v40 }
 0x76e   : > { %4859 = vmatpush3.msra.mxu1 %v3599_v43 }
 0x76f   : > { %4860 = vmatprep.subr.mxu1 %v3614_v57 }
 0x770   : > { %4861 = vmatpush3.msra.mxu1 %v3598_v31 }
 0x771   : > { %4862 = vmatprep.subr.mxu1 %v3613_v33 }
 0x772   : > { %4863 = vmatpush3.msra.mxu1 %v3597_v17 }
 0x773   : > { %4864 = vmatprep.subr.mxu1 %v3612_v13 }
 0x774   : > { %4865 = vmatpush3.msra.mxu1 %v3596_v62 }
 0x775   : > { %4866 = vmatprep.subr.mxu1 %v3611_v38 }
 0x776   : > { %4867 = vmatpush3.msra.mxu1 %v3595_v42 }
 0x777   : > { %4868 = vmatprep.subr.mxu1 %v3610_v48 }
 0x778   : > { %4869 = vmatpush3.msra.mxu1 %v3594_v54 }
 0x779   : > { %4870 = vmatprep.subr.mxu1 %v3609_v45 }
 0x77a   : > { %4871 = vmatpush3.msra.mxu1 %v3593_v41 }
 0x77b   : > { %4872 = vmatprep.subr.mxu1 %v3608_v20 }
 0x77c   : > { %4873 = vmatpush3.msra.mxu1 %v3592_v52 }
 0x77d   : > { %4874 = vmatprep.subr.mxu1 %v3607_v4 }
 0x77e   : > { %4875 = vmatpush3.msra.mxu1 %v3591_v3 }
 0x77f   : > { %4876 = vmatprep.subr.mxu1 %v3606_v21 }
 0x780   : > { %4877 = vmatpush3.msra.mxu1 %v3590_v55 }
 0x781   : > { %3687 = vmatmul.mubr.f32.vlgmr.msra.gmra.mxu1 %v8867_v16 }
 0x841   : > { %v4878_v56 = vpop.f32.mrf.mxu1 }
 0x843   : > { %v4879_v25 = vpop.f32.mrf.mxu1 }
 0x844   : > { %v4880_v47 = vadd.f32 %v4879_v25, %v4878_v56 }
 0x846   : > { %v3689_v15 = vadd.f32 %v4880_v47, %v8868_v29 }
 0x848   : > { %v3698_v27 = vmax.f32 %v8869_v53, %v3689_v15 }
 0x84a   : > { %v3699_v50 = vsub.f32 %v8870_v46, %v3698_v27  ;;  %v3702_v49 = vsub.f32 %v8871_v35, %v3698_v27  ;;  %v3705_v1 = vsub.f32 %v8872_v23, %v3698_v27  ;;  %v3708_v39 = vsub.f32 %v8873_v24, %v3698_v27 }
 0x84b   : > { %v3711_v22 = vsub.f32 %v8874_v18, %v3698_v27  ;;  %v3714_v40 = vsub.f32 %v8875_v34, %v3698_v27  ;;  %v3717_v43 = vsub.f32 %v8876_v28, %v3698_v27  ;;  %v3720_v2 = vsub.f32 %v3689_v15, %v3698_v27 }
 0x84c   : > { %v3700_v14 = vmul.f32 1.442695, %v3699_v50  ;;  %v3703_v57 = vmul.f32 1.442695, %v3702_v49  ;;  %v3706_v8 = vmul.f32 1.442695, %v3705_v1 }
 0x84d   : > { %v3709_v31 = vmul.f32 1.442695, %v3708_v39  ;;  %v3712_v9 = vmul.f32 1.442695, %v3711_v22  ;;  %v3715_v33 = vmul.f32 1.442695, %v3714_v40 }
 0x84e   : > { %5566 = vpow2.f32 %v3700_v14  ;;  %v3718_v17 = vmul.f32 1.442695, %v3717_v43  ;;  %v3721_v19 = vmul.f32 1.442695, %v3720_v2 }
 0x84f   : > { %5568 = vpow2.f32 %v3703_v57 }
 0x850   : > { %5570 = vpow2.f32 %v3706_v8 }
 0x851   : > { %5572 = vpow2.f32 %v3709_v31 }
 0x852   : > { %5574 = vpow2.f32 %v3712_v9 }
 0x853   : > { %5576 = vpow2.f32 %v3715_v33 }
 0x854   : > { %5578 = vpow2.f32 %v3718_v17 }
 0x855   : > { %5580 = vpow2.f32 %v3721_v19 }
 0x85b   : > { %v5567_v13 = vpop.eup %5566 }
 0x85c   : > { %v5569_v6 = vpop.eup %5568 }
 0x85d   : > { %v3723_v62 = vadd.f32 %v5569_v6, %v5567_v13  ;;  %v5571_v58 = vpop.eup %5570 }
 0x85e   : > { %v5573_v59 = vpop.eup %5572 }
 0x85f   : > { %v3724_v38 = vadd.f32 %v5571_v58, %v3723_v62  ;;  %v5575_v12 = vpop.eup %5574 }
 0x860   : > { %v5577_v51 = vpop.eup %5576 }
 0x861   : > { %v3725_v42 = vadd.f32 %v5573_v59, %v3724_v38  ;;  %v5579_v26 = vpop.eup %5578 }
 0x862   : > { %v5581_v61 = vpop.eup %5580 }
 0x863   : > { %v3726_v48 = vadd.f32 %v5575_v12, %v3725_v42 }
 0x865   : > { %v3727_v63 = vadd.f32 %v5577_v51, %v3726_v48 }
 0x867   : > { %v3728_v54 = vadd.f32 %v5579_v26, %v3727_v63 }
 0x869   : > { %v3729_v7 = vadd.f32 %v5581_v61, %v3728_v54 }
 0x86b   : > { %5582 = vrcp.f32 %v3729_v7 }
 0x878   : > { %v5583_v44 = vpop.eup %5582 }
 0x879   : > { %v3745_v45 = vmul.f32 %v5583_v44, %v5581_v61  ;;  %v3731_v37 = vmul.f32 %v5583_v44, %v5567_v13  ;;  %v3733_v60 = vmul.f32 %v5583_v44, %v5569_v6  ;;  %v3735_v36 = vmul.f32 %v5583_v44, %v5571_v58 }
 0x87a   : > { %v3737_v41 = vmul.f32 %v5583_v44, %v5573_v59  ;;  %v3739_v5 = vmul.f32 %v5583_v44, %v5575_v12  ;;  %v3741_v30 = vmul.f32 %v5583_v44, %v5577_v51  ;;  %v3743_v11 = vmul.f32 %v5583_v44, %v5579_v26 }
 0x87b   : > { %3746 = vst [vmem:[%s221_s15 + $0x7] sm:$0x1] %v3745_v45  ;;  %3732 = vst [vmem:[%s221_s15] sm:$0x1] %v3731_v37 }
 0x87c   : > { %3734 = vst [vmem:[%s221_s15 + $0x1] sm:$0x1] %v3733_v60  ;;  %3736 = vst [vmem:[%s221_s15 + $0x2] sm:$0x1] %v3735_v36 }
 0x87d   : > { %3738 = vst [vmem:[%s221_s15 + $0x3] sm:$0x1] %v3737_v41  ;;  %3740 = vst [vmem:[%s221_s15 + $0x4] sm:$0x1] %v3739_v5 }
 0x87e   : > { %3742 = vst [vmem:[%s221_s15 + $0x5] sm:$0x1] %v3741_v30  ;;  %3744 = vst [vmem:[%s221_s15 + $0x6] sm:$0x1] %v3743_v11 }
 0x87f   : > { %5661 = shalt.err (!%p5658_p3)
}
 0x880   : > { %s5662_s6 = scalar_lea.hbm %s8234_s24, 128  ;;  %s5666_s10 = scalar_lea.hbm %s8280_s5, 256 }
 0x881   : > { %p5663_p4 = scmp.ne.s32.totalorder %s8234_s24, %s5662_s6  ;;  %p5667_p9 = scmp.lt.s32.totalorder %s8234_s24, %s8280_s5 }
 0x882   : > { %p5668_p10 = scmp.lt.s32.totalorder %s5666_s10, %s5662_s6 }
 0x883   : > { %p5664_p7 = pnand %p5663_p4, %p5786_p5 }
 0x884   : > { %p5669_p11 = por %p5668_p10, %p5667_p9 }
 0x885   : > { %p5665_p8 = pneg %p5664_p7 }
 0x887   : > { %p5670_p12 = pnand %p5669_p11, %p5665_p8 }
 0x889   : > { %5673 = shalt.err (!%p5670_p12)
}
 0x88a   : > { %5521 = dma.vmem_to_hbm [thread:$0]  (%p5786_p5), %s8236_s17, 128, %s8234_s24, %s3748_s4  }
 0x88b PF: > { %p5527_p13 = scmp.ge.s32.totalorder %s5708_s23, 2  ;;  %s3773_s13 = sand.u32 1, %s5696_s20  }
 0x88c   : > { %s3774_s14 = scalar_lea.sflag [#allocation4], %s3773_s13 }
 0x88d   : > { %p5524_p0 = pnand %p5527_p13, %p5790_p6 }
 0x88f   : > { %p5525_p1 = pneg %p5524_p0 }
 0x891   : > { %5691 = dma.done.wait (%p5525_p1), %s3774_s14, 128  }
 0x892   : > { %5693 = vsyncadd (%p5525_p1), %s3774_s14, 4294967168  ;;  %p16_p2 = scmp.ge.s32.totalorder %s5773_s25, 4   ;;  %s8877_s20 = smov %s5700_s21 }
 0x893   : > { %s8878_s21 = smov %s5704_s22  ;;  %s8879_s22 = smov %s5784_s28 }
 0x894   : > { %s8880_s23 = smov %s5773_s25  ;;  %18 = sbr.rel (!%p16_p2) target bundleno = 5 (0x5), region = 75 }
 0x899   :  { %3779 = vsyncpa [#allocation4], 1 }
 0x89a   :  { %3781 = vsyncpa [#allocation4 + $0x1], 1 }

</bundles_post_ra>
